<compile_context>
chip_gen: v7x
topology: tpu7x:2x2x1
jax: 0.10.0
libtpu: 0.0.40
codegen_flags: <defaults>
</compile_context>

<pallas_src>
import math
import functools

import jax
import jax.numpy as jnp
from jax.experimental import pallas as pl
from jax.experimental.pallas import tpu as pltpu


LANE = 128
CONV_OFFSETS = (-2, -1, 0, 1, 2)   # tap offsets of the packed 5-tap conv bank


def _round_up(x, m):
    return ((x + m - 1) // m) * m


# ----------------------------- fused kernel -------------------------------- #

def make_fused_kernel(*, M, input_dim, E, Ep, nhead, num_layers):
    """M = B_blk*S rows stacked per grid step. E = real width, Ep = lane-padded width."""
    dhp = Ep // nhead            # lane-aligned per-head slab (real head dim dh <= dhp)
    inv_E = 1.0 / float(E)

    def layernorm(x, g, b):
        # Mean/var over the E real features only (padded lanes of x are zero by
        # construction); gamma/beta are zero-padded so output pads stay zero.
        mu = jnp.sum(x, axis=-1, keepdims=True) * inv_E
        var = jnp.sum(x * x, axis=-1, keepdims=True) * inv_E - mu * mu
        return (x - mu) * jax.lax.rsqrt(var + 1e-5) * g + b

    def mha(q, k, v, mask):
        """q: (Mq, Ep) f32 (scale folded into Wq), k/v: (Mk, Ep) f32.
        mask: additive bias (Mq, Mk) keeping attention block-diagonal per sequence."""
        q16 = q.astype(jnp.bfloat16)
        k16 = k.astype(jnp.bfloat16)
        v16 = v.astype(jnp.bfloat16)
        outs = []
        for h in range(nhead):
            sl = slice(h * dhp, (h + 1) * dhp)        # 32-lane aligned head slab
            s = jax.lax.dot_general(q16[:, sl], k16[:, sl],
                                    (((1,), (1,)), ((), ())),
                                    preferred_element_type=jnp.float32)
            s = s + mask
            m = jnp.max(s, axis=-1, keepdims=True)
            p = jnp.exp(s - m)
            inv = pl.reciprocal(jnp.sum(p, axis=-1, keepdims=True), approx=True)
            outs.append(jnp.dot(p.astype(jnp.bfloat16), v16[:, sl],
                                preferred_element_type=jnp.float32) * inv)
        # 4 x 32-lane aligned pieces -> one 128-lane slab (padded lanes remain zero).
        return jnp.concatenate(outs, axis=-1)

    def kernel(src_ref, pe_ref, conv_mask_ref, enc_mask_ref, fin_mask_ref,
               last_sel_ref,
               emb_w_ref, emb_b_ref, conv_w_ref, conv_b_ref,
               lqkv_w_ref, lqkv_b_ref, lout_w_ref, lout_b_ref,
               lff1_w_ref, lff1_b_ref, lff2_w_ref, lff2_b_ref,
               lg1_ref, lb1_ref, lg2_ref, lb2_ref,
               fq_w_ref, fq_b_ref, fkv_w_ref, fkv_b_ref,
               fout_w_ref, fout_b_ref,
               fc1_w_ref, fc1_b_ref, fc2_w_ref, fc2_b_ref,
               out_ref):
        # ---- embedding + positional encoding (all B_blk sequences row-stacked) ----
        src = src_ref[...].reshape(M, input_dim)
        x = jnp.dot(src.astype(jnp.bfloat16), emb_w_ref[...],
                    preferred_element_type=jnp.float32) + emb_b_ref[...]
        x = x + pe_ref[...]                                      # (M, d_model) f32

        # ---- fused 'same' Conv1d bank (k=1,3,5) as ONE im2col matmul --------------
        pieces = []
        for o in CONV_OFFSETS:
            if o == 0:
                pieces.append(x)
            else:
                pieces.append(pltpu.roll(x, (-o) % M, axis=0))   # row t <- x[t + o]
        # conv_mask zeroes rows that crossed a sequence edge (and the cyclic wrap).
        x_im = jnp.concatenate(pieces, axis=-1) * conv_mask_ref[...]   # (M, 5*d_model)
        x = jnp.dot(x_im.astype(jnp.bfloat16), conv_w_ref[...],
                    preferred_element_type=jnp.float32) + conv_b_ref[...]  # (M, Ep)

        enc_mask = enc_mask_ref[...]

        # ---- transformer encoder stack (post-norm, ReLU, dropout = identity) ------
        for l in range(num_layers):
            qkv = jnp.dot(x.astype(jnp.bfloat16), lqkv_w_ref[l],
                          preferred_element_type=jnp.float32) + lqkv_b_ref[l]
            a = mha(qkv[:, 0:Ep], qkv[:, Ep:2 * Ep], qkv[:, 2 * Ep:3 * Ep], enc_mask)
            a = jnp.dot(a.astype(jnp.bfloat16), lout_w_ref[l],
                        preferred_element_type=jnp.float32) + lout_b_ref[l]
            x = layernorm(x + a, lg1_ref[l], lb1_ref[l])
            h = jnp.dot(x.astype(jnp.bfloat16), lff1_w_ref[l],
                        preferred_element_type=jnp.float32) + lff1_b_ref[l]
            h = jnp.maximum(h, 0.0)
            y = jnp.dot(h.astype(jnp.bfloat16), lff2_w_ref[l],
                        preferred_element_type=jnp.float32) + lff2_b_ref[l]
            x = layernorm(x + y, lg2_ref[l], lb2_ref[l])

        # ---- final MultiheadAttention: only the last row of each sequence ---------
        x_last = jnp.dot(last_sel_ref[...], x,
                         preferred_element_type=jnp.float32)     # (B_blk, Ep)
        q = jnp.dot(x_last.astype(jnp.bfloat16), fq_w_ref[...],
                    preferred_element_type=jnp.float32) + fq_b_ref[...]
        kv = jnp.dot(x.astype(jnp.bfloat16), fkv_w_ref[...],
                     preferred_element_type=jnp.float32) + fkv_b_ref[...]
        a = mha(q, kv[:, 0:Ep], kv[:, Ep:2 * Ep], fin_mask_ref[...])
        a = jnp.dot(a.astype(jnp.bfloat16), fout_w_ref[...],
                    preferred_element_type=jnp.float32) + fout_b_ref[...]

        # ---- head: LeakyReLU(fc1) -> (dropout = identity) -> fc2 ------------------
        # TODO(synk): nn.Dropout has no deterministic kernel equivalent; identity (eval).
        h = jnp.dot(a.astype(jnp.bfloat16), fc1_w_ref[...],
                    preferred_element_type=jnp.float32) + fc1_b_ref[...]
        h = jnp.where(h >= 0.0, h, 0.01 * h)                      # LeakyReLU(0.01)
        out = jnp.dot(h.astype(jnp.bfloat16), fc2_w_ref[...],
                      preferred_element_type=jnp.float32) + fc2_b_ref[...]
        out_ref[...] = out                                        # (B_blk, 1)

    return kernel


# ------------------------------ wrapper ------------------------------------ #

def _pick_block_b(B, S, target_rows):
    """Largest divisor of B such that block_b*S <= target_rows (>=1)."""
    bb = max(1, min(B, max(1, target_rows // max(S, 1))))
    while B % bb != 0:
        bb -= 1
    return bb


def transformer_forward(src, p, *, nhead, target_rows=256):
    # target_rows=256 matches the v6e/v7x MXU height; use 128 on v5e.
    B, S, input_dim = src.shape
    d_model = p["emb_w"].shape[1]
    E = 3 * d_model
    Ep = p["lyr_qkv_w"].shape[1]
    num_layers = p["lyr_qkv_w"].shape[0]

    block_b = _pick_block_b(B, S, target_rows)
    n_blocks = B // block_b
    M = block_b * S

    # ---- host-side constants (computed outside the kernel, folded by XLA) --------
    pe_t = jnp.tile(p["pe"][:S], (block_b, 1)).astype(jnp.float32)        # (M, d_model)

    pos = jnp.arange(M) % S
    conv_mask = jnp.concatenate(
        [jnp.repeat(((pos + o >= 0) & (pos + o < S)).astype(jnp.float32)[:, None],
                    d_model, axis=1) for o in CONV_OFFSETS], axis=1)      # (M, 5*d_model)

    seq_id = jnp.arange(M) // S
    enc_mask = jnp.where(seq_id[:, None] == seq_id[None, :],
                         0.0, -1e30).astype(jnp.float32)                  # (M, M)
    fin_mask = jnp.where(jnp.arange(block_b)[:, None] == seq_id[None, :],
                         0.0, -1e30).astype(jnp.float32)                  # (B_blk, M)
    last_sel = jnp.zeros((block_b, M), jnp.float32).at[
        jnp.arange(block_b), jnp.arange(block_b) * S + (S - 1)].set(1.0)  # (B_blk, M)

    inputs = [src, pe_t, conv_mask, enc_mask, fin_mask, last_sel,
              p["emb_w"], p["emb_b"], p["conv_w"], p["conv_b"],
              p["lyr_qkv_w"], p["lyr_qkv_b"], p["lyr_out_w"], p["lyr_out_b"],
              p["lyr_ff1_w"], p["lyr_ff1_b"], p["lyr_ff2_w"], p["lyr_ff2_b"],
              p["lyr_ln1_g"], p["lyr_ln1_b"], p["lyr_ln2_g"], p["lyr_ln2_b"],
              p["fq_w"], p["fq_b"], p["fkv_w"], p["fkv_b"],
              p["fout_w"], p["fout_b"],
              p["fc1_w"], p["fc1_b"], p["fc2_w"], p["fc2_b"]]

    def _rep(arr):
        nd = arr.ndim
        return pl.BlockSpec(arr.shape, lambda i, _nd=nd: (0,) * _nd)

    in_specs = [pl.BlockSpec((block_b, S, input_dim), lambda i: (i, 0, 0))]
    in_specs += [_rep(a) for a in inputs[1:]]

    kernel = make_fused_kernel(M=M, input_dim=input_dim, E=E, Ep=Ep,
                               nhead=nhead, num_layers=num_layers)

    out = pl.pallas_call(
        kernel,
        out_shape=jax.ShapeDtypeStruct((B, 1), jnp.float32),
        grid=(n_blocks,),
        in_specs=in_specs,
        out_specs=pl.BlockSpec((block_b, 1), lambda i: (i, 0)),
        compiler_params=pltpu.CompilerParams(dimension_semantics=("parallel",)),
    )(*inputs)
    return out


# ------------------------------ parameters --------------------------------- #

def make_positional_encoding(seq_length, d_model):
    pos = jnp.arange(seq_length, dtype=jnp.float32)[:, None]
    div = jnp.exp(jnp.arange(0, d_model, 2, dtype=jnp.float32)
                  * (-math.log(10000.0) / d_model))
    pe = jnp.zeros((seq_length, d_model), jnp.float32)
    pe = pe.at[:, 0::2].set(jnp.sin(pos * div))
    pe = pe.at[:, 1::2].set(jnp.cos(pos * div))
    return pe


def init_params(key, input_dim, d_model, nhead, num_layers, dim_ff, seq_length):
    """Parameters in PyTorch layout (as they live in the nn.Module)."""
    E = 3 * d_model
    keys = iter(jax.random.split(key, 256))

    def w(shape, scale=0.05):
        return (scale * jax.random.normal(next(keys), shape)).astype(jnp.float32)

    params = {
        "emb_w": w((d_model, input_dim)), "emb_b": w((d_model,)),
        "pe": make_positional_encoding(seq_length, d_model),
        "conv1_w": w((d_model, d_model, 1)), "conv1_b": w((d_model,)),
        "conv3_w": w((d_model, d_model, 3)), "conv3_b": w((d_model,)),
        "conv5_w": w((d_model, d_model, 5)), "conv5_b": w((d_model,)),
        "fattn_in_w": w((3 * E, E)), "fattn_in_b": w((3 * E,)),
        "fattn_out_w": w((E, E)), "fattn_out_b": w((E,)),
        "fc1_w": w((d_model, E)), "fc1_b": w((d_model,)),
        "fc2_w": w((1, d_model)), "fc2_b": w((1,)),
        "layers": [],
    }
    for _ in range(num_layers):
        params["layers"].append({
            "attn_in_w": w((3 * E, E)), "attn_in_b": w((3 * E,)),
            "attn_out_w": w((E, E)), "attn_out_b": w((E,)),
            "ff1_w": w((dim_ff, E)), "ff1_b": w((dim_ff,)),
            "ff2_w": w((E, dim_ff)), "ff2_b": w((E,)),
            "ln1_g": jnp.ones((E,), jnp.float32), "ln1_b": jnp.zeros((E,), jnp.float32),
            "ln2_g": jnp.ones((E,), jnp.float32), "ln2_b": jnp.zeros((E,), jnp.float32),
        })
    return params


def preprocess_params(raw, d_model, nhead, dim_ff):
    """One-time repack: transpose, lane-pad (E->128, dh->32, dim_ff->128), fold the
    attention scale into Wq, pack the conv bank for im2col, cast matmul weights bf16."""
    E = 3 * d_model
    Ep = _round_up(E, LANE)
    Fp = _round_up(dim_ff, LANE)
    Dp = _round_up(d_model, LANE)
    assert Ep % nhead == 0
    dh = E // nhead
    dhp = Ep // nhead
    assert dhp >= dh
    scale = 1.0 / math.sqrt(dh)
    f32, bf16 = jnp.float32, jnp.bfloat16

    def pad_vec(v, n):
        return jnp.zeros((1, n), f32).at[0, :v.shape[0]].set(v)

    def pack_in_proj_part(Wp, bp, do_scale):
        # Wp: (E, E) torch (out, in). Head h lands at lane-aligned cols [h*dhp, h*dhp+dh).
        w = jnp.zeros((Ep, Ep), f32)
        b = jnp.zeros((Ep,), f32)
        Wt = Wp.T
        for h in range(nhead):
            w = w.at[:E, h * dhp:h * dhp + dh].set(Wt[:, h * dh:(h + 1) * dh])
            b = b.at[h * dhp:h * dhp + dh].set(bp[h * dh:(h + 1) * dh])
        if do_scale:
            w, b = w * scale, b * scale
        return w, b

    def pack_out_proj(Wo, bo):
        w = jnp.zeros((Ep, Ep), f32)
        Wt = Wo.T
        for h in range(nhead):
            w = w.at[h * dhp:h * dhp + dh, :E].set(Wt[h * dh:(h + 1) * dh, :])
        return w, pad_vec(bo, Ep)

    def pack_linear(W, b, in_real, in_pad, out_real, out_pad):
        w = jnp.zeros((in_pad, out_pad), f32).at[:in_real, :out_real].set(W.T)
        return w, pad_vec(b, out_pad)

    def pack_mha(in_w, in_b, out_w, out_b):
        ws, bs = [], []
        for pidx in range(3):  # q, k, v
            w_, b_ = pack_in_proj_part(in_w[pidx * E:(pidx + 1) * E, :],
                                       in_b[pidx * E:(pidx + 1) * E],
                                       do_scale=(pidx == 0))
            ws.append(w_); bs.append(b_)
        ow, ob = pack_out_proj(out_w, out_b)
        return ws, bs, ow, ob

    # ---- conv bank: (5*d_model, Ep), tap j holds offset (j-2) weights -------------
    conv_w = jnp.zeros((5 * d_model, Ep), f32)
    conv_w = conv_w.at[2 * d_model:3 * d_model, 0:d_model].set(raw["conv1_w"][:, :, 0].T)
    for j in range(3):
        r = (j + 1) * d_model
        conv_w = conv_w.at[r:r + d_model, d_model:2 * d_model].set(raw["conv3_w"][:, :, j].T)
    for j in range(5):
        r = j * d_model
        conv_w = conv_w.at[r:r + d_model, 2 * d_model:3 * d_model].set(raw["conv5_w"][:, :, j].T)
    conv_b = pad_vec(jnp.concatenate([raw["conv1_b"], raw["conv3_b"], raw["conv5_b"]]), Ep)

    # ---- encoder layers ------------------------------------------------------------
    lqkv_w, lqkv_b, lout_w, lout_b = [], [], [], []
    lff1_w, lff1_b, lff2_w, lff2_b = [], [], [], []
    lg1, lb1, lg2, lb2 = [], [], [], []
    for lp in raw["layers"]:
        ws, bs, ow, ob = pack_mha(lp["attn_in_w"], lp["attn_in_b"],
                                  lp["attn_out_w"], lp["attn_out_b"])
        lqkv_w.append(jnp.concatenate(ws, axis=1))
        lqkv_b.append(jnp.concatenate(bs)[None, :])
        lout_w.append(ow); lout_b.append(ob)
        w_, b_ = pack_linear(lp["ff1_w"], lp["ff1_b"], E, Ep, dim_ff, Fp)
        lff1_w.append(w_); lff1_b.append(b_)
        w_, b_ = pack_linear(lp["ff2_w"], lp["ff2_b"], dim_ff, Fp, E, Ep)
        lff2_w.append(w_); lff2_b.append(b_)
        lg1.append(pad_vec(lp["ln1_g"], Ep)); lb1.append(pad_vec(lp["ln1_b"], Ep))
        lg2.append(pad_vec(lp["ln2_g"], Ep)); lb2.append(pad_vec(lp["ln2_b"], Ep))

    # ---- final attention + head ----------------------------------------------------
    ws, bs, fow, fob = pack_mha(raw["fattn_in_w"], raw["fattn_in_b"],
                                raw["fattn_out_w"], raw["fattn_out_b"])
    fq_w, fq_b = ws[0], bs[0][None, :]
    fkv_w = jnp.concatenate(ws[1:], axis=1)
    fkv_b = jnp.concatenate(bs[1:])[None, :]
    fc1_w, fc1_b = pack_linear(raw["fc1_w"], raw["fc1_b"], E, Ep, d_model, Dp)
    fc2_w, fc2_b = pack_linear(raw["fc2_w"], raw["fc2_b"], d_model, Dp, 1, 1)

    return {
        "pe": raw["pe"].astype(f32),
        "emb_w": raw["emb_w"].T.astype(bf16), "emb_b": raw["emb_b"][None, :].astype(f32),
        "conv_w": conv_w.astype(bf16), "conv_b": conv_b,
        "lyr_qkv_w": jnp.stack(lqkv_w).astype(bf16), "lyr_qkv_b": jnp.stack(lqkv_b),
        "lyr_out_w": jnp.stack(lout_w).astype(bf16), "lyr_out_b": jnp.stack(lout_b),
        "lyr_ff1_w": jnp.stack(lff1_w).astype(bf16), "lyr_ff1_b": jnp.stack(lff1_b),
        "lyr_ff2_w": jnp.stack(lff2_w).astype(bf16), "lyr_ff2_b": jnp.stack(lff2_b),
        "lyr_ln1_g": jnp.stack(lg1), "lyr_ln1_b": jnp.stack(lb1),
        "lyr_ln2_g": jnp.stack(lg2), "lyr_ln2_b": jnp.stack(lb2),
        "fq_w": fq_w.astype(bf16), "fq_b": fq_b,
        "fkv_w": fkv_w.astype(bf16), "fkv_b": fkv_b,
        "fout_w": fow.astype(bf16), "fout_b": fob,
        "fc1_w": fc1_w.astype(bf16), "fc1_b": fc1_b,
        "fc2_w": fc2_w.astype(bf16), "fc2_b": fc2_b,
    }


# --------------------------------- main ------------------------------------ #

if __name__ == "__main__":
    INPUT_DIM = 8
    D_MODEL = 32
    NHEAD = 4
    NUM_LAYERS = 2
    DIM_FF = 64
    SEQ_LEN = 8
    BATCH = 2

    key = jax.random.PRNGKey(0)
    k_in, k_par = jax.random.split(key)
    src = jax.random.normal(k_in, (BATCH, SEQ_LEN, INPUT_DIM), dtype=jnp.float32)

    raw_params = init_params(k_par, INPUT_DIM, D_MODEL, NHEAD, NUM_LAYERS,
                             DIM_FF, SEQ_LEN)
    params = preprocess_params(raw_params, D_MODEL, NHEAD, DIM_FF)  # one-time repack

    fwd = jax.jit(functools.partial(transformer_forward, nhead=NHEAD))
    out = jax.block_until_ready(fwd(src, params))

    assert out.shape == (BATCH, 1), out.shape
    assert bool(jnp.all(jnp.isfinite(out)))
    print("KERNEL_OK")
</pallas_src>

<mosaic_0001>
module attributes {stable_mosaic.version = 11 : i64} {
  func.func @kernel(%arg0: i32, %arg1: memref<2x8x8xf32, #tpu.memory_space<vmem>>, %arg2: memref<16x32xf32, #tpu.memory_space<vmem>>, %arg3: memref<16x160xf32, #tpu.memory_space<vmem>>, %arg4: memref<16x16xf32, #tpu.memory_space<vmem>>, %arg5: memref<2x16xf32, #tpu.memory_space<vmem>>, %arg6: memref<2x16xf32, #tpu.memory_space<vmem>>, %arg7: memref<8x32xbf16, #tpu.memory_space<vmem>>, %arg8: memref<1x32xf32, #tpu.memory_space<vmem>>, %arg9: memref<160x128xbf16, #tpu.memory_space<vmem>>, %arg10: memref<1x128xf32, #tpu.memory_space<vmem>>, %arg11: memref<2x128x384xbf16, #tpu.memory_space<vmem>>, %arg12: memref<2x1x384xf32, #tpu.memory_space<vmem>>, %arg13: memref<2x128x128xbf16, #tpu.memory_space<vmem>>, %arg14: memref<2x1x128xf32, #tpu.memory_space<vmem>>, %arg15: memref<2x128x128xbf16, #tpu.memory_space<vmem>>, %arg16: memref<2x1x128xf32, #tpu.memory_space<vmem>>, %arg17: memref<2x128x128xbf16, #tpu.memory_space<vmem>>, %arg18: memref<2x1x128xf32, #tpu.memory_space<vmem>>, %arg19: memref<2x1x128xf32, #tpu.memory_space<vmem>>, %arg20: memref<2x1x128xf32, #tpu.memory_space<vmem>>, %arg21: memref<2x1x128xf32, #tpu.memory_space<vmem>>, %arg22: memref<2x1x128xf32, #tpu.memory_space<vmem>>, %arg23: memref<128x128xbf16, #tpu.memory_space<vmem>>, %arg24: memref<1x128xf32, #tpu.memory_space<vmem>>, %arg25: memref<128x256xbf16, #tpu.memory_space<vmem>>, %arg26: memref<1x256xf32, #tpu.memory_space<vmem>>, %arg27: memref<128x128xbf16, #tpu.memory_space<vmem>>, %arg28: memref<1x128xf32, #tpu.memory_space<vmem>>, %arg29: memref<128x128xbf16, #tpu.memory_space<vmem>>, %arg30: memref<1x128xf32, #tpu.memory_space<vmem>>, %arg31: memref<128x1xbf16, #tpu.memory_space<vmem>>, %arg32: memref<1x1xf32, #tpu.memory_space<vmem>>, %arg33: memref<2x1xf32, #tpu.memory_space<vmem>>) attributes {dimension_semantics = [#tpu.dimension_semantics<parallel>], iteration_bounds = array<i64: 1>, scalar_prefetch = 0 : i64, scratch_operands = 0 : i64, tpu.core_type = #tpu.core_type<tc>, window_params = [{transform_indices = @transform_0, window_bounds = array<i64: 2, 8, 8>}, {pipeline_mode = #tpu.pipeline_mode<synchronous>, transform_indices = @transform_1, window_bounds = array<i64: 16, 32>}, {pipeline_mode = #tpu.pipeline_mode<synchronous>, transform_indices = @transform_2, window_bounds = array<i64: 16, 160>}, {pipeline_mode = #tpu.pipeline_mode<synchronous>, transform_indices = @transform_3, window_bounds = array<i64: 16, 16>}, {pipeline_mode = #tpu.pipeline_mode<synchronous>, transform_indices = @transform_4, window_bounds = array<i64: 2, 16>}, {pipeline_mode = #tpu.pipeline_mode<synchronous>, transform_indices = @transform_5, window_bounds = array<i64: 2, 16>}, {pipeline_mode = #tpu.pipeline_mode<synchronous>, transform_indices = @transform_6, window_bounds = array<i64: 8, 32>}, {pipeline_mode = #tpu.pipeline_mode<synchronous>, transform_indices = @transform_7, window_bounds = array<i64: 1, 32>}, {pipeline_mode = #tpu.pipeline_mode<synchronous>, transform_indices = @transform_8, window_bounds = array<i64: 160, 128>}, {pipeline_mode = #tpu.pipeline_mode<synchronous>, transform_indices = @transform_9, window_bounds = array<i64: 1, 128>}, {pipeline_mode = #tpu.pipeline_mode<synchronous>, transform_indices = @transform_10, window_bounds = array<i64: 2, 128, 384>}, {pipeline_mode = #tpu.pipeline_mode<synchronous>, transform_indices = @transform_11, window_bounds = array<i64: 2, 1, 384>}, {pipeline_mode = #tpu.pipeline_mode<synchronous>, transform_indices = @transform_12, window_bounds = array<i64: 2, 128, 128>}, {pipeline_mode = #tpu.pipeline_mode<synchronous>, transform_indices = @transform_13, window_bounds = array<i64: 2, 1, 128>}, {pipeline_mode = #tpu.pipeline_mode<synchronous>, transform_indices = @transform_14, window_bounds = array<i64: 2, 128, 128>}, {pipeline_mode = #tpu.pipeline_mode<synchronous>, transform_indices = @transform_15, window_bounds = array<i64: 2, 1, 128>}, {pipeline_mode = #tpu.pipeline_mode<synchronous>, transform_indices = @transform_16, window_bounds = array<i64: 2, 128, 128>}, {pipeline_mode = #tpu.pipeline_mode<synchronous>, transform_indices = @transform_17, window_bounds = array<i64: 2, 1, 128>}, {pipeline_mode = #tpu.pipeline_mode<synchronous>, transform_indices = @transform_18, window_bounds = array<i64: 2, 1, 128>}, {pipeline_mode = #tpu.pipeline_mode<synchronous>, transform_indices = @transform_19, window_bounds = array<i64: 2, 1, 128>}, {pipeline_mode = #tpu.pipeline_mode<synchronous>, transform_indices = @transform_20, window_bounds = array<i64: 2, 1, 128>}, {pipeline_mode = #tpu.pipeline_mode<synchronous>, transform_indices = @transform_21, window_bounds = array<i64: 2, 1, 128>}, {pipeline_mode = #tpu.pipeline_mode<synchronous>, transform_indices = @transform_22, window_bounds = array<i64: 128, 128>}, {pipeline_mode = #tpu.pipeline_mode<synchronous>, transform_indices = @transform_23, window_bounds = array<i64: 1, 128>}, {pipeline_mode = #tpu.pipeline_mode<synchronous>, transform_indices = @transform_24, window_bounds = array<i64: 128, 256>}, {pipeline_mode = #tpu.pipeline_mode<synchronous>, transform_indices = @transform_25, window_bounds = array<i64: 1, 256>}, {pipeline_mode = #tpu.pipeline_mode<synchronous>, transform_indices = @transform_26, window_bounds = array<i64: 128, 128>}, {pipeline_mode = #tpu.pipeline_mode<synchronous>, transform_indices = @transform_27, window_bounds = array<i64: 1, 128>}, {pipeline_mode = #tpu.pipeline_mode<synchronous>, transform_indices = @transform_28, window_bounds = array<i64: 128, 128>}, {pipeline_mode = #tpu.pipeline_mode<synchronous>, transform_indices = @transform_29, window_bounds = array<i64: 1, 128>}, {pipeline_mode = #tpu.pipeline_mode<synchronous>, transform_indices = @transform_30, window_bounds = array<i64: 128, 1>}, {pipeline_mode = #tpu.pipeline_mode<synchronous>, transform_indices = @transform_31, window_bounds = array<i64: 1, 1>}, {transform_indices = @transform_32, window_bounds = array<i64: 2, 1>}]} {
    %c0 = arith.constant 0 : index
    %c0_0 = arith.constant 0 : index
    %c0_1 = arith.constant 0 : index
    %0 = vector.load %arg1[%c0, %c0_0, %c0_1] : memref<2x8x8xf32, #tpu.memory_space<vmem>>, vector<2x8x8xf32>
    %1 = vector.shape_cast %0 : vector<2x8x8xf32> to vector<16x8xf32>
    %2 = arith.truncf %1 : vector<16x8xf32> to vector<16x8xbf16>
    %c0_2 = arith.constant 0 : index
    %c0_3 = arith.constant 0 : index
    %3 = vector.load %arg7[%c0_2, %c0_3] : memref<8x32xbf16, #tpu.memory_space<vmem>>, vector<8x32xbf16>
    %cst = arith.constant dense<0.000000e+00> : vector<16x32xf32>
    %4 = tpu.matmul %2, %3, %cst {dimension_numbers = #tpu.dot_dimension_numbers<[1], [0], [0], [1], [0, 0, 1, 1], [], []>} : vector<16x8xbf16>, vector<8x32xbf16>, vector<16x32xf32> -> vector<16x32xf32>
    %c0_4 = arith.constant 0 : index
    %c0_5 = arith.constant 0 : index
    %5 = vector.load %arg8[%c0_4, %c0_5] : memref<1x32xf32, #tpu.memory_space<vmem>>, vector<1x32xf32>
    %6 = vector.broadcast %5 : vector<1x32xf32> to vector<16x32xf32>
    %7 = arith.addf %4, %6 : vector<16x32xf32>
    %c0_6 = arith.constant 0 : index
    %c0_7 = arith.constant 0 : index
    %8 = vector.load %arg2[%c0_6, %c0_7] : memref<16x32xf32, #tpu.memory_space<vmem>>, vector<16x32xf32>
    %9 = arith.addf %7, %8 : vector<16x32xf32>
    %c2_i32 = arith.constant 2 : i32
    %10 = tpu.dynamic_rotate %9 by %c2_i32 dim 0 : vector<16x32xf32>, i32 -> vector<16x32xf32>
    %c1_i32 = arith.constant 1 : i32
    %11 = tpu.dynamic_rotate %9 by %c1_i32 dim 0 : vector<16x32xf32>, i32 -> vector<16x32xf32>
    %c15_i32 = arith.constant 15 : i32
    %12 = tpu.dynamic_rotate %9 by %c15_i32 dim 0 : vector<16x32xf32>, i32 -> vector<16x32xf32>
    %c14_i32 = arith.constant 14 : i32
    %13 = tpu.dynamic_rotate %9 by %c14_i32 dim 0 : vector<16x32xf32>, i32 -> vector<16x32xf32>
    %14 = tpu.concatenate %10, %11, %9, %12, %13 in 1 : vector<16x32xf32>, vector<16x32xf32>, vector<16x32xf32>, vector<16x32xf32>, vector<16x32xf32> -> vector<16x160xf32>
    %c0_8 = arith.constant 0 : index
    %c0_9 = arith.constant 0 : index
    %15 = vector.load %arg3[%c0_8, %c0_9] : memref<16x160xf32, #tpu.memory_space<vmem>>, vector<16x160xf32>
    %16 = arith.mulf %14, %15 : vector<16x160xf32>
    %17 = arith.truncf %16 : vector<16x160xf32> to vector<16x160xbf16>
    %c0_10 = arith.constant 0 : index
    %c0_11 = arith.constant 0 : index
    %18 = vector.load %arg9[%c0_10, %c0_11] : memref<160x128xbf16, #tpu.memory_space<vmem>>, vector<160x128xbf16>
    %cst_12 = arith.constant dense<0.000000e+00> : vector<16x128xf32>
    %19 = tpu.matmul %17, %18, %cst_12 {dimension_numbers = #tpu.dot_dimension_numbers<[1], [0], [0], [1], [0, 0, 1, 1], [], []>} : vector<16x160xbf16>, vector<160x128xbf16>, vector<16x128xf32> -> vector<16x128xf32>
    %c0_13 = arith.constant 0 : index
    %c0_14 = arith.constant 0 : index
    %20 = vector.load %arg10[%c0_13, %c0_14] : memref<1x128xf32, #tpu.memory_space<vmem>>, vector<1x128xf32>
    %21 = vector.broadcast %20 : vector<1x128xf32> to vector<16x128xf32>
    %22 = arith.addf %19, %21 : vector<16x128xf32>
    %c0_15 = arith.constant 0 : index
    %c0_16 = arith.constant 0 : index
    %23 = vector.load %arg4[%c0_15, %c0_16] : memref<16x16xf32, #tpu.memory_space<vmem>>, vector<16x16xf32>
    %24 = arith.truncf %22 : vector<16x128xf32> to vector<16x128xbf16>
    %c0_17 = arith.constant 0 : index
    %c0_18 = arith.constant 0 : index
    %c0_19 = arith.constant 0 : index
    %25 = vector.load %arg11[%c0_17, %c0_18, %c0_19] : memref<2x128x384xbf16, #tpu.memory_space<vmem>>, vector<1x128x384xbf16>
    %26 = vector.shape_cast %25 : vector<1x128x384xbf16> to vector<128x384xbf16>
    %cst_20 = arith.constant dense<0.000000e+00> : vector<16x384xf32>
    %27 = tpu.matmul %24, %26, %cst_20 {dimension_numbers = #tpu.dot_dimension_numbers<[1], [0], [0], [1], [0, 0, 1, 1], [], []>} : vector<16x128xbf16>, vector<128x384xbf16>, vector<16x384xf32> -> vector<16x384xf32>
    %c0_21 = arith.constant 0 : index
    %c0_22 = arith.constant 0 : index
    %c0_23 = arith.constant 0 : index
    %28 = vector.load %arg12[%c0_21, %c0_22, %c0_23] : memref<2x1x384xf32, #tpu.memory_space<vmem>>, vector<1x1x384xf32>
    %29 = vector.shape_cast %28 : vector<1x1x384xf32> to vector<1x384xf32>
    %30 = vector.broadcast %29 : vector<1x384xf32> to vector<16x384xf32>
    %31 = arith.addf %27, %30 : vector<16x384xf32>
    %32 = vector.extract_strided_slice %31 {offsets = [0, 0], sizes = [16, 128], strides = [1, 1]} : vector<16x384xf32> to vector<16x128xf32>
    %33 = vector.extract_strided_slice %31 {offsets = [0, 128], sizes = [16, 128], strides = [1, 1]} : vector<16x384xf32> to vector<16x128xf32>
    %34 = vector.extract_strided_slice %31 {offsets = [0, 256], sizes = [16, 128], strides = [1, 1]} : vector<16x384xf32> to vector<16x128xf32>
    %35 = arith.truncf %32 : vector<16x128xf32> to vector<16x128xbf16>
    %36 = arith.truncf %33 : vector<16x128xf32> to vector<16x128xbf16>
    %37 = arith.truncf %34 : vector<16x128xf32> to vector<16x128xbf16>
    %38 = vector.extract_strided_slice %35 {offsets = [0, 0], sizes = [16, 32], strides = [1, 1]} : vector<16x128xbf16> to vector<16x32xbf16>
    %39 = vector.extract_strided_slice %36 {offsets = [0, 0], sizes = [16, 32], strides = [1, 1]} : vector<16x128xbf16> to vector<16x32xbf16>
    %cst_24 = arith.constant dense<0.000000e+00> : vector<16x16xf32>
    %40 = tpu.matmul %38, %39, %cst_24 {dimension_numbers = #tpu.dot_dimension_numbers<[1], [1], [0], [0], [0, 0, 1, 0], [], []>} : vector<16x32xbf16>, vector<16x32xbf16>, vector<16x16xf32> -> vector<16x16xf32>
    %41 = arith.addf %40, %23 : vector<16x16xf32>
    %cst_25 = arith.constant dense<0xFF800000> : vector<16xf32>
    %42 = vector.multi_reduction <maximumf>, %41, %cst_25 [1] : vector<16x16xf32> to vector<16xf32>
    %43 = vector.shape_cast %42 : vector<16xf32> to vector<16x1xf32>
    %44 = vector.broadcast %43 : vector<16x1xf32> to vector<16x16xf32>
    %45 = arith.subf %41, %44 : vector<16x16xf32>
    %46 = math.exp %45 : vector<16x16xf32>
    %cst_26 = arith.constant dense<0.000000e+00> : vector<16xf32>
    %47 = vector.multi_reduction <add>, %46, %cst_26 [1] : vector<16x16xf32> to vector<16xf32>
    %48 = vector.shape_cast %47 : vector<16xf32> to vector<16x1xf32>
    %49 = tpu.reciprocal %48 {approx = true} : vector<16x1xf32> -> vector<16x1xf32>
    %50 = arith.truncf %46 : vector<16x16xf32> to vector<16x16xbf16>
    %51 = vector.extract_strided_slice %37 {offsets = [0, 0], sizes = [16, 32], strides = [1, 1]} : vector<16x128xbf16> to vector<16x32xbf16>
    %cst_27 = arith.constant dense<0.000000e+00> : vector<16x32xf32>
    %52 = tpu.matmul %50, %51, %cst_27 {dimension_numbers = #tpu.dot_dimension_numbers<[1], [0], [0], [1], [0, 0, 1, 1], [], []>} : vector<16x16xbf16>, vector<16x32xbf16>, vector<16x32xf32> -> vector<16x32xf32>
    %53 = vector.broadcast %49 : vector<16x1xf32> to vector<16x32xf32>
    %54 = arith.mulf %52, %53 : vector<16x32xf32>
    %55 = vector.extract_strided_slice %35 {offsets = [0, 32], sizes = [16, 32], strides = [1, 1]} : vector<16x128xbf16> to vector<16x32xbf16>
    %56 = vector.extract_strided_slice %36 {offsets = [0, 32], sizes = [16, 32], strides = [1, 1]} : vector<16x128xbf16> to vector<16x32xbf16>
    %cst_28 = arith.constant dense<0.000000e+00> : vector<16x16xf32>
    %57 = tpu.matmul %55, %56, %cst_28 {dimension_numbers = #tpu.dot_dimension_numbers<[1], [1], [0], [0], [0, 0, 1, 0], [], []>} : vector<16x32xbf16>, vector<16x32xbf16>, vector<16x16xf32> -> vector<16x16xf32>
    %58 = arith.addf %57, %23 : vector<16x16xf32>
    %cst_29 = arith.constant dense<0xFF800000> : vector<16xf32>
    %59 = vector.multi_reduction <maximumf>, %58, %cst_29 [1] : vector<16x16xf32> to vector<16xf32>
    %60 = vector.shape_cast %59 : vector<16xf32> to vector<16x1xf32>
    %61 = vector.broadcast %60 : vector<16x1xf32> to vector<16x16xf32>
    %62 = arith.subf %58, %61 : vector<16x16xf32>
    %63 = math.exp %62 : vector<16x16xf32>
    %cst_30 = arith.constant dense<0.000000e+00> : vector<16xf32>
    %64 = vector.multi_reduction <add>, %63, %cst_30 [1] : vector<16x16xf32> to vector<16xf32>
    %65 = vector.shape_cast %64 : vector<16xf32> to vector<16x1xf32>
    %66 = tpu.reciprocal %65 {approx = true} : vector<16x1xf32> -> vector<16x1xf32>
    %67 = arith.truncf %63 : vector<16x16xf32> to vector<16x16xbf16>
    %68 = vector.extract_strided_slice %37 {offsets = [0, 32], sizes = [16, 32], strides = [1, 1]} : vector<16x128xbf16> to vector<16x32xbf16>
    %cst_31 = arith.constant dense<0.000000e+00> : vector<16x32xf32>
    %69 = tpu.matmul %67, %68, %cst_31 {dimension_numbers = #tpu.dot_dimension_numbers<[1], [0], [0], [1], [0, 0, 1, 1], [], []>} : vector<16x16xbf16>, vector<16x32xbf16>, vector<16x32xf32> -> vector<16x32xf32>
    %70 = vector.broadcast %66 : vector<16x1xf32> to vector<16x32xf32>
    %71 = arith.mulf %69, %70 : vector<16x32xf32>
    %72 = vector.extract_strided_slice %35 {offsets = [0, 64], sizes = [16, 32], strides = [1, 1]} : vector<16x128xbf16> to vector<16x32xbf16>
    %73 = vector.extract_strided_slice %36 {offsets = [0, 64], sizes = [16, 32], strides = [1, 1]} : vector<16x128xbf16> to vector<16x32xbf16>
    %cst_32 = arith.constant dense<0.000000e+00> : vector<16x16xf32>
    %74 = tpu.matmul %72, %73, %cst_32 {dimension_numbers = #tpu.dot_dimension_numbers<[1], [1], [0], [0], [0, 0, 1, 0], [], []>} : vector<16x32xbf16>, vector<16x32xbf16>, vector<16x16xf32> -> vector<16x16xf32>
    %75 = arith.addf %74, %23 : vector<16x16xf32>
    %cst_33 = arith.constant dense<0xFF800000> : vector<16xf32>
    %76 = vector.multi_reduction <maximumf>, %75, %cst_33 [1] : vector<16x16xf32> to vector<16xf32>
    %77 = vector.shape_cast %76 : vector<16xf32> to vector<16x1xf32>
    %78 = vector.broadcast %77 : vector<16x1xf32> to vector<16x16xf32>
    %79 = arith.subf %75, %78 : vector<16x16xf32>
    %80 = math.exp %79 : vector<16x16xf32>
    %cst_34 = arith.constant dense<0.000000e+00> : vector<16xf32>
    %81 = vector.multi_reduction <add>, %80, %cst_34 [1] : vector<16x16xf32> to vector<16xf32>
    %82 = vector.shape_cast %81 : vector<16xf32> to vector<16x1xf32>
    %83 = tpu.reciprocal %82 {approx = true} : vector<16x1xf32> -> vector<16x1xf32>
    %84 = arith.truncf %80 : vector<16x16xf32> to vector<16x16xbf16>
    %85 = vector.extract_strided_slice %37 {offsets = [0, 64], sizes = [16, 32], strides = [1, 1]} : vector<16x128xbf16> to vector<16x32xbf16>
    %cst_35 = arith.constant dense<0.000000e+00> : vector<16x32xf32>
    %86 = tpu.matmul %84, %85, %cst_35 {dimension_numbers = #tpu.dot_dimension_numbers<[1], [0], [0], [1], [0, 0, 1, 1], [], []>} : vector<16x16xbf16>, vector<16x32xbf16>, vector<16x32xf32> -> vector<16x32xf32>
    %87 = vector.broadcast %83 : vector<16x1xf32> to vector<16x32xf32>
    %88 = arith.mulf %86, %87 : vector<16x32xf32>
    %89 = vector.extract_strided_slice %35 {offsets = [0, 96], sizes = [16, 32], strides = [1, 1]} : vector<16x128xbf16> to vector<16x32xbf16>
    %90 = vector.extract_strided_slice %36 {offsets = [0, 96], sizes = [16, 32], strides = [1, 1]} : vector<16x128xbf16> to vector<16x32xbf16>
    %cst_36 = arith.constant dense<0.000000e+00> : vector<16x16xf32>
    %91 = tpu.matmul %89, %90, %cst_36 {dimension_numbers = #tpu.dot_dimension_numbers<[1], [1], [0], [0], [0, 0, 1, 0], [], []>} : vector<16x32xbf16>, vector<16x32xbf16>, vector<16x16xf32> -> vector<16x16xf32>
    %92 = arith.addf %91, %23 : vector<16x16xf32>
    %cst_37 = arith.constant dense<0xFF800000> : vector<16xf32>
    %93 = vector.multi_reduction <maximumf>, %92, %cst_37 [1] : vector<16x16xf32> to vector<16xf32>
    %94 = vector.shape_cast %93 : vector<16xf32> to vector<16x1xf32>
    %95 = vector.broadcast %94 : vector<16x1xf32> to vector<16x16xf32>
    %96 = arith.subf %92, %95 : vector<16x16xf32>
    %97 = math.exp %96 : vector<16x16xf32>
    %cst_38 = arith.constant dense<0.000000e+00> : vector<16xf32>
    %98 = vector.multi_reduction <add>, %97, %cst_38 [1] : vector<16x16xf32> to vector<16xf32>
    %99 = vector.shape_cast %98 : vector<16xf32> to vector<16x1xf32>
    %100 = tpu.reciprocal %99 {approx = true} : vector<16x1xf32> -> vector<16x1xf32>
    %101 = arith.truncf %97 : vector<16x16xf32> to vector<16x16xbf16>
    %102 = vector.extract_strided_slice %37 {offsets = [0, 96], sizes = [16, 32], strides = [1, 1]} : vector<16x128xbf16> to vector<16x32xbf16>
    %cst_39 = arith.constant dense<0.000000e+00> : vector<16x32xf32>
    %103 = tpu.matmul %101, %102, %cst_39 {dimension_numbers = #tpu.dot_dimension_numbers<[1], [0], [0], [1], [0, 0, 1, 1], [], []>} : vector<16x16xbf16>, vector<16x32xbf16>, vector<16x32xf32> -> vector<16x32xf32>
    %104 = vector.broadcast %100 : vector<16x1xf32> to vector<16x32xf32>
    %105 = arith.mulf %103, %104 : vector<16x32xf32>
    %106 = tpu.concatenate %54, %71, %88, %105 in 1 : vector<16x32xf32>, vector<16x32xf32>, vector<16x32xf32>, vector<16x32xf32> -> vector<16x128xf32>
    %107 = arith.truncf %106 : vector<16x128xf32> to vector<16x128xbf16>
    %c0_40 = arith.constant 0 : index
    %c0_41 = arith.constant 0 : index
    %c0_42 = arith.constant 0 : index
    %108 = vector.load %arg13[%c0_40, %c0_41, %c0_42] : memref<2x128x128xbf16, #tpu.memory_space<vmem>>, vector<1x128x128xbf16>
    %109 = vector.shape_cast %108 : vector<1x128x128xbf16> to vector<128x128xbf16>
    %cst_43 = arith.constant dense<0.000000e+00> : vector<16x128xf32>
    %110 = tpu.matmul %107, %109, %cst_43 {dimension_numbers = #tpu.dot_dimension_numbers<[1], [0], [0], [1], [0, 0, 1, 1], [], []>} : vector<16x128xbf16>, vector<128x128xbf16>, vector<16x128xf32> -> vector<16x128xf32>
    %c0_44 = arith.constant 0 : index
    %c0_45 = arith.constant 0 : index
    %c0_46 = arith.constant 0 : index
    %111 = vector.load %arg14[%c0_44, %c0_45, %c0_46] : memref<2x1x128xf32, #tpu.memory_space<vmem>>, vector<1x1x128xf32>
    %112 = vector.shape_cast %111 : vector<1x1x128xf32> to vector<1x128xf32>
    %113 = vector.broadcast %112 : vector<1x128xf32> to vector<16x128xf32>
    %114 = arith.addf %110, %113 : vector<16x128xf32>
    %115 = arith.addf %22, %114 : vector<16x128xf32>
    %c0_47 = arith.constant 0 : index
    %c0_48 = arith.constant 0 : index
    %c0_49 = arith.constant 0 : index
    %116 = vector.load %arg19[%c0_47, %c0_48, %c0_49] : memref<2x1x128xf32, #tpu.memory_space<vmem>>, vector<1x1x128xf32>
    %117 = vector.shape_cast %116 : vector<1x1x128xf32> to vector<1x128xf32>
    %c0_50 = arith.constant 0 : index
    %c0_51 = arith.constant 0 : index
    %c0_52 = arith.constant 0 : index
    %118 = vector.load %arg20[%c0_50, %c0_51, %c0_52] : memref<2x1x128xf32, #tpu.memory_space<vmem>>, vector<1x1x128xf32>
    %119 = vector.shape_cast %118 : vector<1x1x128xf32> to vector<1x128xf32>
    %cst_53 = arith.constant dense<0.000000e+00> : vector<16xf32>
    %120 = vector.multi_reduction <add>, %115, %cst_53 [1] : vector<16x128xf32> to vector<16xf32>
    %121 = vector.shape_cast %120 : vector<16xf32> to vector<16x1xf32>
    %cst_54 = arith.constant 0.010416667 : f32
    %122 = vector.broadcast %cst_54 : f32 to vector<16x1xf32>
    %123 = arith.mulf %121, %122 : vector<16x1xf32>
    %124 = arith.mulf %115, %115 : vector<16x128xf32>
    %cst_55 = arith.constant dense<0.000000e+00> : vector<16xf32>
    %125 = vector.multi_reduction <add>, %124, %cst_55 [1] : vector<16x128xf32> to vector<16xf32>
    %126 = vector.shape_cast %125 : vector<16xf32> to vector<16x1xf32>
    %cst_56 = arith.constant 0.010416667 : f32
    %127 = vector.broadcast %cst_56 : f32 to vector<16x1xf32>
    %128 = arith.mulf %126, %127 : vector<16x1xf32>
    %129 = arith.mulf %123, %123 : vector<16x1xf32>
    %130 = arith.subf %128, %129 : vector<16x1xf32>
    %131 = vector.broadcast %123 : vector<16x1xf32> to vector<16x128xf32>
    %132 = arith.subf %115, %131 : vector<16x128xf32>
    %cst_57 = arith.constant 9.99999974E-6 : f32
    %133 = vector.broadcast %cst_57 : f32 to vector<16x1xf32>
    %134 = arith.addf %130, %133 : vector<16x1xf32>
    %135 = math.rsqrt %134 : vector<16x1xf32>
    %136 = vector.broadcast %135 : vector<16x1xf32> to vector<16x128xf32>
    %137 = arith.mulf %132, %136 : vector<16x128xf32>
    %138 = vector.broadcast %117 : vector<1x128xf32> to vector<16x128xf32>
    %139 = arith.mulf %137, %138 : vector<16x128xf32>
    %140 = vector.broadcast %119 : vector<1x128xf32> to vector<16x128xf32>
    %141 = arith.addf %139, %140 : vector<16x128xf32>
    %142 = arith.truncf %141 : vector<16x128xf32> to vector<16x128xbf16>
    %c0_58 = arith.constant 0 : index
    %c0_59 = arith.constant 0 : index
    %c0_60 = arith.constant 0 : index
    %143 = vector.load %arg15[%c0_58, %c0_59, %c0_60] : memref<2x128x128xbf16, #tpu.memory_space<vmem>>, vector<1x128x128xbf16>
    %144 = vector.shape_cast %143 : vector<1x128x128xbf16> to vector<128x128xbf16>
    %cst_61 = arith.constant dense<0.000000e+00> : vector<16x128xf32>
    %145 = tpu.matmul %142, %144, %cst_61 {dimension_numbers = #tpu.dot_dimension_numbers<[1], [0], [0], [1], [0, 0, 1, 1], [], []>} : vector<16x128xbf16>, vector<128x128xbf16>, vector<16x128xf32> -> vector<16x128xf32>
    %c0_62 = arith.constant 0 : index
    %c0_63 = arith.constant 0 : index
    %c0_64 = arith.constant 0 : index
    %146 = vector.load %arg16[%c0_62, %c0_63, %c0_64] : memref<2x1x128xf32, #tpu.memory_space<vmem>>, vector<1x1x128xf32>
    %147 = vector.shape_cast %146 : vector<1x1x128xf32> to vector<1x128xf32>
    %148 = vector.broadcast %147 : vector<1x128xf32> to vector<16x128xf32>
    %149 = arith.addf %145, %148 : vector<16x128xf32>
    %cst_65 = arith.constant 0.000000e+00 : f32
    %150 = vector.broadcast %cst_65 : f32 to vector<16x128xf32>
    %151 = arith.maximumf %149, %150 : vector<16x128xf32>
    %152 = arith.truncf %151 : vector<16x128xf32> to vector<16x128xbf16>
    %c0_66 = arith.constant 0 : index
    %c0_67 = arith.constant 0 : index
    %c0_68 = arith.constant 0 : index
    %153 = vector.load %arg17[%c0_66, %c0_67, %c0_68] : memref<2x128x128xbf16, #tpu.memory_space<vmem>>, vector<1x128x128xbf16>
    %154 = vector.shape_cast %153 : vector<1x128x128xbf16> to vector<128x128xbf16>
    %cst_69 = arith.constant dense<0.000000e+00> : vector<16x128xf32>
    %155 = tpu.matmul %152, %154, %cst_69 {dimension_numbers = #tpu.dot_dimension_numbers<[1], [0], [0], [1], [0, 0, 1, 1], [], []>} : vector<16x128xbf16>, vector<128x128xbf16>, vector<16x128xf32> -> vector<16x128xf32>
    %c0_70 = arith.constant 0 : index
    %c0_71 = arith.constant 0 : index
    %c0_72 = arith.constant 0 : index
    %156 = vector.load %arg18[%c0_70, %c0_71, %c0_72] : memref<2x1x128xf32, #tpu.memory_space<vmem>>, vector<1x1x128xf32>
    %157 = vector.shape_cast %156 : vector<1x1x128xf32> to vector<1x128xf32>
    %158 = vector.broadcast %157 : vector<1x128xf32> to vector<16x128xf32>
    %159 = arith.addf %155, %158 : vector<16x128xf32>
    %160 = arith.addf %141, %159 : vector<16x128xf32>
    %c0_73 = arith.constant 0 : index
    %c0_74 = arith.constant 0 : index
    %c0_75 = arith.constant 0 : index
    %161 = vector.load %arg21[%c0_73, %c0_74, %c0_75] : memref<2x1x128xf32, #tpu.memory_space<vmem>>, vector<1x1x128xf32>
    %162 = vector.shape_cast %161 : vector<1x1x128xf32> to vector<1x128xf32>
    %c0_76 = arith.constant 0 : index
    %c0_77 = arith.constant 0 : index
    %c0_78 = arith.constant 0 : index
    %163 = vector.load %arg22[%c0_76, %c0_77, %c0_78] : memref<2x1x128xf32, #tpu.memory_space<vmem>>, vector<1x1x128xf32>
    %164 = vector.shape_cast %163 : vector<1x1x128xf32> to vector<1x128xf32>
    %cst_79 = arith.constant dense<0.000000e+00> : vector<16xf32>
    %165 = vector.multi_reduction <add>, %160, %cst_79 [1] : vector<16x128xf32> to vector<16xf32>
    %166 = vector.shape_cast %165 : vector<16xf32> to vector<16x1xf32>
    %cst_80 = arith.constant 0.010416667 : f32
    %167 = vector.broadcast %cst_80 : f32 to vector<16x1xf32>
    %168 = arith.mulf %166, %167 : vector<16x1xf32>
    %169 = arith.mulf %160, %160 : vector<16x128xf32>
    %cst_81 = arith.constant dense<0.000000e+00> : vector<16xf32>
    %170 = vector.multi_reduction <add>, %169, %cst_81 [1] : vector<16x128xf32> to vector<16xf32>
    %171 = vector.shape_cast %170 : vector<16xf32> to vector<16x1xf32>
    %cst_82 = arith.constant 0.010416667 : f32
    %172 = vector.broadcast %cst_82 : f32 to vector<16x1xf32>
    %173 = arith.mulf %171, %172 : vector<16x1xf32>
    %174 = arith.mulf %168, %168 : vector<16x1xf32>
    %175 = arith.subf %173, %174 : vector<16x1xf32>
    %176 = vector.broadcast %168 : vector<16x1xf32> to vector<16x128xf32>
    %177 = arith.subf %160, %176 : vector<16x128xf32>
    %cst_83 = arith.constant 9.99999974E-6 : f32
    %178 = vector.broadcast %cst_83 : f32 to vector<16x1xf32>
    %179 = arith.addf %175, %178 : vector<16x1xf32>
    %180 = math.rsqrt %179 : vector<16x1xf32>
    %181 = vector.broadcast %180 : vector<16x1xf32> to vector<16x128xf32>
    %182 = arith.mulf %177, %181 : vector<16x128xf32>
    %183 = vector.broadcast %162 : vector<1x128xf32> to vector<16x128xf32>
    %184 = arith.mulf %182, %183 : vector<16x128xf32>
    %185 = vector.broadcast %164 : vector<1x128xf32> to vector<16x128xf32>
    %186 = arith.addf %184, %185 : vector<16x128xf32>
    %187 = arith.truncf %186 : vector<16x128xf32> to vector<16x128xbf16>
    %c1 = arith.constant 1 : index
    %c0_84 = arith.constant 0 : index
    %c0_85 = arith.constant 0 : index
    %188 = vector.load %arg11[%c1, %c0_84, %c0_85] : memref<2x128x384xbf16, #tpu.memory_space<vmem>>, vector<1x128x384xbf16>
    %189 = vector.shape_cast %188 : vector<1x128x384xbf16> to vector<128x384xbf16>
    %cst_86 = arith.constant dense<0.000000e+00> : vector<16x384xf32>
    %190 = tpu.matmul %187, %189, %cst_86 {dimension_numbers = #tpu.dot_dimension_numbers<[1], [0], [0], [1], [0, 0, 1, 1], [], []>} : vector<16x128xbf16>, vector<128x384xbf16>, vector<16x384xf32> -> vector<16x384xf32>
    %c1_87 = arith.constant 1 : index
    %c0_88 = arith.constant 0 : index
    %c0_89 = arith.constant 0 : index
    %191 = vector.load %arg12[%c1_87, %c0_88, %c0_89] : memref<2x1x384xf32, #tpu.memory_space<vmem>>, vector<1x1x384xf32>
    %192 = vector.shape_cast %191 : vector<1x1x384xf32> to vector<1x384xf32>
    %193 = vector.broadcast %192 : vector<1x384xf32> to vector<16x384xf32>
    %194 = arith.addf %190, %193 : vector<16x384xf32>
    %195 = vector.extract_strided_slice %194 {offsets = [0, 0], sizes = [16, 128], strides = [1, 1]} : vector<16x384xf32> to vector<16x128xf32>
    %196 = vector.extract_strided_slice %194 {offsets = [0, 128], sizes = [16, 128], strides = [1, 1]} : vector<16x384xf32> to vector<16x128xf32>
    %197 = vector.extract_strided_slice %194 {offsets = [0, 256], sizes = [16, 128], strides = [1, 1]} : vector<16x384xf32> to vector<16x128xf32>
    %198 = arith.truncf %195 : vector<16x128xf32> to vector<16x128xbf16>
    %199 = arith.truncf %196 : vector<16x128xf32> to vector<16x128xbf16>
    %200 = arith.truncf %197 : vector<16x128xf32> to vector<16x128xbf16>
    %201 = vector.extract_strided_slice %198 {offsets = [0, 0], sizes = [16, 32], strides = [1, 1]} : vector<16x128xbf16> to vector<16x32xbf16>
    %202 = vector.extract_strided_slice %199 {offsets = [0, 0], sizes = [16, 32], strides = [1, 1]} : vector<16x128xbf16> to vector<16x32xbf16>
    %cst_90 = arith.constant dense<0.000000e+00> : vector<16x16xf32>
    %203 = tpu.matmul %201, %202, %cst_90 {dimension_numbers = #tpu.dot_dimension_numbers<[1], [1], [0], [0], [0, 0, 1, 0], [], []>} : vector<16x32xbf16>, vector<16x32xbf16>, vector<16x16xf32> -> vector<16x16xf32>
    %204 = arith.addf %203, %23 : vector<16x16xf32>
    %cst_91 = arith.constant dense<0xFF800000> : vector<16xf32>
    %205 = vector.multi_reduction <maximumf>, %204, %cst_91 [1] : vector<16x16xf32> to vector<16xf32>
    %206 = vector.shape_cast %205 : vector<16xf32> to vector<16x1xf32>
    %207 = vector.broadcast %206 : vector<16x1xf32> to vector<16x16xf32>
    %208 = arith.subf %204, %207 : vector<16x16xf32>
    %209 = math.exp %208 : vector<16x16xf32>
    %cst_92 = arith.constant dense<0.000000e+00> : vector<16xf32>
    %210 = vector.multi_reduction <add>, %209, %cst_92 [1] : vector<16x16xf32> to vector<16xf32>
    %211 = vector.shape_cast %210 : vector<16xf32> to vector<16x1xf32>
    %212 = tpu.reciprocal %211 {approx = true} : vector<16x1xf32> -> vector<16x1xf32>
    %213 = arith.truncf %209 : vector<16x16xf32> to vector<16x16xbf16>
    %214 = vector.extract_strided_slice %200 {offsets = [0, 0], sizes = [16, 32], strides = [1, 1]} : vector<16x128xbf16> to vector<16x32xbf16>
    %cst_93 = arith.constant dense<0.000000e+00> : vector<16x32xf32>
    %215 = tpu.matmul %213, %214, %cst_93 {dimension_numbers = #tpu.dot_dimension_numbers<[1], [0], [0], [1], [0, 0, 1, 1], [], []>} : vector<16x16xbf16>, vector<16x32xbf16>, vector<16x32xf32> -> vector<16x32xf32>
    %216 = vector.broadcast %212 : vector<16x1xf32> to vector<16x32xf32>
    %217 = arith.mulf %215, %216 : vector<16x32xf32>
    %218 = vector.extract_strided_slice %198 {offsets = [0, 32], sizes = [16, 32], strides = [1, 1]} : vector<16x128xbf16> to vector<16x32xbf16>
    %219 = vector.extract_strided_slice %199 {offsets = [0, 32], sizes = [16, 32], strides = [1, 1]} : vector<16x128xbf16> to vector<16x32xbf16>
    %cst_94 = arith.constant dense<0.000000e+00> : vector<16x16xf32>
    %220 = tpu.matmul %218, %219, %cst_94 {dimension_numbers = #tpu.dot_dimension_numbers<[1], [1], [0], [0], [0, 0, 1, 0], [], []>} : vector<16x32xbf16>, vector<16x32xbf16>, vector<16x16xf32> -> vector<16x16xf32>
    %221 = arith.addf %220, %23 : vector<16x16xf32>
    %cst_95 = arith.constant dense<0xFF800000> : vector<16xf32>
    %222 = vector.multi_reduction <maximumf>, %221, %cst_95 [1] : vector<16x16xf32> to vector<16xf32>
    %223 = vector.shape_cast %222 : vector<16xf32> to vector<16x1xf32>
    %224 = vector.broadcast %223 : vector<16x1xf32> to vector<16x16xf32>
    %225 = arith.subf %221, %224 : vector<16x16xf32>
    %226 = math.exp %225 : vector<16x16xf32>
    %cst_96 = arith.constant dense<0.000000e+00> : vector<16xf32>
    %227 = vector.multi_reduction <add>, %226, %cst_96 [1] : vector<16x16xf32> to vector<16xf32>
    %228 = vector.shape_cast %227 : vector<16xf32> to vector<16x1xf32>
    %229 = tpu.reciprocal %228 {approx = true} : vector<16x1xf32> -> vector<16x1xf32>
    %230 = arith.truncf %226 : vector<16x16xf32> to vector<16x16xbf16>
    %231 = vector.extract_strided_slice %200 {offsets = [0, 32], sizes = [16, 32], strides = [1, 1]} : vector<16x128xbf16> to vector<16x32xbf16>
    %cst_97 = arith.constant dense<0.000000e+00> : vector<16x32xf32>
    %232 = tpu.matmul %230, %231, %cst_97 {dimension_numbers = #tpu.dot_dimension_numbers<[1], [0], [0], [1], [0, 0, 1, 1], [], []>} : vector<16x16xbf16>, vector<16x32xbf16>, vector<16x32xf32> -> vector<16x32xf32>
    %233 = vector.broadcast %229 : vector<16x1xf32> to vector<16x32xf32>
    %234 = arith.mulf %232, %233 : vector<16x32xf32>
    %235 = vector.extract_strided_slice %198 {offsets = [0, 64], sizes = [16, 32], strides = [1, 1]} : vector<16x128xbf16> to vector<16x32xbf16>
    %236 = vector.extract_strided_slice %199 {offsets = [0, 64], sizes = [16, 32], strides = [1, 1]} : vector<16x128xbf16> to vector<16x32xbf16>
    %cst_98 = arith.constant dense<0.000000e+00> : vector<16x16xf32>
    %237 = tpu.matmul %235, %236, %cst_98 {dimension_numbers = #tpu.dot_dimension_numbers<[1], [1], [0], [0], [0, 0, 1, 0], [], []>} : vector<16x32xbf16>, vector<16x32xbf16>, vector<16x16xf32> -> vector<16x16xf32>
    %238 = arith.addf %237, %23 : vector<16x16xf32>
    %cst_99 = arith.constant dense<0xFF800000> : vector<16xf32>
    %239 = vector.multi_reduction <maximumf>, %238, %cst_99 [1] : vector<16x16xf32> to vector<16xf32>
    %240 = vector.shape_cast %239 : vector<16xf32> to vector<16x1xf32>
    %241 = vector.broadcast %240 : vector<16x1xf32> to vector<16x16xf32>
    %242 = arith.subf %238, %241 : vector<16x16xf32>
    %243 = math.exp %242 : vector<16x16xf32>
    %cst_100 = arith.constant dense<0.000000e+00> : vector<16xf32>
    %244 = vector.multi_reduction <add>, %243, %cst_100 [1] : vector<16x16xf32> to vector<16xf32>
    %245 = vector.shape_cast %244 : vector<16xf32> to vector<16x1xf32>
    %246 = tpu.reciprocal %245 {approx = true} : vector<16x1xf32> -> vector<16x1xf32>
    %247 = arith.truncf %243 : vector<16x16xf32> to vector<16x16xbf16>
    %248 = vector.extract_strided_slice %200 {offsets = [0, 64], sizes = [16, 32], strides = [1, 1]} : vector<16x128xbf16> to vector<16x32xbf16>
    %cst_101 = arith.constant dense<0.000000e+00> : vector<16x32xf32>
    %249 = tpu.matmul %247, %248, %cst_101 {dimension_numbers = #tpu.dot_dimension_numbers<[1], [0], [0], [1], [0, 0, 1, 1], [], []>} : vector<16x16xbf16>, vector<16x32xbf16>, vector<16x32xf32> -> vector<16x32xf32>
    %250 = vector.broadcast %246 : vector<16x1xf32> to vector<16x32xf32>
    %251 = arith.mulf %249, %250 : vector<16x32xf32>
    %252 = vector.extract_strided_slice %198 {offsets = [0, 96], sizes = [16, 32], strides = [1, 1]} : vector<16x128xbf16> to vector<16x32xbf16>
    %253 = vector.extract_strided_slice %199 {offsets = [0, 96], sizes = [16, 32], strides = [1, 1]} : vector<16x128xbf16> to vector<16x32xbf16>
    %cst_102 = arith.constant dense<0.000000e+00> : vector<16x16xf32>
    %254 = tpu.matmul %252, %253, %cst_102 {dimension_numbers = #tpu.dot_dimension_numbers<[1], [1], [0], [0], [0, 0, 1, 0], [], []>} : vector<16x32xbf16>, vector<16x32xbf16>, vector<16x16xf32> -> vector<16x16xf32>
    %255 = arith.addf %254, %23 : vector<16x16xf32>
    %cst_103 = arith.constant dense<0xFF800000> : vector<16xf32>
    %256 = vector.multi_reduction <maximumf>, %255, %cst_103 [1] : vector<16x16xf32> to vector<16xf32>
    %257 = vector.shape_cast %256 : vector<16xf32> to vector<16x1xf32>
    %258 = vector.broadcast %257 : vector<16x1xf32> to vector<16x16xf32>
    %259 = arith.subf %255, %258 : vector<16x16xf32>
    %260 = math.exp %259 : vector<16x16xf32>
    %cst_104 = arith.constant dense<0.000000e+00> : vector<16xf32>
    %261 = vector.multi_reduction <add>, %260, %cst_104 [1] : vector<16x16xf32> to vector<16xf32>
    %262 = vector.shape_cast %261 : vector<16xf32> to vector<16x1xf32>
    %263 = tpu.reciprocal %262 {approx = true} : vector<16x1xf32> -> vector<16x1xf32>
    %264 = arith.truncf %260 : vector<16x16xf32> to vector<16x16xbf16>
    %265 = vector.extract_strided_slice %200 {offsets = [0, 96], sizes = [16, 32], strides = [1, 1]} : vector<16x128xbf16> to vector<16x32xbf16>
    %cst_105 = arith.constant dense<0.000000e+00> : vector<16x32xf32>
    %266 = tpu.matmul %264, %265, %cst_105 {dimension_numbers = #tpu.dot_dimension_numbers<[1], [0], [0], [1], [0, 0, 1, 1], [], []>} : vector<16x16xbf16>, vector<16x32xbf16>, vector<16x32xf32> -> vector<16x32xf32>
    %267 = vector.broadcast %263 : vector<16x1xf32> to vector<16x32xf32>
    %268 = arith.mulf %266, %267 : vector<16x32xf32>
    %269 = tpu.concatenate %217, %234, %251, %268 in 1 : vector<16x32xf32>, vector<16x32xf32>, vector<16x32xf32>, vector<16x32xf32> -> vector<16x128xf32>
    %270 = arith.truncf %269 : vector<16x128xf32> to vector<16x128xbf16>
    %c1_106 = arith.constant 1 : index
    %c0_107 = arith.constant 0 : index
    %c0_108 = arith.constant 0 : index
    %271 = vector.load %arg13[%c1_106, %c0_107, %c0_108] : memref<2x128x128xbf16, #tpu.memory_space<vmem>>, vector<1x128x128xbf16>
    %272 = vector.shape_cast %271 : vector<1x128x128xbf16> to vector<128x128xbf16>
    %cst_109 = arith.constant dense<0.000000e+00> : vector<16x128xf32>
    %273 = tpu.matmul %270, %272, %cst_109 {dimension_numbers = #tpu.dot_dimension_numbers<[1], [0], [0], [1], [0, 0, 1, 1], [], []>} : vector<16x128xbf16>, vector<128x128xbf16>, vector<16x128xf32> -> vector<16x128xf32>
    %c1_110 = arith.constant 1 : index
    %c0_111 = arith.constant 0 : index
    %c0_112 = arith.constant 0 : index
    %274 = vector.load %arg14[%c1_110, %c0_111, %c0_112] : memref<2x1x128xf32, #tpu.memory_space<vmem>>, vector<1x1x128xf32>
    %275 = vector.shape_cast %274 : vector<1x1x128xf32> to vector<1x128xf32>
    %276 = vector.broadcast %275 : vector<1x128xf32> to vector<16x128xf32>
    %277 = arith.addf %273, %276 : vector<16x128xf32>
    %278 = arith.addf %186, %277 : vector<16x128xf32>
    %c1_113 = arith.constant 1 : index
    %c0_114 = arith.constant 0 : index
    %c0_115 = arith.constant 0 : index
    %279 = vector.load %arg19[%c1_113, %c0_114, %c0_115] : memref<2x1x128xf32, #tpu.memory_space<vmem>>, vector<1x1x128xf32>
    %280 = vector.shape_cast %279 : vector<1x1x128xf32> to vector<1x128xf32>
    %c1_116 = arith.constant 1 : index
    %c0_117 = arith.constant 0 : index
    %c0_118 = arith.constant 0 : index
    %281 = vector.load %arg20[%c1_116, %c0_117, %c0_118] : memref<2x1x128xf32, #tpu.memory_space<vmem>>, vector<1x1x128xf32>
    %282 = vector.shape_cast %281 : vector<1x1x128xf32> to vector<1x128xf32>
    %cst_119 = arith.constant dense<0.000000e+00> : vector<16xf32>
    %283 = vector.multi_reduction <add>, %278, %cst_119 [1] : vector<16x128xf32> to vector<16xf32>
    %284 = vector.shape_cast %283 : vector<16xf32> to vector<16x1xf32>
    %cst_120 = arith.constant 0.010416667 : f32
    %285 = vector.broadcast %cst_120 : f32 to vector<16x1xf32>
    %286 = arith.mulf %284, %285 : vector<16x1xf32>
    %287 = arith.mulf %278, %278 : vector<16x128xf32>
    %cst_121 = arith.constant dense<0.000000e+00> : vector<16xf32>
    %288 = vector.multi_reduction <add>, %287, %cst_121 [1] : vector<16x128xf32> to vector<16xf32>
    %289 = vector.shape_cast %288 : vector<16xf32> to vector<16x1xf32>
    %cst_122 = arith.constant 0.010416667 : f32
    %290 = vector.broadcast %cst_122 : f32 to vector<16x1xf32>
    %291 = arith.mulf %289, %290 : vector<16x1xf32>
    %292 = arith.mulf %286, %286 : vector<16x1xf32>
    %293 = arith.subf %291, %292 : vector<16x1xf32>
    %294 = vector.broadcast %286 : vector<16x1xf32> to vector<16x128xf32>
    %295 = arith.subf %278, %294 : vector<16x128xf32>
    %cst_123 = arith.constant 9.99999974E-6 : f32
    %296 = vector.broadcast %cst_123 : f32 to vector<16x1xf32>
    %297 = arith.addf %293, %296 : vector<16x1xf32>
    %298 = math.rsqrt %297 : vector<16x1xf32>
    %299 = vector.broadcast %298 : vector<16x1xf32> to vector<16x128xf32>
    %300 = arith.mulf %295, %299 : vector<16x128xf32>
    %301 = vector.broadcast %280 : vector<1x128xf32> to vector<16x128xf32>
    %302 = arith.mulf %300, %301 : vector<16x128xf32>
    %303 = vector.broadcast %282 : vector<1x128xf32> to vector<16x128xf32>
    %304 = arith.addf %302, %303 : vector<16x128xf32>
    %305 = arith.truncf %304 : vector<16x128xf32> to vector<16x128xbf16>
    %c1_124 = arith.constant 1 : index
    %c0_125 = arith.constant 0 : index
    %c0_126 = arith.constant 0 : index
    %306 = vector.load %arg15[%c1_124, %c0_125, %c0_126] : memref<2x128x128xbf16, #tpu.memory_space<vmem>>, vector<1x128x128xbf16>
    %307 = vector.shape_cast %306 : vector<1x128x128xbf16> to vector<128x128xbf16>
    %cst_127 = arith.constant dense<0.000000e+00> : vector<16x128xf32>
    %308 = tpu.matmul %305, %307, %cst_127 {dimension_numbers = #tpu.dot_dimension_numbers<[1], [0], [0], [1], [0, 0, 1, 1], [], []>} : vector<16x128xbf16>, vector<128x128xbf16>, vector<16x128xf32> -> vector<16x128xf32>
    %c1_128 = arith.constant 1 : index
    %c0_129 = arith.constant 0 : index
    %c0_130 = arith.constant 0 : index
    %309 = vector.load %arg16[%c1_128, %c0_129, %c0_130] : memref<2x1x128xf32, #tpu.memory_space<vmem>>, vector<1x1x128xf32>
    %310 = vector.shape_cast %309 : vector<1x1x128xf32> to vector<1x128xf32>
    %311 = vector.broadcast %310 : vector<1x128xf32> to vector<16x128xf32>
    %312 = arith.addf %308, %311 : vector<16x128xf32>
    %cst_131 = arith.constant 0.000000e+00 : f32
    %313 = vector.broadcast %cst_131 : f32 to vector<16x128xf32>
    %314 = arith.maximumf %312, %313 : vector<16x128xf32>
    %315 = arith.truncf %314 : vector<16x128xf32> to vector<16x128xbf16>
    %c1_132 = arith.constant 1 : index
    %c0_133 = arith.constant 0 : index
    %c0_134 = arith.constant 0 : index
    %316 = vector.load %arg17[%c1_132, %c0_133, %c0_134] : memref<2x128x128xbf16, #tpu.memory_space<vmem>>, vector<1x128x128xbf16>
    %317 = vector.shape_cast %316 : vector<1x128x128xbf16> to vector<128x128xbf16>
    %cst_135 = arith.constant dense<0.000000e+00> : vector<16x128xf32>
    %318 = tpu.matmul %315, %317, %cst_135 {dimension_numbers = #tpu.dot_dimension_numbers<[1], [0], [0], [1], [0, 0, 1, 1], [], []>} : vector<16x128xbf16>, vector<128x128xbf16>, vector<16x128xf32> -> vector<16x128xf32>
    %c1_136 = arith.constant 1 : index
    %c0_137 = arith.constant 0 : index
    %c0_138 = arith.constant 0 : index
    %319 = vector.load %arg18[%c1_136, %c0_137, %c0_138] : memref<2x1x128xf32, #tpu.memory_space<vmem>>, vector<1x1x128xf32>
    %320 = vector.shape_cast %319 : vector<1x1x128xf32> to vector<1x128xf32>
    %321 = vector.broadcast %320 : vector<1x128xf32> to vector<16x128xf32>
    %322 = arith.addf %318, %321 : vector<16x128xf32>
    %323 = arith.addf %304, %322 : vector<16x128xf32>
    %c1_139 = arith.constant 1 : index
    %c0_140 = arith.constant 0 : index
    %c0_141 = arith.constant 0 : index
    %324 = vector.load %arg21[%c1_139, %c0_140, %c0_141] : memref<2x1x128xf32, #tpu.memory_space<vmem>>, vector<1x1x128xf32>
    %325 = vector.shape_cast %324 : vector<1x1x128xf32> to vector<1x128xf32>
    %c1_142 = arith.constant 1 : index
    %c0_143 = arith.constant 0 : index
    %c0_144 = arith.constant 0 : index
    %326 = vector.load %arg22[%c1_142, %c0_143, %c0_144] : memref<2x1x128xf32, #tpu.memory_space<vmem>>, vector<1x1x128xf32>
    %327 = vector.shape_cast %326 : vector<1x1x128xf32> to vector<1x128xf32>
    %cst_145 = arith.constant dense<0.000000e+00> : vector<16xf32>
    %328 = vector.multi_reduction <add>, %323, %cst_145 [1] : vector<16x128xf32> to vector<16xf32>
    %329 = vector.shape_cast %328 : vector<16xf32> to vector<16x1xf32>
    %cst_146 = arith.constant 0.010416667 : f32
    %330 = vector.broadcast %cst_146 : f32 to vector<16x1xf32>
    %331 = arith.mulf %329, %330 : vector<16x1xf32>
    %332 = arith.mulf %323, %323 : vector<16x128xf32>
    %cst_147 = arith.constant dense<0.000000e+00> : vector<16xf32>
    %333 = vector.multi_reduction <add>, %332, %cst_147 [1] : vector<16x128xf32> to vector<16xf32>
    %334 = vector.shape_cast %333 : vector<16xf32> to vector<16x1xf32>
    %cst_148 = arith.constant 0.010416667 : f32
    %335 = vector.broadcast %cst_148 : f32 to vector<16x1xf32>
    %336 = arith.mulf %334, %335 : vector<16x1xf32>
    %337 = arith.mulf %331, %331 : vector<16x1xf32>
    %338 = arith.subf %336, %337 : vector<16x1xf32>
    %339 = vector.broadcast %331 : vector<16x1xf32> to vector<16x128xf32>
    %340 = arith.subf %323, %339 : vector<16x128xf32>
    %cst_149 = arith.constant 9.99999974E-6 : f32
    %341 = vector.broadcast %cst_149 : f32 to vector<16x1xf32>
    %342 = arith.addf %338, %341 : vector<16x1xf32>
    %343 = math.rsqrt %342 : vector<16x1xf32>
    %344 = vector.broadcast %343 : vector<16x1xf32> to vector<16x128xf32>
    %345 = arith.mulf %340, %344 : vector<16x128xf32>
    %346 = vector.broadcast %325 : vector<1x128xf32> to vector<16x128xf32>
    %347 = arith.mulf %345, %346 : vector<16x128xf32>
    %348 = vector.broadcast %327 : vector<1x128xf32> to vector<16x128xf32>
    %349 = arith.addf %347, %348 : vector<16x128xf32>
    %c0_150 = arith.constant 0 : index
    %c0_151 = arith.constant 0 : index
    %350 = vector.load %arg6[%c0_150, %c0_151] : memref<2x16xf32, #tpu.memory_space<vmem>>, vector<2x16xf32>
    %cst_152 = arith.constant dense<0.000000e+00> : vector<2x128xf32>
    %351 = tpu.matmul %350, %349, %cst_152 {dimension_numbers = #tpu.dot_dimension_numbers<[1], [0], [0], [1], [0, 0, 1, 1], [], []>} : vector<2x16xf32>, vector<16x128xf32>, vector<2x128xf32> -> vector<2x128xf32>
    %352 = arith.truncf %351 : vector<2x128xf32> to vector<2x128xbf16>
    %c0_153 = arith.constant 0 : index
    %c0_154 = arith.constant 0 : index
    %353 = vector.load %arg23[%c0_153, %c0_154] : memref<128x128xbf16, #tpu.memory_space<vmem>>, vector<128x128xbf16>
    %cst_155 = arith.constant dense<0.000000e+00> : vector<2x128xf32>
    %354 = tpu.matmul %352, %353, %cst_155 {dimension_numbers = #tpu.dot_dimension_numbers<[1], [0], [0], [1], [0, 0, 1, 1], [], []>} : vector<2x128xbf16>, vector<128x128xbf16>, vector<2x128xf32> -> vector<2x128xf32>
    %c0_156 = arith.constant 0 : index
    %c0_157 = arith.constant 0 : index
    %355 = vector.load %arg24[%c0_156, %c0_157] : memref<1x128xf32, #tpu.memory_space<vmem>>, vector<1x128xf32>
    %356 = vector.broadcast %355 : vector<1x128xf32> to vector<2x128xf32>
    %357 = arith.addf %354, %356 : vector<2x128xf32>
    %358 = arith.truncf %349 : vector<16x128xf32> to vector<16x128xbf16>
    %c0_158 = arith.constant 0 : index
    %c0_159 = arith.constant 0 : index
    %359 = vector.load %arg25[%c0_158, %c0_159] : memref<128x256xbf16, #tpu.memory_space<vmem>>, vector<128x256xbf16>
    %cst_160 = arith.constant dense<0.000000e+00> : vector<16x256xf32>
    %360 = tpu.matmul %358, %359, %cst_160 {dimension_numbers = #tpu.dot_dimension_numbers<[1], [0], [0], [1], [0, 0, 1, 1], [], []>} : vector<16x128xbf16>, vector<128x256xbf16>, vector<16x256xf32> -> vector<16x256xf32>
    %c0_161 = arith.constant 0 : index
    %c0_162 = arith.constant 0 : index
    %361 = vector.load %arg26[%c0_161, %c0_162] : memref<1x256xf32, #tpu.memory_space<vmem>>, vector<1x256xf32>
    %362 = vector.broadcast %361 : vector<1x256xf32> to vector<16x256xf32>
    %363 = arith.addf %360, %362 : vector<16x256xf32>
    %364 = vector.extract_strided_slice %363 {offsets = [0, 0], sizes = [16, 128], strides = [1, 1]} : vector<16x256xf32> to vector<16x128xf32>
    %365 = vector.extract_strided_slice %363 {offsets = [0, 128], sizes = [16, 128], strides = [1, 1]} : vector<16x256xf32> to vector<16x128xf32>
    %c0_163 = arith.constant 0 : index
    %c0_164 = arith.constant 0 : index
    %366 = vector.load %arg5[%c0_163, %c0_164] : memref<2x16xf32, #tpu.memory_space<vmem>>, vector<2x16xf32>
    %367 = arith.truncf %357 : vector<2x128xf32> to vector<2x128xbf16>
    %368 = arith.truncf %364 : vector<16x128xf32> to vector<16x128xbf16>
    %369 = arith.truncf %365 : vector<16x128xf32> to vector<16x128xbf16>
    %370 = vector.extract_strided_slice %367 {offsets = [0, 0], sizes = [2, 32], strides = [1, 1]} : vector<2x128xbf16> to vector<2x32xbf16>
    %371 = vector.extract_strided_slice %368 {offsets = [0, 0], sizes = [16, 32], strides = [1, 1]} : vector<16x128xbf16> to vector<16x32xbf16>
    %cst_165 = arith.constant dense<0.000000e+00> : vector<2x16xf32>
    %372 = tpu.matmul %370, %371, %cst_165 {dimension_numbers = #tpu.dot_dimension_numbers<[1], [1], [0], [0], [0, 0, 1, 0], [], []>} : vector<2x32xbf16>, vector<16x32xbf16>, vector<2x16xf32> -> vector<2x16xf32>
    %373 = arith.addf %372, %366 : vector<2x16xf32>
    %cst_166 = arith.constant dense<0xFF800000> : vector<2xf32>
    %374 = vector.multi_reduction <maximumf>, %373, %cst_166 [1] : vector<2x16xf32> to vector<2xf32>
    %375 = vector.shape_cast %374 : vector<2xf32> to vector<2x1xf32>
    %376 = vector.broadcast %375 : vector<2x1xf32> to vector<2x16xf32>
    %377 = arith.subf %373, %376 : vector<2x16xf32>
    %378 = math.exp %377 : vector<2x16xf32>
    %cst_167 = arith.constant dense<0.000000e+00> : vector<2xf32>
    %379 = vector.multi_reduction <add>, %378, %cst_167 [1] : vector<2x16xf32> to vector<2xf32>
    %380 = vector.shape_cast %379 : vector<2xf32> to vector<2x1xf32>
    %381 = tpu.reciprocal %380 {approx = true} : vector<2x1xf32> -> vector<2x1xf32>
    %382 = arith.truncf %378 : vector<2x16xf32> to vector<2x16xbf16>
    %383 = vector.extract_strided_slice %369 {offsets = [0, 0], sizes = [16, 32], strides = [1, 1]} : vector<16x128xbf16> to vector<16x32xbf16>
    %cst_168 = arith.constant dense<0.000000e+00> : vector<2x32xf32>
    %384 = tpu.matmul %382, %383, %cst_168 {dimension_numbers = #tpu.dot_dimension_numbers<[1], [0], [0], [1], [0, 0, 1, 1], [], []>} : vector<2x16xbf16>, vector<16x32xbf16>, vector<2x32xf32> -> vector<2x32xf32>
    %385 = vector.broadcast %381 : vector<2x1xf32> to vector<2x32xf32>
    %386 = arith.mulf %384, %385 : vector<2x32xf32>
    %387 = vector.extract_strided_slice %367 {offsets = [0, 32], sizes = [2, 32], strides = [1, 1]} : vector<2x128xbf16> to vector<2x32xbf16>
    %388 = vector.extract_strided_slice %368 {offsets = [0, 32], sizes = [16, 32], strides = [1, 1]} : vector<16x128xbf16> to vector<16x32xbf16>
    %cst_169 = arith.constant dense<0.000000e+00> : vector<2x16xf32>
    %389 = tpu.matmul %387, %388, %cst_169 {dimension_numbers = #tpu.dot_dimension_numbers<[1], [1], [0], [0], [0, 0, 1, 0], [], []>} : vector<2x32xbf16>, vector<16x32xbf16>, vector<2x16xf32> -> vector<2x16xf32>
    %390 = arith.addf %389, %366 : vector<2x16xf32>
    %cst_170 = arith.constant dense<0xFF800000> : vector<2xf32>
    %391 = vector.multi_reduction <maximumf>, %390, %cst_170 [1] : vector<2x16xf32> to vector<2xf32>
    %392 = vector.shape_cast %391 : vector<2xf32> to vector<2x1xf32>
    %393 = vector.broadcast %392 : vector<2x1xf32> to vector<2x16xf32>
    %394 = arith.subf %390, %393 : vector<2x16xf32>
    %395 = math.exp %394 : vector<2x16xf32>
    %cst_171 = arith.constant dense<0.000000e+00> : vector<2xf32>
    %396 = vector.multi_reduction <add>, %395, %cst_171 [1] : vector<2x16xf32> to vector<2xf32>
    %397 = vector.shape_cast %396 : vector<2xf32> to vector<2x1xf32>
    %398 = tpu.reciprocal %397 {approx = true} : vector<2x1xf32> -> vector<2x1xf32>
    %399 = arith.truncf %395 : vector<2x16xf32> to vector<2x16xbf16>
    %400 = vector.extract_strided_slice %369 {offsets = [0, 32], sizes = [16, 32], strides = [1, 1]} : vector<16x128xbf16> to vector<16x32xbf16>
    %cst_172 = arith.constant dense<0.000000e+00> : vector<2x32xf32>
    %401 = tpu.matmul %399, %400, %cst_172 {dimension_numbers = #tpu.dot_dimension_numbers<[1], [0], [0], [1], [0, 0, 1, 1], [], []>} : vector<2x16xbf16>, vector<16x32xbf16>, vector<2x32xf32> -> vector<2x32xf32>
    %402 = vector.broadcast %398 : vector<2x1xf32> to vector<2x32xf32>
    %403 = arith.mulf %401, %402 : vector<2x32xf32>
    %404 = vector.extract_strided_slice %367 {offsets = [0, 64], sizes = [2, 32], strides = [1, 1]} : vector<2x128xbf16> to vector<2x32xbf16>
    %405 = vector.extract_strided_slice %368 {offsets = [0, 64], sizes = [16, 32], strides = [1, 1]} : vector<16x128xbf16> to vector<16x32xbf16>
    %cst_173 = arith.constant dense<0.000000e+00> : vector<2x16xf32>
    %406 = tpu.matmul %404, %405, %cst_173 {dimension_numbers = #tpu.dot_dimension_numbers<[1], [1], [0], [0], [0, 0, 1, 0], [], []>} : vector<2x32xbf16>, vector<16x32xbf16>, vector<2x16xf32> -> vector<2x16xf32>
    %407 = arith.addf %406, %366 : vector<2x16xf32>
    %cst_174 = arith.constant dense<0xFF800000> : vector<2xf32>
    %408 = vector.multi_reduction <maximumf>, %407, %cst_174 [1] : vector<2x16xf32> to vector<2xf32>
    %409 = vector.shape_cast %408 : vector<2xf32> to vector<2x1xf32>
    %410 = vector.broadcast %409 : vector<2x1xf32> to vector<2x16xf32>
    %411 = arith.subf %407, %410 : vector<2x16xf32>
    %412 = math.exp %411 : vector<2x16xf32>
    %cst_175 = arith.constant dense<0.000000e+00> : vector<2xf32>
    %413 = vector.multi_reduction <add>, %412, %cst_175 [1] : vector<2x16xf32> to vector<2xf32>
    %414 = vector.shape_cast %413 : vector<2xf32> to vector<2x1xf32>
    %415 = tpu.reciprocal %414 {approx = true} : vector<2x1xf32> -> vector<2x1xf32>
    %416 = arith.truncf %412 : vector<2x16xf32> to vector<2x16xbf16>
    %417 = vector.extract_strided_slice %369 {offsets = [0, 64], sizes = [16, 32], strides = [1, 1]} : vector<16x128xbf16> to vector<16x32xbf16>
    %cst_176 = arith.constant dense<0.000000e+00> : vector<2x32xf32>
    %418 = tpu.matmul %416, %417, %cst_176 {dimension_numbers = #tpu.dot_dimension_numbers<[1], [0], [0], [1], [0, 0, 1, 1], [], []>} : vector<2x16xbf16>, vector<16x32xbf16>, vector<2x32xf32> -> vector<2x32xf32>
    %419 = vector.broadcast %415 : vector<2x1xf32> to vector<2x32xf32>
    %420 = arith.mulf %418, %419 : vector<2x32xf32>
    %421 = vector.extract_strided_slice %367 {offsets = [0, 96], sizes = [2, 32], strides = [1, 1]} : vector<2x128xbf16> to vector<2x32xbf16>
    %422 = vector.extract_strided_slice %368 {offsets = [0, 96], sizes = [16, 32], strides = [1, 1]} : vector<16x128xbf16> to vector<16x32xbf16>
    %cst_177 = arith.constant dense<0.000000e+00> : vector<2x16xf32>
    %423 = tpu.matmul %421, %422, %cst_177 {dimension_numbers = #tpu.dot_dimension_numbers<[1], [1], [0], [0], [0, 0, 1, 0], [], []>} : vector<2x32xbf16>, vector<16x32xbf16>, vector<2x16xf32> -> vector<2x16xf32>
    %424 = arith.addf %423, %366 : vector<2x16xf32>
    %cst_178 = arith.constant dense<0xFF800000> : vector<2xf32>
    %425 = vector.multi_reduction <maximumf>, %424, %cst_178 [1] : vector<2x16xf32> to vector<2xf32>
    %426 = vector.shape_cast %425 : vector<2xf32> to vector<2x1xf32>
    %427 = vector.broadcast %426 : vector<2x1xf32> to vector<2x16xf32>
    %428 = arith.subf %424, %427 : vector<2x16xf32>
    %429 = math.exp %428 : vector<2x16xf32>
    %cst_179 = arith.constant dense<0.000000e+00> : vector<2xf32>
    %430 = vector.multi_reduction <add>, %429, %cst_179 [1] : vector<2x16xf32> to vector<2xf32>
    %431 = vector.shape_cast %430 : vector<2xf32> to vector<2x1xf32>
    %432 = tpu.reciprocal %431 {approx = true} : vector<2x1xf32> -> vector<2x1xf32>
    %433 = arith.truncf %429 : vector<2x16xf32> to vector<2x16xbf16>
    %434 = vector.extract_strided_slice %369 {offsets = [0, 96], sizes = [16, 32], strides = [1, 1]} : vector<16x128xbf16> to vector<16x32xbf16>
    %cst_180 = arith.constant dense<0.000000e+00> : vector<2x32xf32>
    %435 = tpu.matmul %433, %434, %cst_180 {dimension_numbers = #tpu.dot_dimension_numbers<[1], [0], [0], [1], [0, 0, 1, 1], [], []>} : vector<2x16xbf16>, vector<16x32xbf16>, vector<2x32xf32> -> vector<2x32xf32>
    %436 = vector.broadcast %432 : vector<2x1xf32> to vector<2x32xf32>
    %437 = arith.mulf %435, %436 : vector<2x32xf32>
    %438 = tpu.concatenate %386, %403, %420, %437 in 1 : vector<2x32xf32>, vector<2x32xf32>, vector<2x32xf32>, vector<2x32xf32> -> vector<2x128xf32>
    %439 = arith.truncf %438 : vector<2x128xf32> to vector<2x128xbf16>
    %c0_181 = arith.constant 0 : index
    %c0_182 = arith.constant 0 : index
    %440 = vector.load %arg27[%c0_181, %c0_182] : memref<128x128xbf16, #tpu.memory_space<vmem>>, vector<128x128xbf16>
    %cst_183 = arith.constant dense<0.000000e+00> : vector<2x128xf32>
    %441 = tpu.matmul %439, %440, %cst_183 {dimension_numbers = #tpu.dot_dimension_numbers<[1], [0], [0], [1], [0, 0, 1, 1], [], []>} : vector<2x128xbf16>, vector<128x128xbf16>, vector<2x128xf32> -> vector<2x128xf32>
    %c0_184 = arith.constant 0 : index
    %c0_185 = arith.constant 0 : index
    %442 = vector.load %arg28[%c0_184, %c0_185] : memref<1x128xf32, #tpu.memory_space<vmem>>, vector<1x128xf32>
    %443 = vector.broadcast %442 : vector<1x128xf32> to vector<2x128xf32>
    %444 = arith.addf %441, %443 : vector<2x128xf32>
    %445 = arith.truncf %444 : vector<2x128xf32> to vector<2x128xbf16>
    %c0_186 = arith.constant 0 : index
    %c0_187 = arith.constant 0 : index
    %446 = vector.load %arg29[%c0_186, %c0_187] : memref<128x128xbf16, #tpu.memory_space<vmem>>, vector<128x128xbf16>
    %cst_188 = arith.constant dense<0.000000e+00> : vector<2x128xf32>
    %447 = tpu.matmul %445, %446, %cst_188 {dimension_numbers = #tpu.dot_dimension_numbers<[1], [0], [0], [1], [0, 0, 1, 1], [], []>} : vector<2x128xbf16>, vector<128x128xbf16>, vector<2x128xf32> -> vector<2x128xf32>
    %c0_189 = arith.constant 0 : index
    %c0_190 = arith.constant 0 : index
    %448 = vector.load %arg30[%c0_189, %c0_190] : memref<1x128xf32, #tpu.memory_space<vmem>>, vector<1x128xf32>
    %449 = vector.broadcast %448 : vector<1x128xf32> to vector<2x128xf32>
    %450 = arith.addf %447, %449 : vector<2x128xf32>
    %cst_191 = arith.constant 0.000000e+00 : f32
    %451 = vector.broadcast %cst_191 : f32 to vector<2x128xf32>
    %452 = arith.cmpf oge, %450, %451 : vector<2x128xf32>
    %cst_192 = arith.constant 0.00999999977 : f32
    %453 = vector.broadcast %cst_192 : f32 to vector<2x128xf32>
    %454 = arith.mulf %453, %450 : vector<2x128xf32>
    %455 = arith.select %452, %450, %454 : vector<2x128xi1>, vector<2x128xf32>
    %456 = arith.truncf %455 : vector<2x128xf32> to vector<2x128xbf16>
    %c0_193 = arith.constant 0 : index
    %c0_194 = arith.constant 0 : index
    %457 = vector.load %arg31[%c0_193, %c0_194] : memref<128x1xbf16, #tpu.memory_space<vmem>>, vector<128x1xbf16>
    %cst_195 = arith.constant dense<0.000000e+00> : vector<2x1xf32>
    %458 = tpu.matmul %456, %457, %cst_195 {dimension_numbers = #tpu.dot_dimension_numbers<[1], [0], [0], [1], [0, 0, 1, 1], [], []>} : vector<2x128xbf16>, vector<128x1xbf16>, vector<2x1xf32> -> vector<2x1xf32>
    %c0_196 = arith.constant 0 : index
    %c0_197 = arith.constant 0 : index
    %459 = vector.load %arg32[%c0_196, %c0_197] : memref<1x1xf32, #tpu.memory_space<vmem>>, vector<1x1xf32>
    %460 = vector.broadcast %459 : vector<1x1xf32> to vector<2x1xf32>
    %461 = arith.addf %458, %460 : vector<2x1xf32>
    %c0_198 = arith.constant 0 : index
    %c0_199 = arith.constant 0 : index
    %462 = vector.load %arg33[%c0_198, %c0_199] : memref<2x1xf32, #tpu.memory_space<vmem>>, vector<2x1xf32>
    tpu.vector_store %arg33[%c0_198, %c0_199], %461 {strides = array<i32>} : memref<2x1xf32, #tpu.memory_space<vmem>>, vector<2x1xf32>,
    return
  }
  func.func @transform_0(%arg0: i32) -> (i32, i32, i32) {
    %c0_i32 = arith.constant 0 : i32
    %c0_i32_0 = arith.constant 0 : i32
    %c0_i32_1 = arith.constant 0 : i32
    return %arg0, %c0_i32, %c0_i32_0 : i32, i32, i32
  }
  func.func @transform_1(%arg0: i32) -> (i32, i32) {
    %c0_i32 = arith.constant 0 : i32
    %c0_i32_0 = arith.constant 0 : i32
    %c0_i32_1 = arith.constant 0 : i32
    return %c0_i32, %c0_i32_0 : i32, i32
  }
  func.func @transform_2(%arg0: i32) -> (i32, i32) {
    %c0_i32 = arith.constant 0 : i32
    %c0_i32_0 = arith.constant 0 : i32
    %c0_i32_1 = arith.constant 0 : i32
    return %c0_i32, %c0_i32_0 : i32, i32
  }
  func.func @transform_3(%arg0: i32) -> (i32, i32) {
    %c0_i32 = arith.constant 0 : i32
    %c0_i32_0 = arith.constant 0 : i32
    %c0_i32_1 = arith.constant 0 : i32
    return %c0_i32, %c0_i32_0 : i32, i32
  }
  func.func @transform_4(%arg0: i32) -> (i32, i32) {
    %c0_i32 = arith.constant 0 : i32
    %c0_i32_0 = arith.constant 0 : i32
    %c0_i32_1 = arith.constant 0 : i32
    return %c0_i32, %c0_i32_0 : i32, i32
  }
  func.func @transform_5(%arg0: i32) -> (i32, i32) {
    %c0_i32 = arith.constant 0 : i32
    %c0_i32_0 = arith.constant 0 : i32
    %c0_i32_1 = arith.constant 0 : i32
    return %c0_i32, %c0_i32_0 : i32, i32
  }
  func.func @transform_6(%arg0: i32) -> (i32, i32) {
    %c0_i32 = arith.constant 0 : i32
    %c0_i32_0 = arith.constant 0 : i32
    %c0_i32_1 = arith.constant 0 : i32
    return %c0_i32, %c0_i32_0 : i32, i32
  }
  func.func @transform_7(%arg0: i32) -> (i32, i32) {
    %c0_i32 = arith.constant 0 : i32
    %c0_i32_0 = arith.constant 0 : i32
    %c0_i32_1 = arith.constant 0 : i32
    return %c0_i32, %c0_i32_0 : i32, i32
  }
  func.func @transform_8(%arg0: i32) -> (i32, i32) {
    %c0_i32 = arith.constant 0 : i32
    %c0_i32_0 = arith.constant 0 : i32
    %c0_i32_1 = arith.constant 0 : i32
    return %c0_i32, %c0_i32_0 : i32, i32
  }
  func.func @transform_9(%arg0: i32) -> (i32, i32) {
    %c0_i32 = arith.constant 0 : i32
    %c0_i32_0 = arith.constant 0 : i32
    %c0_i32_1 = arith.constant 0 : i32
    return %c0_i32, %c0_i32_0 : i32, i32
  }
  func.func @transform_10(%arg0: i32) -> (i32, i32, i32) {
    %c0_i32 = arith.constant 0 : i32
    %c0_i32_0 = arith.constant 0 : i32
    %c0_i32_1 = arith.constant 0 : i32
    %c0_i32_2 = arith.constant 0 : i32
    return %c0_i32, %c0_i32_0, %c0_i32_1 : i32, i32, i32
  }
  func.func @transform_11(%arg0: i32) -> (i32, i32, i32) {
    %c0_i32 = arith.constant 0 : i32
    %c0_i32_0 = arith.constant 0 : i32
    %c0_i32_1 = arith.constant 0 : i32
    %c0_i32_2 = arith.constant 0 : i32
    return %c0_i32, %c0_i32_0, %c0_i32_1 : i32, i32, i32
  }
  func.func @transform_12(%arg0: i32) -> (i32, i32, i32) {
    %c0_i32 = arith.constant 0 : i32
    %c0_i32_0 = arith.constant 0 : i32
    %c0_i32_1 = arith.constant 0 : i32
    %c0_i32_2 = arith.constant 0 : i32
    return %c0_i32, %c0_i32_0, %c0_i32_1 : i32, i32, i32
  }
  func.func @transform_13(%arg0: i32) -> (i32, i32, i32) {
    %c0_i32 = arith.constant 0 : i32
    %c0_i32_0 = arith.constant 0 : i32
    %c0_i32_1 = arith.constant 0 : i32
    %c0_i32_2 = arith.constant 0 : i32
    return %c0_i32, %c0_i32_0, %c0_i32_1 : i32, i32, i32
  }
  func.func @transform_14(%arg0: i32) -> (i32, i32, i32) {
    %c0_i32 = arith.constant 0 : i32
    %c0_i32_0 = arith.constant 0 : i32
    %c0_i32_1 = arith.constant 0 : i32
    %c0_i32_2 = arith.constant 0 : i32
    return %c0_i32, %c0_i32_0, %c0_i32_1 : i32, i32, i32
  }
  func.func @transform_15(%arg0: i32) -> (i32, i32, i32) {
    %c0_i32 = arith.constant 0 : i32
    %c0_i32_0 = arith.constant 0 : i32
    %c0_i32_1 = arith.constant 0 : i32
    %c0_i32_2 = arith.constant 0 : i32
    return %c0_i32, %c0_i32_0, %c0_i32_1 : i32, i32, i32
  }
  func.func @transform_16(%arg0: i32) -> (i32, i32, i32) {
    %c0_i32 = arith.constant 0 : i32
    %c0_i32_0 = arith.constant 0 : i32
    %c0_i32_1 = arith.constant 0 : i32
    %c0_i32_2 = arith.constant 0 : i32
    return %c0_i32, %c0_i32_0, %c0_i32_1 : i32, i32, i32
  }
  func.func @transform_17(%arg0: i32) -> (i32, i32, i32) {
    %c0_i32 = arith.constant 0 : i32
    %c0_i32_0 = arith.constant 0 : i32
    %c0_i32_1 = arith.constant 0 : i32
    %c0_i32_2 = arith.constant 0 : i32
    return %c0_i32, %c0_i32_0, %c0_i32_1 : i32, i32, i32
  }
  func.func @transform_18(%arg0: i32) -> (i32, i32, i32) {
    %c0_i32 = arith.constant 0 : i32
    %c0_i32_0 = arith.constant 0 : i32
    %c0_i32_1 = arith.constant 0 : i32
    %c0_i32_2 = arith.constant 0 : i32
    return %c0_i32, %c0_i32_0, %c0_i32_1 : i32, i32, i32
  }
  func.func @transform_19(%arg0: i32) -> (i32, i32, i32) {
    %c0_i32 = arith.constant 0 : i32
    %c0_i32_0 = arith.constant 0 : i32
    %c0_i32_1 = arith.constant 0 : i32
    %c0_i32_2 = arith.constant 0 : i32
    return %c0_i32, %c0_i32_0, %c0_i32_1 : i32, i32, i32
  }
  func.func @transform_20(%arg0: i32) -> (i32, i32, i32) {
    %c0_i32 = arith.constant 0 : i32
    %c0_i32_0 = arith.constant 0 : i32
    %c0_i32_1 = arith.constant 0 : i32
    %c0_i32_2 = arith.constant 0 : i32
    return %c0_i32, %c0_i32_0, %c0_i32_1 : i32, i32, i32
  }
  func.func @transform_21(%arg0: i32) -> (i32, i32, i32) {
    %c0_i32 = arith.constant 0 : i32
    %c0_i32_0 = arith.constant 0 : i32
    %c0_i32_1 = arith.constant 0 : i32
    %c0_i32_2 = arith.constant 0 : i32
    return %c0_i32, %c0_i32_0, %c0_i32_1 : i32, i32, i32
  }
  func.func @transform_22(%arg0: i32) -> (i32, i32) {
    %c0_i32 = arith.constant 0 : i32
    %c0_i32_0 = arith.constant 0 : i32
    %c0_i32_1 = arith.constant 0 : i32
    return %c0_i32, %c0_i32_0 : i32, i32
  }
  func.func @transform_23(%arg0: i32) -> (i32, i32) {
    %c0_i32 = arith.constant 0 : i32
    %c0_i32_0 = arith.constant 0 : i32
    %c0_i32_1 = arith.constant 0 : i32
    return %c0_i32, %c0_i32_0 : i32, i32
  }
  func.func @transform_24(%arg0: i32) -> (i32, i32) {
    %c0_i32 = arith.constant 0 : i32
    %c0_i32_0 = arith.constant 0 : i32
    %c0_i32_1 = arith.constant 0 : i32
    return %c0_i32, %c0_i32_0 : i32, i32
  }
  func.func @transform_25(%arg0: i32) -> (i32, i32) {
    %c0_i32 = arith.constant 0 : i32
    %c0_i32_0 = arith.constant 0 : i32
    %c0_i32_1 = arith.constant 0 : i32
    return %c0_i32, %c0_i32_0 : i32, i32
  }
  func.func @transform_26(%arg0: i32) -> (i32, i32) {
    %c0_i32 = arith.constant 0 : i32
    %c0_i32_0 = arith.constant 0 : i32
    %c0_i32_1 = arith.constant 0 : i32
    return %c0_i32, %c0_i32_0 : i32, i32
  }
  func.func @transform_27(%arg0: i32) -> (i32, i32) {
    %c0_i32 = arith.constant 0 : i32
    %c0_i32_0 = arith.constant 0 : i32
    %c0_i32_1 = arith.constant 0 : i32
    return %c0_i32, %c0_i32_0 : i32, i32
  }
  func.func @transform_28(%arg0: i32) -> (i32, i32) {
    %c0_i32 = arith.constant 0 : i32
    %c0_i32_0 = arith.constant 0 : i32
    %c0_i32_1 = arith.constant 0 : i32
    return %c0_i32, %c0_i32_0 : i32, i32
  }
  func.func @transform_29(%arg0: i32) -> (i32, i32) {
    %c0_i32 = arith.constant 0 : i32
    %c0_i32_0 = arith.constant 0 : i32
    %c0_i32_1 = arith.constant 0 : i32
    return %c0_i32, %c0_i32_0 : i32, i32
  }
  func.func @transform_30(%arg0: i32) -> (i32, i32) {
    %c0_i32 = arith.constant 0 : i32
    %c0_i32_0 = arith.constant 0 : i32
    %c0_i32_1 = arith.constant 0 : i32
    return %c0_i32, %c0_i32_0 : i32, i32
  }
  func.func @transform_31(%arg0: i32) -> (i32, i32) {
    %c0_i32 = arith.constant 0 : i32
    %c0_i32_0 = arith.constant 0 : i32
    %c0_i32_1 = arith.constant 0 : i32
    return %c0_i32, %c0_i32_0 : i32, i32
  }
  func.func @transform_32(%arg0: i32) -> (i32, i32) {
    %c0_i32 = arith.constant 0 : i32
    %c0_i32_0 = arith.constant 0 : i32
    return %arg0, %c0_i32 : i32, i32
  }
}

</mosaic_0001>

<bundles_post_ra>
// kernel: transformer_forward.1
= control target key start
LH: loop header
LB: loop body
LE: loop exit
PB: predicated region body
PF: predicated region fallthrough
CT: control target
= control target key end

     0   :  { %v5185_v0 = vmov 0.0   ;;  %s5186_s3 = smov 6   ;;  %vm5187_vm0 = vmmov 0   ;;  %vm152_vm1 = vcmask 1043456   ;;  %vm148_vm2 = vcmask 64512   ;;  %s5189_s10 = smov 8   ;;  %s6070_s0 = inlined_call_operand.smem [shape: u32[33], index: -1, kind: input, shape index: {}] }
   0x1   :  { %4441 = vmatprep.subr.bf16.mxu0 %v5185_v0  ;;  %s3964_s6 = sld [smem:[%s6070_s0 + %s5186_s3]]   ;;  %4443 = vmatprep.mubr.msk.bf16.mxu0 %vm5187_vm0, %v5185_v0  ;;  %v5188_v6 = vmov 0   ;;  %s5190_s14 = smov 7   ;;  %v203_v14 = vlaneseq  ;;  %vm247_vm7 = vcmask 261120   ;;  %vm253_vm8 = vcmask 785408  }
   0x2   :  { %s1_s9 = sld [smem:[%s6070_s0]]   ;;  %356 = vmatprep.subr.bf16.mxu1 %v5188_v6  ;;  %s5191_s18 = smov 1   ;;  %vm250_vm9 = vcmask 523264   ;;  %vm711_vm10 = vcmask 130048   ;;  %vm3216_vm11 = vcmask 123904   ;;  %vm3953_vm13 = vcmask 1024  }
   0x3   :  { %s5241_s13 = sld [smem:[%s6070_s0 + %s5189_s10]]   ;;  %s5192_s22 = smov 2   ;;  %v5271_v21 = vshrl.u32 %v203_v14, 7 }
   0x4   :  { %s3965_s17 = sld [smem:[%s6070_s0 + %s5190_s14]]   ;;  %s5193_s26 = smov 64  }
   0x5   :  { %s3959_s21 = sld [smem:[%s6070_s0 + %s5191_s18]]   ;;  %vm210_vm3 = vcmp.lt.s32.totalorder %v5271_v21, 1  ;;  %vm215_vm4 = vcmp.lt.s32.totalorder %v5271_v21, 7  ;;  %vm220_vm5 = vcmp.lt.s32.totalorder %v5271_v21, 6  ;;  %vm205_vm6 = vcmp.lt.s32.totalorder %v5271_v21, 2  ;;  %s5194_s27 = smov 32  }
   0x6   :  { %s5268_s25 = sld [smem:[%s6070_s0 + %s5192_s22]]   ;;  %s5195_s28 = smov 10  }
   0x7   :  { %v140_v1 = vld [vmem:[%s3964_s6] sm:$0xf]  ;;  %s5296_s1 = sld [smem:[%s6070_s0 + %s5195_s28]]   ;;  %s5196_s2 = smov 96  }
   0x8   :  { %v137_v2 = vld [vmem:[%s1_s9] sm:$0xff]  ;;  %v138_v3 = vld [vmem:[%s1_s9 + $0x8] sm:$0xff]  ;;  %v154_v4 = vsel %vm152_vm1, %v140_v1, 0  ;;  %s5197_s3 = smov 9   ;;  %s5198_s7 = smov 11  }
   0x9   :  { %v139_v5 = vpack.c.bf16 %v138_v3, %v137_v2  ;;  %4442 = vmatpush3.bf16.msra.mxu0 %v154_v4  ;;  %v4909_v7 = vld [vmem:[%s5241_s13] sm:$0xff]   ;;  %v4910_v8 = vld [vmem:[%s5241_s13 + $0x8] sm:$0xff]   ;;  %v4911_v9 = vld [vmem:[%s5241_s13 + $0x10] sm:$0xff]   ;;  %s3967_s6 = sld [smem:[%s6070_s0 + %s5197_s3]]   ;;  %s5199_s11 = smov 3  }
   0xa   :  { %357 = vmatpush1.bf16.msra.mxu1 %v4909_v7  ;;  %v4912_v10 = vld [vmem:[%s5241_s13 + $0x18] sm:$0xff]   ;;  %v4913_v11 = vld [vmem:[%s5241_s13 + $0x20] sm:$0xff]   ;;  %v4914_v12 = vld [vmem:[%s5241_s13 + $0x28] sm:$0xff]   ;;  %s5362_s10 = sld [smem:[%s6070_s0 + %s5198_s7]]   ;;  %s5200_s15 = smov 12  }
   0xb   :  { %358 = vmatprep.subr.bf16.mxu1 %v5188_v6  ;;  %v4915_v13 = vld [vmem:[%s5241_s13 + $0x30] sm:$0xff]   ;;  %v4916_v15 = vld [vmem:[%s5241_s13 + $0x38] sm:$0xff]   ;;  %v3991_v16 = vld [vmem:[%s3965_s17] ss:$0 sm:$0xff]  ;;  %s5391_s14 = sld [smem:[%s6070_s0 + %s5199_s11]]   ;;  %s5201_s19 = smov 13  }
   0xc   :  { %4444 = vmatmul.mubr.msk.bf16.vlgmr.msra.gmra.mrb[0].mxu0 %vm148_vm2, %v139_v5  ;;  %v197_v18 = vld [vmem:[%s3959_s21] sm:$0xff]  ;;  %v198_v23 = vld [vmem:[%s3959_s21 + $0x8] sm:$0xff]  ;;  %v259_v36 = vld [vmem:[%s5268_s25 + $0x18] sm:$0xff]  ;;  %s5478_s18 = sld [smem:[%s6070_s0 + %s5200_s15]]   ;;  %s5202_s23 = smov 14  }
   0xd   :  { %609 = vmatprep.mubr.bf16.mxu0 %v5188_v6  ;;  %v4917_v27 = vld [vmem:[%s5241_s13 + $0x40] sm:$0xff]   ;;  %v257_v32 = vld [vmem:[%s5268_s25 + $0x8] sm:$0xff]  ;;  %v4925_v56 = vld [vmem:[%s5296_s1 + $0x30] ss:$12 sps:$4 sm:$0xff]   ;;  %s5511_s22 = sld [smem:[%s6070_s0 + %s5201_s19]]   ;;  %s5203_s29 = smov 16  }
   0xe   :  { %359 = vmatpush1.bf16.msra.mxu1 %v4910_v8  ;;  %v4918_v38 = vld [vmem:[%s5241_s13 + $0x48] sm:$0xff]   ;;  %v4921_v52 = vld [vmem:[%s5296_s1 + $0x4] ss:$12 sps:$4 sm:$0xff]   ;;  %v4927_v55 = vld [vmem:[%s5296_s1 + $0x34] ss:$12 sps:$4 sm:$0xff]   ;;  %s5529_s28 = sld [smem:[%s6070_s0 + %s5202_s23]]   ;;  %s5204_s5 = smov 18  }
   0xf   :  { %360 = vmatprep.subr.bf16.mxu1 %v5188_v6  ;;  %v4919_v51 = vld [vmem:[%s5296_s1] ss:$12 sps:$4 sm:$0xff]   ;;  %v4924_v53 = vld [vmem:[%s5296_s1 + $0x1c] ss:$12 sps:$4 sm:$0xff]   ;;  %577 = vmatprep.subr.bf16.mxu0 %v4921_v52  ;;  %v4922_v54 = vld [vmem:[%s5296_s1 + $0x18] ss:$12 sps:$4 sm:$0xff]   ;;  %s5549_s4 = sld [smem:[%s6070_s0 + %s5203_s29]]  }
  0x10   :  { %578 = vmatpush1.bf16.msra.mxu0 %v4919_v51  ;;  %v4930_v57 = vld [vmem:[%s5296_s1 + $0x4c] ss:$12 sps:$4 sm:$0xff]   ;;  %v4928_v58 = vld [vmem:[%s5296_s1 + $0x48] ss:$12 sps:$4 sm:$0xff]   ;;  %v4933_v59 = vld [vmem:[%s5296_s1 + $0x64] ss:$12 sps:$4 sm:$0xff]   ;;  %s5566_s8 = sld [smem:[%s6070_s0 + %s5204_s5]]  }
  0x11   :  { %579 = vmatprep.subr.bf16.mxu0 %v4924_v53  ;;  %v4931_v60 = vld [vmem:[%s5296_s1 + $0x60] ss:$12 sps:$4 sm:$0xff]   ;;  %v4936_v61 = vld [vmem:[%s5296_s1 + $0x7c] ss:$12 sps:$4 sm:$0xff]   ;;  %v4934_v62 = vld [vmem:[%s5296_s1 + $0x78] ss:$12 sps:$4 sm:$0xff]   ;;  %s3990_s29 = sld [smem:[%s6070_s0 + %s5194_s27]]  }
  0x12   :  { %361 = vmatpush1.bf16.msra.mxu1 %v4911_v9  ;;  %v4939_v63 = vld [vmem:[%s5296_s1 + $0x94] ss:$12 sps:$4 sm:$0xff]   ;;  %v4937_v1 = vld [vmem:[%s5296_s1 + $0x90] ss:$12 sps:$4 sm:$0xff]   ;;  %s5205_s9 = smov 19   ;;  %s5206_s15 = smov 15  }
  0x13   :  { %362 = vmatprep.subr.bf16.mxu1 %v5188_v6  ;;  %s5571_s13 = sld [smem:[%s6070_s0 + %s5205_s9]]   ;;  %s5207_s20 = smov 17  }
  0x14   :  { %580 = vmatpush1.bf16.msra.mxu0 %v4922_v54  ;;  %s5585_s19 = sld [smem:[%s6070_s0 + %s5206_s15]]   ;;  %s5209_s3 = smov 21  }
  0x15   :  { %581 = vmatprep.subr.bf16.mxu0 %v4927_v55  ;;  %v444_v55 = vsub.s32 2, %v5271_v21  ;;  %s5595_s24 = sld [smem:[%s6070_s0 + %s5207_s20]]   ;;  %s5213_s11 = smov 5  }
  0x16   :  { %363 = vmatpush1.bf16.msra.mxu1 %v4912_v10  ;;  %s5647_s7 = sld [smem:[%s6070_s0 + %s5209_s3]]   ;;  %s5214_s16 = smov 25  }
  0x17   :  { %364 = vmatprep.subr.bf16.mxu1 %v5188_v6  ;;  %s3963_s15 = sld [smem:[%s6070_s0 + %s5213_s11]]   ;;  %s5215_s21 = smov 23  }
  0x18   :  { %582 = vmatpush1.bf16.msra.mxu0 %v4925_v56  ;;  %s3983_s20 = sld [smem:[%s6070_s0 + %s5214_s16]]   ;;  %s5217_s5 = smov 26  }
  0x19   :  { %583 = vmatprep.subr.bf16.mxu0 %v4930_v57 }
  0x1a   :  { %365 = vmatpush1.bf16.msra.mxu1 %v4913_v11 }
  0x1b   :  { %366 = vmatprep.subr.bf16.mxu1 %v5188_v6 }
  0x1c   :  { %584 = vmatpush1.bf16.msra.mxu0 %v4928_v58 }
  0x1d   :  { %585 = vmatprep.subr.bf16.mxu0 %v4933_v59 }
  0x1e   :  { %367 = vmatpush1.bf16.msra.mxu1 %v4914_v12  ;;  %v256_v12 = vld [vmem:[%s5268_s25] sm:$0xff] }
  0x1f   :  { %368 = vmatprep.subr.bf16.mxu1 %v5188_v6 }
  0x20   :  { %586 = vmatpush1.bf16.msra.mxu0 %v4931_v60 }
  0x21   :  { %587 = vmatprep.subr.bf16.mxu0 %v4936_v61 }
  0x22   :  { %369 = vmatpush1.bf16.msra.mxu1 %v4915_v13  ;;  %v258_v13 = vld [vmem:[%s5268_s25 + $0x10] sm:$0xff]  ;;  %s5216_s25 = smov 4  }
  0x23   :  { %370 = vmatprep.subr.bf16.mxu1 %v5188_v6  ;;  %s3962_s3 = sld [smem:[%s6070_s0 + %s5216_s25]]  }
  0x24   :  { %588 = vmatpush1.bf16.msra.mxu0 %v4934_v62 }
  0x25   :  { %589 = vmatprep.subr.bf16.mxu0 %v4939_v63 }
  0x26   :  { %371 = vmatpush1.bf16.msra.mxu1 %v4916_v15 }
  0x27   :  { %372 = vmatprep.subr.bf16.mxu1 %v5188_v6 }
  0x28   :  { %590 = vmatpush1.bf16.msra.mxu0 %v4937_v1 }
  0x2a   :  { %373 = vmatpush1.bf16.msra.mxu1 %v4917_v27 }
  0x2b   :  { %374 = vmatprep.subr.bf16.mxu1 %v5188_v6 }
  0x2e   :  { %375 = vmatpush1.bf16.msra.mxu1 %v4918_v38  ;;  %v4950_v38 = vld [vmem:[%s5296_s1 + $0xb0] ss:$12 sps:$4 sm:$0xff]  }
  0x2f   :  { %4479 = vmatprep.subr.bf16.mxu1 %v5185_v0 }
  0xdf   :  { %v190_v17 = vpop.f32.mrb[0].mxu0 }
  0xe0   :  { %v191_v19 = vadd.f32 %v3991_v16, %v190_v17  ;;  %v4445_v20 = vpop.f32.mrb[1].mxu0 }
  0xe1   :  { %v193_v22 = vpop.f32.mrb[2].mxu0  ;;  %v4942_v20 = vld [vmem:[%s5296_s1 + $0xac] ss:$12 sps:$4 sm:$0xff]  }
  0xe2   :  { %v199_v24 = vadd.f32 %v197_v18, %v191_v19  ;;  %v194_v25 = vadd.f32 %v3991_v16, %v193_v22  ;;  %v4446_v26 = vpop.f32.mrb[3].mxu0  ;;  %v4940_v22 = vld [vmem:[%s5296_s1 + $0xa8] ss:$12 sps:$4 sm:$0xff]   ;;  %591 = vmatprep.subr.bf16.mxu0 %v4942_v20 }
  0xe3   :  { %592 = vmatpush1.bf16.msra.mxu0 %v4940_v22 }
  0xe4   :  { %v200_v28 = vadd.f32 %v198_v23, %v194_v25  ;;  %233 = vrot.lane.b32.xlu1 %v199_v24, %s5193_s26  ;;  %v208_v29 = vrot.slane %v199_v24, 7  ;;  %v213_v30 = vrot.slane %v199_v24, 1  ;;  %v218_v31 = vrot.slane %v199_v24, 2  ;;  %4447 = vmatprep.subr.bf16.mxu0 %v5185_v0  ;;  %v3993_v23 = vld [vmem:[%s3967_s6] ss:$0 sm:$0xff] }
  0xe5   :  { %v201_v39 = vrot.slane %v199_v24, 6 }
  0xe6   :  { %v209_v33 = vrot.slane %v200_v28, 7  ;;  %v214_v34 = vrot.slane %v200_v28, 1  ;;  %v219_v35 = vrot.slane %v200_v28, 2  ;;  %v202_v37 = vrot.slane %v200_v28, 6 }
  0xe8   :  { %235 = vrot.lane.b32.xlu1 %v200_v28, %s5193_s26  ;;  %v212_v40 = vsel %vm210_vm3, %v209_v33, %v208_v29  ;;  %v217_v41 = vsel %vm215_vm4, %v214_v34, %v213_v30  ;;  %v221_v42 = vsel %vm220_vm5, %v218_v31, %v219_v35  ;;  %v222_v43 = vsel %vm220_vm5, %v219_v35, %v218_v31  ;;  %v4947_v35 = vld [vmem:[%s5296_s1 + $0x68] ss:$12 sps:$4 sm:$0xff]  }
  0xe9   :  { %225 = vrot.lane.b32.xlu0 %v212_v40, %s5194_s27  ;;  %v261_v44 = vmul.f32 %v257_v32, %v221_v42  ;;  %v263_v45 = vmul.f32 %v259_v36, %v222_v43  ;;  %v211_v46 = vsel %vm210_vm3, %v208_v29, %v209_v33  ;;  %v216_v47 = vsel %vm215_vm4, %v213_v30, %v214_v34  ;;  %v4943_v30 = vld [vmem:[%s5296_s1 + $0x8] ss:$12 sps:$4 sm:$0xff]   ;;  %v4944_v32 = vld [vmem:[%s5296_s1 + $0x20] ss:$12 sps:$4 sm:$0xff]   ;;  %v4945_v33 = vld [vmem:[%s5296_s1 + $0x38] ss:$12 sps:$4 sm:$0xff]  }
  0xea   :  { %v207_v48 = vsel %vm205_vm6, %v202_v37, %v201_v39  ;;  %v206_v49 = vsel %vm205_vm6, %v201_v39, %v202_v37  ;;  %v4946_v34 = vld [vmem:[%s5296_s1 + $0x50] ss:$12 sps:$4 sm:$0xff]   ;;  %v4948_v36 = vld [vmem:[%s5296_s1 + $0x80] ss:$12 sps:$4 sm:$0xff]   ;;  %v4949_v37 = vld [vmem:[%s5296_s1 + $0x98] ss:$12 sps:$4 sm:$0xff]  }
  0xeb   :  { %v265_v50 = vpack.c.bf16 %v263_v45, %v261_v44  ;;  %v5365_v39 = vsub.s32 0, %v5271_v21  ;;  %v432_v40 = vld [vmem:[%s5362_s10] sm:$0x7] }
  0xec   :  { %243 = vrot.lane.b32.xlu1 %v217_v41, %s5196_s2  ;;  %v5369_v41 = vsub.s32 1, %v5271_v21  ;;  %v445_v56 = vrot.slane %v432_v40, %v444_v55 }
  0xed   :  { %4004 = vmatprep.mubr.msk.bf16.mxu1 %vm247_vm7, %v265_v50  ;;  %227 = vrot.lane.b32.xlu0 %v211_v46, %s5194_s27  ;;  %v437_v42 = vrot.slane %v432_v40, %v5365_v39 }
  0xee   :  { %v441_v44 = vrot.slane %v432_v40, %v5369_v41 }
  0xf1   :  { %241 = vrot.lane.b32.xlu0 %v216_v47, %s5196_s2 }
 0x156   :  { %v234_v2 = vpop.permute.xlu1 %233 }
 0x15a   :  { %v236_v3 = vpop.permute.xlu1 %235 }
 0x15b   :  { %v226_v4 = vpop.permute.xlu0 %225 }
 0x15c   :  { %v248_v7 = vsel %vm247_vm7, %v207_v48, %v226_v4 }
 0x15d   :  { %v251_v15 = vsel %vm250_vm9, %v248_v7, %v234_v2 }
 0x15e   :  { %v244_v9 = vpop.permute.xlu1 %243 }
 0x15f   :  { %v228_v5 = vpop.permute.xlu0 %227 }
 0x160   :  { %v249_v8 = vsel %vm247_vm7, %v206_v49, %v228_v5  ;;  %v5397_v5 = vld [vmem:[%s5391_s14 + $0x8] sm:$0xff] }
 0x161   :  { %v252_v10 = vsel %vm250_vm9, %v249_v8, %v236_v3  ;;  %v5394_v3 = vld [vmem:[%s5391_s14] sm:$0xff] }
 0x162   :  { %v255_v11 = vsel %vm253_vm8, %v252_v10, %v244_v9 }
 0x163   :  { %v242_v14 = vpop.permute.xlu0 %241  ;;  %v262_v18 = vmul.f32 %v258_v13, %v255_v11 }
 0x164   :  { %v254_v16 = vsel %vm253_vm8, %v251_v15, %v242_v14 }
 0x165   :  { %v260_v17 = vmul.f32 %v256_v12, %v254_v16 }
 0x167   :  { %v264_v19 = vpack.c.bf16 %v262_v18, %v260_v17 }
 0x169   :  { %389 = vmatmul.mubr.bf16.vlgmr.msra.gmra.mrb[0].mxu1 %v264_v19 }
 0x16a   :  { %4481 = vmatprep.mubr.msk.bf16.mxu1 %vm5187_vm0, %v5185_v0 }
 0x23c   :  { %v390_v24 = vpop.f32.mrb[0].mxu1 }
 0x23d   :  { %v392_v25 = vpop.f32.mrb[1].mxu1  ;;  %v5333_v27 = vadd.f32 %v3993_v23, %v390_v24 }
 0x23e   :  { %v393_v26 = vpop.f32.mrb[2].mxu1 }
 0x23f   :  { %v5335_v28 = vadd.f32 %v3993_v23, %v393_v26  ;;  %v395_v29 = vpop.f32.mrb[3].mxu1 }
 0x241   :  { %v399_v31 = vpack.c.bf16 %v5335_v28, %v5333_v27 }
 0x243   :  { %610 = vmatmul.mubr.bf16.vlgmr.msra.gmra.mrb[4].mxu0 %v399_v31 }
 0x244   :  { %4448 = vmatpush3.bf16.msra.mxu0 %v4943_v30  ;;  %4463 = vmatprep.mubr.msk.bf16.mxu0 %vm5187_vm0, %v5185_v0 }
 0x245   :  { %4449 = vmatprep.subr.bf16.mxu0 %v5185_v0 }
 0x248   :  { %4450 = vmatpush3.bf16.msra.mxu0 %v4944_v32 }
 0x249   :  { %4451 = vmatprep.subr.bf16.mxu0 %v5185_v0 }
 0x24c   :  { %4452 = vmatpush3.bf16.msra.mxu0 %v4945_v33 }
 0x24d   :  { %4453 = vmatprep.subr.bf16.mxu0 %v5185_v0 }
 0x250   :  { %4454 = vmatpush3.bf16.msra.mxu0 %v4946_v34 }
 0x251   :  { %4455 = vmatprep.subr.bf16.mxu0 %v5185_v0 }
 0x254   :  { %4456 = vmatpush3.bf16.msra.mxu0 %v4947_v35 }
 0x255   :  { %4457 = vmatprep.subr.bf16.mxu0 %v5185_v0 }
 0x258   :  { %4458 = vmatpush3.bf16.msra.mxu0 %v4948_v36 }
 0x259   :  { %4459 = vmatprep.subr.bf16.mxu0 %v5185_v0 }
 0x25c   :  { %4460 = vmatpush3.bf16.msra.mxu0 %v4949_v37 }
 0x25d   :  { %4461 = vmatprep.subr.bf16.mxu0 %v5185_v0 }
 0x260   :  { %4462 = vmatpush3.bf16.msra.mxu0 %v4950_v38 }
 0x261   :  { %4467 = vmatprep.subr.bf16.mxu0 %v5185_v0 }
 0x263   :  { %4464 = vmatmul.mubr.bf16.vlgmr.msra.gmra.mrb[8].mxu0 %v399_v31 }
 0x264   :  { %4469 = vmatprep.mubr.msk.bf16.mxu0 %vm5187_vm0, %v5185_v0 }
 0x316   :  { %v611_v43 = vpop.f32.mrb[4].mxu0 }
 0x317   :  { %v613_v45 = vpop.f32.mrb[5].mxu0  ;;  %v612_v47 = vadd.f32 %v611_v43, %v437_v42 }
 0x318   :  { %v615_v46 = vpop.f32.mrb[6].mxu0  ;;  %v614_v50 = vadd.f32 %v613_v45, %v441_v44 }
 0x319   :  { %v616_v48 = vadd.f32 %v615_v46, %v437_v42  ;;  %v617_v49 = vpop.f32.mrb[7].mxu0 }
 0x31a   :  { %v618_v51 = vadd.f32 %v617_v49, %v441_v44 }
 0x31b   :  { %v661_v52 = vpack.c.bf16 %v616_v48, %v612_v47 }
 0x31c   :  { %v662_v53 = vpack.c.bf16 %v618_v51, %v614_v50 }
 0x31e   :  { %783 = vrot.lane.b32.xlu0 %v662_v53, %s5196_s2  ;;  %v668_v54 = vsel %vm247_vm7, %v662_v53, 0 }
 0x31f   :  { %4468 = vmatpush3.bf16.xpose.msra.mxu0 %v668_v54 }
 0x320   :  { %4473 = vmatprep.subr.bf16.mxu0 %v5185_v0 }
 0x326   :  { %4470 = vmatmul.mubr.msk.bf16.vlgmr.msra.gmra.mrb[12].mxu0 %vm247_vm7, %v661_v52 }
 0x327   :  { %4475 = vmatprep.mubr.msk.bf16.mxu0 %vm5187_vm0, %v5185_v0 }
 0x336   :  { %v654_v57 = vpop.f32.mrb[8].mxu0 }
 0x337   :  { %v4465_v58 = vpop.f32.mrb[9].mxu0  ;;  %v655_v60 = vadd.f32 %v654_v57, %v445_v56 }
 0x338   :  { %v657_v59 = vpop.f32.mrb[10].mxu0 }
 0x339   :  { %v658_v61 = vadd.f32 %v657_v59, %v445_v56  ;;  %v4466_v62 = vpop.f32.mrb[11].mxu0 }
 0x33b   :  { %v5382_v63 = vpack.c.bf16 %v658_v61, %v655_v60 }
 0x33d   :  { %4474 = vmatpush3.bf16.msra.mxu0 %v5382_v63 }
 0x33e   :  { %4491 = vmatprep.subr.bf16.mxu0 %v5185_v0 }
 0x390   :  { %v784_v1 = vpop.permute.xlu0 %783 }
 0x391   :  { %v789_v2 = vsel %vm247_vm7, %v784_v1, 0 }
 0x392   :  { %4480 = vmatpush3.bf16.xpose.msra.mxu1 %v789_v2 }
 0x393   :  { %4485 = vmatprep.subr.bf16.mxu1 %v5185_v0 }
 0x3f9   :  { %v704_v4 = vpop.f32.mrb[12].mxu0 }
 0x3fa   :  { %v705_v7 = vadd.f32 %v704_v4, %v5394_v3  ;;  %v4471_v8 = vpop.f32.mrb[13].mxu0 }
 0x3fb   :  { %v707_v9 = vpop.f32.mrb[14].mxu0 }
 0x3fc   :  { %v708_v10 = vadd.f32 %v707_v9, %v5397_v5  ;;  %v4472_v11 = vpop.f32.mrb[15].mxu0  ;;  %v712_v12 = vsel %vm711_vm10, %v705_v7, -inf }
 0x3fd   :  { %713 = vmax.xlane.f32.xlu0 %v712_v12 }
 0x3fe   :  { %v715_v13 = vsel %vm711_vm10, %v708_v10, -inf }
 0x3ff   :  { %716 = vmax.xlane.f32.xlu1 %v715_v13 }
 0x410   :  { %780 = vrot.lane.b32.xlu1 %v661_v52, %s5196_s2 }
 0x413   :  { %905 = vrot.lane.b32.xlu0 %v662_v53, %s5193_s26 }
 0x414   :  { %903 = vrot.lane.b32.xlu1 %v661_v52, %s5193_s26 }
 0x417   :  { %1026 = vrot.lane.b32.xlu0 %v662_v53, %s5194_s27 }
 0x418   :  { %1024 = vrot.lane.b32.xlu1 %v661_v52, %s5194_s27 }
 0x48a   :  { %v714_v14 = vpop.xlane.xlu0 %713 }
 0x48b   :  { %v718_v15 = vsub.f32 %v705_v7, %v714_v14 }
 0x48c   :  { %v717_v16 = vpop.xlane.xlu1 %716 }
 0x48d   :  { %v720_v17 = vmul.f32 1.442695, %v718_v15  ;;  %v719_v18 = vsub.f32 %v708_v10, %v717_v16 }
 0x48e   :  { %v906_v24 = vpop.permute.xlu0 %905 }
 0x48f   :  { %v722_v19 = vmul.f32 1.442695, %v719_v18  ;;  %5087 = vpow2.f32 %v720_v17  ;;  %v911_v26 = vsel %vm247_vm7, %v906_v24, 0 }
 0x490   :  { %v781_v20 = vpop.permute.xlu1 %780 }
 0x491   :  { %5089 = vpow2.f32 %v722_v19  ;;  %4482 = vmatmul.mubr.msk.bf16.vlgmr.msra.gmra.mrb[4].mxu1 %vm247_vm7, %v781_v20 }
 0x492   :  { %4487 = vmatprep.mubr.msk.bf16.mxu1 %vm5187_vm0, %v5185_v0  ;;  %v1027_v29 = vpop.permute.xlu0 %1026 }
 0x493   :  { %v1032_v31 = vsel %vm247_vm7, %v1027_v29, 0 }
 0x494   :  { %v904_v30 = vpop.permute.xlu1 %903 }
 0x498   :  { %v1025_v32 = vpop.permute.xlu1 %1024 }
 0x499   :  { %v5411_v22 = vpop.eup %5087 }
 0x49b   :  { %v5413_v23 = vpop.eup %5089 }
 0x49c   :  { %v732_v25 = vpack.c.bf16 %v5413_v23, %v5411_v22 }
 0x49e   :  { %4476 = vmatmul.mubr.msk.bf16.vlgmr.msra.gmra.mrb[16].mxu0 %vm711_vm10, %v732_v25 }
 0x49f   :  { %4492 = vmatpush3.bf16.xpose.msra.mxu0 %v911_v26  ;;  %4493 = vmatprep.mubr.msk.bf16.mxu0 %vm5187_vm0, %v5185_v0 }
 0x4a0   :  { %4503 = vmatprep.subr.bf16.mxu0 %v5185_v0 }
 0x4a6   :  { %4494 = vmatmul.mubr.msk.bf16.vlgmr.msra.gmra.mrb[20].mxu0 %vm247_vm7, %v904_v30 }
 0x4a7   :  { %4504 = vmatpush3.bf16.xpose.msra.mxu0 %v1032_v31  ;;  %4505 = vmatprep.mubr.msk.bf16.mxu0 %vm5187_vm0, %v5185_v0 }
 0x4a8   :  { %4515 = vmatprep.subr.bf16.mxu0 %v5185_v0 }
 0x4ae   :  { %4506 = vmatmul.mubr.msk.bf16.vlgmr.msra.gmra.mrb[24].mxu0 %vm247_vm7, %v1025_v32 }
 0x4af   :  { %4531 = vmatprep.mubr.msk.bf16.mxu0 %vm5187_vm0, %v5185_v0 }
 0x564   :  { %v825_v33 = vpop.f32.mrb[4].mxu1 }
 0x565   :  { %v826_v34 = vadd.f32 %v825_v33, %v5394_v3  ;;  %v4483_v35 = vpop.f32.mrb[5].mxu1 }
 0x566   :  { %v828_v36 = vpop.f32.mrb[6].mxu1 }
 0x567   :  { %v829_v37 = vadd.f32 %v828_v36, %v5397_v5  ;;  %v4484_v38 = vpop.f32.mrb[7].mxu1  ;;  %v832_v40 = vsel %vm711_vm10, %v826_v34, -inf  ;;  %v727_v36 = vsel %vm711_vm10, %v5413_v23, 0.0  ;;  %v724_v23 = vsel %vm711_vm10, %v5411_v22, 0.0  ;;  %v4951_v22 = vld [vmem:[%s5478_s18] sm:$0xff]  }
 0x568   :  { %833 = vmax.xlane.f32.xlu0 %v832_v40  ;;  %4516 = vmatpush3.bf16.msra.mxu0 %v4951_v22 }
 0x569   :  { %v835_v42 = vsel %vm711_vm10, %v829_v37, -inf  ;;  %4517 = vmatprep.subr.bf16.mxu0 %v5185_v0 }
 0x56a   :  { %836 = vmax.xlane.f32.xlu1 %v835_v42 }
 0x571   :  { %v5434_v43 = vpop.f32.mrb[16].mxu0 }
 0x572   :  { %v4477_v44 = vpop.f32.mrb[17].mxu0 }
 0x573   :  { %v5436_v45 = vpop.f32.mrb[18].mxu0 }
 0x574   :  { %v4478_v46 = vpop.f32.mrb[19].mxu0 }
 0x579   :  { %v947_v47 = vpop.f32.mrb[20].mxu0 }
 0x57a   :  { %v948_v48 = vadd.f32 %v947_v47, %v5394_v3  ;;  %v4495_v49 = vpop.f32.mrb[21].mxu0 }
 0x57b   :  { %854 = vrot.lane.b32.xlu1 %v5382_v63, %s5196_s2  ;;  %v950_v50 = vpop.f32.mrb[22].mxu0 }
 0x57c   :  { %v951_v51 = vadd.f32 %v950_v50, %v5397_v5  ;;  %v4496_v52 = vpop.f32.mrb[23].mxu0  ;;  %v954_v53 = vsel %vm711_vm10, %v948_v48, -inf }
 0x57d   :  { %955 = vmax.xlane.f32.xlu0 %v954_v53 }
 0x57e   :  { %v957_v54 = vsel %vm711_vm10, %v951_v51, -inf }
 0x581   :  { %958 = vmax.xlane.f32.xlu0 %v957_v54  ;;  %v1068_v56 = vpop.f32.mrb[24].mxu0 }
 0x582   :  { %v4507_v57 = vpop.f32.mrb[25].mxu0  ;;  %v1069_v62 = vadd.f32 %v1068_v56, %v5394_v3 }
 0x583   :  { %v1071_v58 = vpop.f32.mrb[26].mxu0 }
 0x584   :  { %v1072_v59 = vadd.f32 %v1071_v58, %v5397_v5  ;;  %v4508_v60 = vpop.f32.mrb[27].mxu0  ;;  %v1075_v1 = vsel %vm711_vm10, %v1069_v62, -inf }
 0x586   :  { %v1078_v61 = vsel %vm711_vm10, %v1072_v59, -inf }
 0x587   :  { %1079 = vmax.xlane.f32.xlu0 %v1078_v61 }
 0x59d   :  { %975 = vrot.lane.b32.xlu0 %v5382_v63, %s5193_s26 }
 0x59f   :  { %1076 = vmax.xlane.f32.xlu1 %v1075_v1  ;;  %v4952_v1 = vld [vmem:[%s5478_s18 + $0x8] sm:$0xff]  }
 0x5a0   :  { %4518 = vmatpush3.bf16.msra.mxu0 %v4952_v1 }
 0x5a1   :  { %4519 = vmatprep.subr.bf16.mxu0 %v5185_v0 }
 0x5b0   :  { %1096 = vrot.lane.b32.xlu1 %v5382_v63, %s5194_s27 }
 0x5f5   :  { %v834_v2 = vpop.xlane.xlu0 %833 }
 0x5f6   :  { %v838_v4 = vsub.f32 %v826_v34, %v834_v2 }
 0x5f7   :  { %v837_v7 = vpop.xlane.xlu1 %836 }
 0x5f8   :  { %v840_v8 = vmul.f32 1.442695, %v838_v4  ;;  %v839_v5 = vsub.f32 %v829_v37, %v837_v7 }
 0x5fa   :  { %5091 = vpow2.f32 %v840_v8  ;;  %v842_v9 = vmul.f32 1.442695, %v839_v5 }
 0x5fb   :  { %v855_v10 = vpop.permute.xlu1 %854 }
 0x5fc   :  { %5093 = vpow2.f32 %v842_v9  ;;  %4486 = vmatpush3.bf16.msra.mxu1 %v855_v10 }
 0x5fd   :  { %4497 = vmatprep.subr.bf16.mxu1 %v5185_v0 }
 0x604   :  { %v5092_v3 = vpop.eup %5091 }
 0x605   :  { %v844_v11 = vsel %vm711_vm10, %v5092_v3, 0.0 }
 0x606   :  { %v5094_v12 = vpop.eup %5093  ;;  %845 = vadd.xlane.f32.xlu1 %v844_v11 }
 0x607   :  { %v847_v13 = vsel %vm711_vm10, %v5094_v12, 0.0  ;;  %v852_v63 = vpack.c.bf16 %v5094_v12, %v5092_v3  ;;  %v4953_v3 = vld [vmem:[%s5478_s18 + $0x10] sm:$0xff]   ;;  %v4954_v12 = vld [vmem:[%s5478_s18 + $0x18] sm:$0xff]  }
 0x608   :  { %848 = vadd.xlane.f32.xlu0 %v847_v13  ;;  %4520 = vmatpush3.bf16.msra.mxu0 %v4953_v3  ;;  %v4955_v13 = vld [vmem:[%s5478_s18 + $0x20] sm:$0xff]   ;;  %v4966_v3 = vld [vmem:[%s5529_s28 + $0x38] sm:$0xff]  }
 0x609   :  { %4488 = vmatmul.mubr.msk.bf16.vlgmr.msra.gmra.mrb[8].mxu1 %vm711_vm10, %v852_v63  ;;  %4521 = vmatprep.subr.bf16.mxu0 %v5185_v0  ;;  %v4956_v63 = vld [vmem:[%s5478_s18 + $0x28] sm:$0xff]  }
 0x60a   :  { %v956_v14 = vpop.xlane.xlu0 %955  ;;  %4499 = vmatprep.mubr.msk.bf16.mxu1 %vm5187_vm0, %v5185_v0 }
 0x60b   :  { %v960_v15 = vsub.f32 %v948_v48, %v956_v14 }
 0x60c   :  { %4522 = vmatpush3.bf16.msra.mxu0 %v4954_v12  ;;  %v4968_v12 = vld [vmem:[%s5549_s4 + $0x8] sm:$0xff]  }
 0x60d   :  { %v962_v16 = vmul.f32 1.442695, %v960_v15  ;;  %4523 = vmatprep.subr.bf16.mxu0 %v5185_v0 }
 0x60e   :  { %v959_v17 = vpop.xlane.xlu0 %958 }
 0x60f   :  { %5095 = vpow2.f32 %v962_v16  ;;  %v961_v18 = vsub.f32 %v951_v51, %v959_v17  ;;  %v4957_v16 = vld [vmem:[%s5478_s18 + $0x30] sm:$0xff]   ;;  %v4958_v17 = vld [vmem:[%s5478_s18 + $0x38] sm:$0xff]  }
 0x610   :  { %4524 = vmatpush3.bf16.msra.mxu0 %v4955_v13  ;;  %v4969_v13 = vld [vmem:[%s5549_s4 + $0x10] sm:$0xff]  }
 0x611   :  { %v964_v19 = vmul.f32 1.442695, %v961_v18  ;;  %4525 = vmatprep.subr.bf16.mxu0 %v5185_v0 }
 0x613   :  { %5097 = vpow2.f32 %v964_v19 }
 0x614   :  { %v1080_v20 = vpop.xlane.xlu0 %1079  ;;  %4526 = vmatpush3.bf16.msra.mxu0 %v4956_v63  ;;  %v4970_v63 = vld [vmem:[%s5549_s4 + $0x18] sm:$0xff]  }
 0x615   :  { %v1082_v24 = vsub.f32 %v1072_v59, %v1080_v20  ;;  %4527 = vmatprep.subr.bf16.mxu0 %v5185_v0 }
 0x617   :  { %v1085_v25 = vmul.f32 1.442695, %v1082_v24 }
 0x618   :  { %v976_v26 = vpop.permute.xlu0 %975  ;;  %4528 = vmatpush3.bf16.msra.mxu0 %v4957_v16 }
 0x619   :  { %v5096_v29 = vpop.eup %5095  ;;  %5099 = vpow2.f32 %v1085_v25  ;;  %4498 = vmatpush3.bf16.msra.mxu1 %v976_v26  ;;  %4529 = vmatprep.subr.bf16.mxu0 %v5185_v0 }
 0x61a   :  { %v966_v30 = vsel %vm711_vm10, %v5096_v29, 0.0  ;;  %4509 = vmatprep.subr.bf16.mxu1 %v5185_v0 }
 0x61b   :  { %967 = vadd.xlane.f32.xlu0 %v966_v30 }
 0x61c   :  { %4530 = vmatpush3.bf16.msra.mxu0 %v4958_v17 }
 0x61d   :  { %v5098_v31 = vpop.eup %5097  ;;  %4555 = vmatprep.subr.bf16.mxu0 %v5185_v0 }
 0x61e   :  { %v969_v32 = vsel %vm711_vm10, %v5098_v31, 0.0  ;;  %v974_v33 = vpack.c.bf16 %v5098_v31, %v5096_v29 }
 0x61f   :  { %970 = vadd.xlane.f32.xlu1 %v969_v32 }
 0x620   :  { %4500 = vmatmul.mubr.msk.bf16.vlgmr.msra.gmra.mrb[12].mxu1 %vm711_vm10, %v974_v33 }
 0x621   :  { %4511 = vmatprep.mubr.msk.bf16.mxu1 %vm5187_vm0, %v5185_v0 }
 0x623   :  { %v5100_v34 = vpop.eup %5099 }
 0x624   :  { %v1090_v35 = vsel %vm711_vm10, %v5100_v34, 0.0 }
 0x625   :  { %1091 = vadd.xlane.f32.xlu1 %v1090_v35 }
 0x629   :  { %728 = vadd.xlane.f32.xlu1 %v727_v36 }
 0x62c   :  { %v1077_v37 = vpop.xlane.xlu1 %1076 }
 0x62d   :  { %v1081_v38 = vsub.f32 %v1069_v62, %v1077_v37 }
 0x62f   :  { %v1083_v40 = vmul.f32 1.442695, %v1081_v38 }
 0x630   :  { %v1097_v42 = vpop.permute.xlu1 %1096 }
 0x631   :  { %5101 = vpow2.f32 %v1083_v40  ;;  %4510 = vmatpush3.bf16.msra.mxu1 %v1097_v42 }
 0x632   :  { %4535 = vmatprep.subr.bf16.mxu1 %v5185_v0 }
 0x63b   :  { %v5102_v44 = vpop.eup %5101 }
 0x63c   :  { %v1087_v46 = vsel %vm711_vm10, %v5102_v44, 0.0  ;;  %v1095_v47 = vpack.c.bf16 %v5100_v34, %v5102_v44 }
 0x63d   :  { %1088 = vadd.xlane.f32.xlu0 %v1087_v46 }
 0x63e   :  { %4512 = vmatmul.mubr.msk.bf16.vlgmr.msra.gmra.mrb[16].mxu1 %vm711_vm10, %v1095_v47 }
 0x63f   :  { %4551 = vmatprep.mubr.msk.bf16.mxu1 %vm5187_vm0, %v5185_v0 }
 0x641   :  { %725 = vadd.xlane.f32.xlu0 %v724_v23 }
 0x693   :  { %v846_v48 = vpop.xlane.xlu1 %845 }
 0x694   :  { %5103 = vrcp.f32 %v846_v48 }
 0x695   :  { %v849_v49 = vpop.xlane.xlu0 %848 }
 0x696   :  { %5105 = vrcp.f32 %v849_v49 }
 0x69e   :  { %v5104_v51 = vpop.eup %5103 }
 0x6a0   :  { %v5106_v53 = vpop.eup %5105 }
 0x6a8   :  { %v968_v60 = vpop.xlane.xlu0 %967 }
 0x6a9   :  { %5107 = vrcp.f32 %v968_v60 }
 0x6ac   :  { %v971_v61 = vpop.xlane.xlu1 %970 }
 0x6ad   :  { %5109 = vrcp.f32 %v971_v61 }
 0x6b2   :  { %v1092_v14 = vpop.xlane.xlu1 %1091 }
 0x6b3   :  { %v5108_v2 = vpop.eup %5107  ;;  %5111 = vrcp.f32 %v1092_v14  ;;  %v4971_v14 = vld [vmem:[%s5549_s4 + $0x20] sm:$0xff]  }
 0x6b6   :  { %v729_v32 = vpop.xlane.xlu1 %728 }
 0x6b7   :  { %v5110_v7 = vpop.eup %5109 }
 0x6bd   :  { %v5112_v19 = vpop.eup %5111 }
 0x6ca   :  { %v1089_v15 = vpop.xlane.xlu0 %1088 }
 0x6cb   :  { %5113 = vrcp.f32 %v1089_v15  ;;  %v4972_v15 = vld [vmem:[%s5549_s4 + $0x28] sm:$0xff]  }
 0x6cc   :  { %5115 = vrcp.f32 %v729_v32 }
 0x6ce   :  { %v726_v33 = vpop.xlane.xlu0 %725 }
 0x6cf   :  { %5117 = vrcp.f32 %v726_v33 }
 0x6d5   :  { %v5114_v24 = vpop.eup %5113 }
 0x6d6   :  { %v5116_v35 = vpop.eup %5115 }
 0x6d7   :  { %v778_v47 = vmul.f32 %v5116_v35, %v5436_v45 }
 0x6d9   :  { %v5118_v37 = vpop.eup %5117 }
 0x6da   :  { %v777_v46 = vmul.f32 %v5118_v37, %v5434_v43  ;;  %v4037_v43 = vld [vmem:[%s5511_s22] ss:$0 sm:$0xff] }
 0x6dc   :  { %v894_v50 = vpop.f32.mrb[8].mxu1 }
 0x6dd   :  { %v4489_v52 = vpop.f32.mrb[9].mxu1  ;;  %v901_v56 = vmul.f32 %v5104_v51, %v894_v50 }
 0x6de   :  { %v897_v54 = vpop.f32.mrb[10].mxu1 }
 0x6df   :  { %v902_v57 = vmul.f32 %v5106_v53, %v897_v54  ;;  %v4490_v58 = vpop.f32.mrb[11].mxu1 }
 0x6e1   :  { %v4879_v59 = vpack.i.bf16 %v902_v57, %v901_v56 }
 0x6e3   :  { %4880 = vrot.lane.b32.xlu0 %v4879_v59, %s5194_s27 }
 0x6f3   :  { %v1015_v62 = vpop.f32.mrb[12].mxu1 }
 0x6f4   :  { %v4501_v4 = vpop.f32.mrb[13].mxu1  ;;  %v1022_v5 = vmul.f32 %v5108_v2, %v1015_v62 }
 0x6f5   :  { %v1018_v8 = vpop.f32.mrb[14].mxu1 }
 0x6f6   :  { %v1023_v9 = vmul.f32 %v5110_v7, %v1018_v8  ;;  %v4502_v10 = vpop.f32.mrb[15].mxu1  ;;  %v4961_v7 = vld [vmem:[%s5529_s28 + $0x10] sm:$0xff]   ;;  %v4962_v8 = vld [vmem:[%s5529_s28 + $0x18] sm:$0xff]  }
 0x6f7   :  { %v4965_v10 = vld [vmem:[%s5529_s28 + $0x30] sm:$0xff]  }
 0x6f8   :  { %v4884_v11 = vpack.i.bf16 %v1023_v9, %v1022_v5  ;;  %v4963_v5 = vld [vmem:[%s5529_s28 + $0x20] sm:$0xff]   ;;  %v4964_v9 = vld [vmem:[%s5529_s28 + $0x28] sm:$0xff]  }
 0x6fa   :  { %4885 = vrot.lane.b32.xlu1 %v4884_v11, %s5193_s26  ;;  %v4967_v11 = vld [vmem:[%s5549_s4] sm:$0xff]  }
 0x711   :  { %v1136_v18 = vpop.f32.mrb[16].mxu1 }
 0x712   :  { %v4513_v20 = vpop.f32.mrb[17].mxu1  ;;  %v1143_v26 = vmul.f32 %v5114_v24, %v1136_v18 }
 0x713   :  { %v1139_v25 = vpop.f32.mrb[18].mxu1 }
 0x714   :  { %v1144_v29 = vmul.f32 %v5112_v19, %v1139_v25  ;;  %v4514_v30 = vpop.f32.mrb[19].mxu1 }
 0x716   :  { %v4889_v31 = vpack.i.bf16 %v1144_v29, %v1143_v26 }
 0x718   :  { %4890 = vrot.lane.b32.xlu1 %v4889_v31, %s5196_s2 }
 0x755   :  { %v4881_v34 = vpop.permute.xlu0 %4880 }
 0x756   :  { %v4883_v38 = vunpack.i.h.bf16 %v4881_v34  ;;  %v4882_v40 = vunpack.i.l.bf16 %v4881_v34 }
 0x758   :  { %v1170_v48 = vsel %vm247_vm7, %v778_v47, %v4883_v38  ;;  %v1169_v49 = vsel %vm247_vm7, %v777_v46, %v4882_v40  ;;  %v4046_v38 = vld [vmem:[%s5566_s8] ss:$0 sm:$0xff] }
 0x759   :  { %v4047_v47 = vld [vmem:[%s5571_s13] ss:$0 sm:$0xff] }
 0x76c   :  { %v4886_v36 = vpop.permute.xlu1 %4885 }
 0x76d   :  { %v4888_v42 = vunpack.i.h.bf16 %v4886_v36  ;;  %v4887_v44 = vunpack.i.l.bf16 %v4886_v36 }
 0x76f   :  { %v1171_v52 = vsel %vm250_vm9, %v1169_v49, %v4887_v44  ;;  %v1172_v53 = vsel %vm250_vm9, %v1170_v48, %v4888_v42 }
 0x78a   :  { %v4891_v23 = vpop.permute.xlu1 %4890 }
 0x78b   :  { %v4893_v50 = vunpack.i.h.bf16 %v4891_v23  ;;  %v4892_v51 = vunpack.i.l.bf16 %v4891_v23 }
 0x78d   :  { %v1173_v54 = vsel %vm253_vm8, %v1171_v52, %v4892_v51  ;;  %v1174_v56 = vsel %vm253_vm8, %v1172_v53, %v4893_v50  ;;  %v4973_v51 = vld [vmem:[%s5549_s4 + $0x30] sm:$0xff]   ;;  %v4974_v52 = vld [vmem:[%s5549_s4 + $0x38] sm:$0xff]   ;;  %v4048_v53 = vld [vmem:[%s5585_s19] ss:$0 sm:$0xff] }
 0x78e   :  { %v1175_v57 = vpack.c.bf16 %v1174_v56, %v1173_v54 }
 0x790   :  { %4532 = vmatmul.mubr.bf16.vlgmr.msra.gmra.mrb[28].mxu0 %v1175_v57 }
 0x791   :  { %4571 = vmatprep.mubr.msk.bf16.mxu0 %vm5187_vm0, %v5185_v0  ;;  %4556 = vmatpush3.bf16.msra.mxu0 %v4967_v11  ;;  %v4978_v11 = vld [vmem:[%s5296_s1 + $0xc8] ss:$12 sps:$4 sm:$0xff]  }
 0x792   :  { %4557 = vmatprep.subr.bf16.mxu0 %v5185_v0 }
 0x795   :  { %4558 = vmatpush3.bf16.msra.mxu0 %v4968_v12  ;;  %v4981_v12 = vld [vmem:[%s5296_s1 + $0xdc] ss:$12 sps:$4 sm:$0xff]  }
 0x796   :  { %4559 = vmatprep.subr.bf16.mxu0 %v5185_v0 }
 0x799   :  { %4560 = vmatpush3.bf16.msra.mxu0 %v4969_v13  ;;  %v4979_v13 = vld [vmem:[%s5296_s1 + $0xd8] ss:$12 sps:$4 sm:$0xff]  }
 0x79a   :  { %4561 = vmatprep.subr.bf16.mxu0 %v5185_v0 }
 0x79d   :  { %4562 = vmatpush3.bf16.msra.mxu0 %v4970_v63  ;;  %v4982_v63 = vld [vmem:[%s5296_s1 + $0xe0] ss:$12 sps:$4 sm:$0xff]  }
 0x79e   :  { %4563 = vmatprep.subr.bf16.mxu0 %v5185_v0 }
 0x7a1   :  { %4564 = vmatpush3.bf16.msra.mxu0 %v4971_v14  ;;  %v4985_v14 = vld [vmem:[%s5296_s1 + $0xf4] ss:$12 sps:$4 sm:$0xff]  }
 0x7a2   :  { %4565 = vmatprep.subr.bf16.mxu0 %v5185_v0 }
 0x7a5   :  { %4566 = vmatpush3.bf16.msra.mxu0 %v4972_v15  ;;  %v4983_v15 = vld [vmem:[%s5296_s1 + $0xf0] ss:$12 sps:$4 sm:$0xff]  }
 0x7a6   :  { %4567 = vmatprep.subr.bf16.mxu0 %v5185_v0 }
 0x7a9   :  { %4568 = vmatpush3.bf16.msra.mxu0 %v4973_v51 }
 0x7aa   :  { %4569 = vmatprep.subr.bf16.mxu0 %v5185_v0 }
 0x7ad   :  { %4570 = vmatpush3.bf16.msra.mxu0 %v4974_v52 }
 0x7ae   :  { %4575 = vmatprep.subr.bf16.mxu0 %v5185_v0 }
 0x863   :  { %v1281_v45 = vpop.f32.mrb[28].mxu0 }
 0x864   :  { %v1282_v58 = vadd.f32 %v4037_v43, %v1281_v45  ;;  %v4533_v59 = vpop.f32.mrb[29].mxu0 }
 0x865   :  { %v1284_v60 = vpop.f32.mrb[30].mxu0 }
 0x866   :  { %v5515_v61 = vadd.f32 %v1282_v58, %v5333_v27  ;;  %v1285_v22 = vadd.f32 %v4037_v43, %v1284_v60  ;;  %v4534_v62 = vpop.f32.mrb[31].mxu0  ;;  %v4959_v27 = vld [vmem:[%s5529_s28] sm:$0xff]  }
 0x867   :  { %4536 = vmatpush3.bf16.msra.mxu1 %v4959_v27  ;;  %v4977_v62 = vld [vmem:[%s5296_s1 + $0xc4] ss:$12 sps:$4 sm:$0xff]  }
 0x868   :  { %v5518_v1 = vadd.f32 %v1285_v22, %v5335_v28  ;;  %1292 = vadd.xlane.f32.xlu0 %v5515_v61  ;;  %v1298_v2 = vmul.f32 %v5515_v61, %v5515_v61  ;;  %4537 = vmatprep.subr.bf16.mxu1 %v5185_v0  ;;  %v4960_v28 = vld [vmem:[%s5529_s28 + $0x8] sm:$0xff]  }
 0x869   :  { %v4975_v22 = vld [vmem:[%s5296_s1 + $0xc0] ss:$12 sps:$4 sm:$0xff]  }
 0x86a   :  { %1294 = vadd.xlane.f32.xlu1 %v5518_v1  ;;  %v1299_v4 = vmul.f32 %v5518_v1, %v5518_v1 }
 0x86b   :  { %4538 = vmatpush3.bf16.msra.mxu1 %v4960_v28 }
 0x86c   :  { %1300 = vadd.xlane.f32.xlu0 %v1298_v2  ;;  %4539 = vmatprep.subr.bf16.mxu1 %v5185_v0 }
 0x86f   :  { %4540 = vmatpush3.bf16.msra.mxu1 %v4961_v7 }
 0x870   :  { %1302 = vadd.xlane.f32.xlu0 %v1299_v4  ;;  %4541 = vmatprep.subr.bf16.mxu1 %v5185_v0 }
 0x873   :  { %4542 = vmatpush3.bf16.msra.mxu1 %v4962_v8 }
 0x874   :  { %4543 = vmatprep.subr.bf16.mxu1 %v5185_v0 }
 0x877   :  { %4544 = vmatpush3.bf16.msra.mxu1 %v4963_v5 }
 0x878   :  { %4545 = vmatprep.subr.bf16.mxu1 %v5185_v0 }
 0x87b   :  { %4546 = vmatpush3.bf16.msra.mxu1 %v4964_v9 }
 0x87c   :  { %4547 = vmatprep.subr.bf16.mxu1 %v5185_v0 }
 0x87f   :  { %4548 = vmatpush3.bf16.msra.mxu1 %v4965_v10 }
 0x880   :  { %4549 = vmatprep.subr.bf16.mxu1 %v5185_v0 }
 0x883   :  { %4550 = vmatpush3.bf16.msra.mxu1 %v4966_v3 }
 0x884   :  { %1788 = vmatprep.subr.bf16.mxu1 %v4977_v62 }
 0x8f5   :  { %v1293_v16 = vpop.xlane.xlu0 %1292 }
 0x8f6   :  { %v1296_v17 = vmul.f32 0.010416667, %v1293_v16  ;;  %v4986_v16 = vld [vmem:[%s5296_s1 + $0xf8] ss:$12 sps:$4 sm:$0xff]  }
 0x8f7   :  { %v1295_v18 = vpop.xlane.xlu1 %1294 }
 0x8f8   :  { %v1306_v20 = vmul.f32 %v1296_v17, %v1296_v17  ;;  %v1297_v24 = vmul.f32 0.010416667, %v1295_v18  ;;  %v1310_v35 = vsub.f32 %v5515_v61, %v1296_v17  ;;  %v4989_v17 = vld [vmem:[%s5296_s1 + $0x10c] ss:$12 sps:$4 sm:$0xff]   ;;  %v4987_v18 = vld [vmem:[%s5296_s1 + $0x108] ss:$12 sps:$4 sm:$0xff]  }
 0x8f9   :  { %v1301_v19 = vpop.xlane.xlu0 %1300 }
 0x8fa   :  { %v1304_v25 = vmul.f32 0.010416667, %v1301_v19  ;;  %v1307_v30 = vmul.f32 %v1297_v24, %v1297_v24  ;;  %v1311_v40 = vsub.f32 %v5518_v1, %v1297_v24  ;;  %v4057_v1 = vld [vmem:[%s5595_s24] ss:$0 sm:$0xff]  ;;  %v4990_v19 = vld [vmem:[%s5296_s1 + $0x110] ss:$12 sps:$4 sm:$0xff]  }
 0x8fb   :  { %v4991_v24 = vld [vmem:[%s5296_s1 + $0x120] ss:$12 sps:$4 sm:$0xff]  }
 0x8fc   :  { %v1308_v26 = vsub.f32 %v1304_v25, %v1306_v20  ;;  %v4993_v20 = vld [vmem:[%s5296_s1 + $0x124] ss:$12 sps:$4 sm:$0xff]   ;;  %v4994_v25 = vld [vmem:[%s5296_s1 + $0x128] ss:$12 sps:$4 sm:$0xff]  }
 0x8fd   :  { %v1303_v29 = vpop.xlane.xlu0 %1302 }
 0x8fe   :  { %v1312_v31 = vadd.f32 1e-05, %v1308_v26  ;;  %v1305_v32 = vmul.f32 0.010416667, %v1303_v29  ;;  %v4997_v26 = vld [vmem:[%s5296_s1 + $0x13c] ss:$12 sps:$4 sm:$0xff]  }
 0x8ff   :  { %v4995_v29 = vld [vmem:[%s5296_s1 + $0x138] ss:$12 sps:$4 sm:$0xff]  }
 0x900   :  { %5119 = vrsqrt.f32 %v1312_v31  ;;  %v1309_v33 = vsub.f32 %v1305_v32, %v1307_v30  ;;  %v4998_v30 = vld [vmem:[%s5296_s1 + $0x140] ss:$12 sps:$4 sm:$0xff]   ;;  %v4999_v32 = vld [vmem:[%s5296_s1 + $0x150] ss:$12 sps:$4 sm:$0xff]  }
 0x901   :  { %v5001_v31 = vld [vmem:[%s5296_s1 + $0x154] ss:$12 sps:$4 sm:$0xff]  }
 0x902   :  { %v1313_v34 = vadd.f32 1e-05, %v1309_v33  ;;  %v5002_v33 = vld [vmem:[%s5296_s1 + $0x158] ss:$12 sps:$4 sm:$0xff]  }
 0x904   :  { %5121 = vrsqrt.f32 %v1313_v34  ;;  %v5005_v34 = vld [vmem:[%s5296_s1 + $0x16c] ss:$12 sps:$4 sm:$0xff]  }
 0x90a   :  { %v5120_v36 = vpop.eup %5119 }
 0x90b   :  { %v1316_v37 = vmul.f32 %v5120_v36, %v1310_v35  ;;  %v5003_v35 = vld [vmem:[%s5296_s1 + $0x168] ss:$12 sps:$4 sm:$0xff]   ;;  %v5006_v36 = vld [vmem:[%s5296_s1 + $0x170] ss:$12 sps:$4 sm:$0xff]   ;;  %s5208_s1 = smov 20  }
 0x90c   :  { %s5642_s30 = sld [smem:[%s6070_s0 + %s5208_s1]]  }
 0x90d   :  { %v1324_v46 = vmul.f32 %v4046_v38, %v1316_v37  ;;  %s3981_s1 = sld [smem:[%s6070_s0 + %s5215_s21]]  }
 0x90e   :  { %v5122_v42 = vpop.eup %5121 }
 0x90f   :  { %v1317_v44 = vmul.f32 %v5122_v42, %v1311_v40  ;;  %v1332_v48 = vadd.f32 %v4047_v47, %v1324_v46 }
 0x911   :  { %v1325_v23 = vmul.f32 %v4046_v38, %v1317_v44 }
 0x913   :  { %v1333_v49 = vadd.f32 %v4047_v47, %v1325_v23 }
 0x915   :  { %v1334_v50 = vpack.c.bf16 %v1333_v49, %v1332_v48 }
 0x917   :  { %4552 = vmatmul.mubr.bf16.vlgmr.msra.gmra.mrb[20].mxu1 %v1334_v50 }
 0x918   :  { %1820 = vmatprep.mubr.bf16.mxu1 %v5188_v6  ;;  %1789 = vmatpush1.bf16.msra.mxu1 %v4975_v22 }
 0x919   :  { %1790 = vmatprep.subr.bf16.mxu1 %v4981_v12 }
 0x91c   :  { %1791 = vmatpush1.bf16.msra.mxu1 %v4979_v13 }
 0x91d   :  { %1792 = vmatprep.subr.bf16.mxu1 %v4985_v14 }
 0x920   :  { %1793 = vmatpush1.bf16.msra.mxu1 %v4983_v15 }
 0x921   :  { %1794 = vmatprep.subr.bf16.mxu1 %v4989_v17 }
 0x924   :  { %1795 = vmatpush1.bf16.msra.mxu1 %v4987_v18 }
 0x925   :  { %1796 = vmatprep.subr.bf16.mxu1 %v4993_v20 }
 0x928   :  { %1797 = vmatpush1.bf16.msra.mxu1 %v4991_v24 }
 0x929   :  { %1798 = vmatprep.subr.bf16.mxu1 %v4997_v26 }
 0x92c   :  { %1799 = vmatpush1.bf16.msra.mxu1 %v4995_v29 }
 0x92d   :  { %1800 = vmatprep.subr.bf16.mxu1 %v5001_v31  ;;  %v5682_v31 = vld [vmem:[%s5391_s14 + $0x8] sm:$0xff] }
 0x930   :  { %1801 = vmatpush1.bf16.msra.mxu1 %v4999_v32 }
 0x931   :  { %1802 = vmatprep.subr.bf16.mxu1 %v5005_v34 }
 0x934   :  { %1803 = vmatpush1.bf16.msra.mxu1 %v5003_v35 }
 0x935   :  { %4595 = vmatprep.subr.bf16.mxu1 %v5185_v0 }
 0x9ea   :  { %v1440_v54 = vpop.f32.mrb[20].mxu1 }
 0x9eb   :  { %v1441_v56 = vadd.f32 %v4048_v53, %v1440_v54  ;;  %v4553_v57 = vpop.f32.mrb[21].mxu1 }
 0x9ec   :  { %v1443_v43 = vpop.f32.mrb[22].mxu1  ;;  %v4066_v57 = vld [vmem:[%s5642_s30] ss:$0 sm:$0xff] }
 0x9ed   :  { %v1444_v45 = vadd.f32 %v4048_v53, %v1443_v43  ;;  %v4554_v58 = vpop.f32.mrb[23].mxu1  ;;  %v1447_v59 = vmax.f32 %v1441_v56, 0.0 }
 0x9ef   :  { %v1448_v60 = vmax.f32 %v1444_v45, 0.0 }
 0x9f1   :  { %v1449_v61 = vpack.c.bf16 %v1448_v60, %v1447_v59 }
 0x9f3   :  { %4572 = vmatmul.mubr.bf16.vlgmr.msra.gmra.mrb[32].mxu0 %v1449_v61  ;;  %v4067_v61 = vld [vmem:[%s5647_s7] ss:$0 sm:$0xff] }
 0x9f4   :  { %4591 = vmatprep.mubr.msk.bf16.mxu0 %vm5187_vm0, %v5185_v0  ;;  %4576 = vmatpush3.bf16.msra.mxu0 %v4978_v11 }
 0x9f5   :  { %4577 = vmatprep.subr.bf16.mxu0 %v5185_v0 }
 0x9f8   :  { %4578 = vmatpush3.bf16.msra.mxu0 %v4982_v63 }
 0x9f9   :  { %4579 = vmatprep.subr.bf16.mxu0 %v5185_v0 }
 0x9fc   :  { %4580 = vmatpush3.bf16.msra.mxu0 %v4986_v16 }
 0x9fd   :  { %4581 = vmatprep.subr.bf16.mxu0 %v5185_v0 }
 0xa00   :  { %4582 = vmatpush3.bf16.msra.mxu0 %v4990_v19 }
 0xa01   :  { %4583 = vmatprep.subr.bf16.mxu0 %v5185_v0 }
 0xa04   :  { %4584 = vmatpush3.bf16.msra.mxu0 %v4994_v25  ;;  %v5678_v25 = vld [vmem:[%s5391_s14] sm:$0xff]  ;;  %s5218_s14 = smov 28  }
 0xa05   :  { %4585 = vmatprep.subr.bf16.mxu0 %v5185_v0 }
 0xa08   :  { %4586 = vmatpush3.bf16.msra.mxu0 %v4998_v30 }
 0xa09   :  { %4587 = vmatprep.subr.bf16.mxu0 %v5185_v0 }
 0xa0c   :  { %4588 = vmatpush3.bf16.msra.mxu0 %v5002_v33 }
 0xa0d   :  { %4589 = vmatprep.subr.bf16.mxu0 %v5185_v0 }
 0xa10   :  { %4590 = vmatpush3.bf16.msra.mxu0 %v5006_v36 }
 0xa11   :  { %4619 = vmatprep.subr.bf16.mxu0 %v5185_v0 }
 0xac6   :  { %v1555_v2 = vpop.f32.mrb[32].mxu0 }
 0xac7   :  { %v1556_v4 = vadd.f32 %v4057_v1, %v1555_v2  ;;  %v4573_v27 = vpop.f32.mrb[33].mxu0 }
 0xac8   :  { %v1558_v28 = vpop.f32.mrb[34].mxu0 }
 0xac9   :  { %v5598_v7 = vadd.f32 %v1556_v4, %v1332_v48  ;;  %v1559_v8 = vadd.f32 %v4057_v1, %v1558_v28  ;;  %v4574_v5 = vpop.f32.mrb[35].mxu0  ;;  %v4100_v4 = vld [vmem:[%s5362_s10 + $0x3] sm:$0x7]  ;;  %s5210_s10 = smov 24  }
 0xaca   :  { %v1648_v27 = vrot.slane %v4100_v4, %v5365_v39  ;;  %v1656_v28 = vrot.slane %v4100_v4, %v444_v55  ;;  %v1652_v5 = vrot.slane %v4100_v4, %v5369_v41 }
 0xacb   :  { %v5600_v9 = vadd.f32 %v1559_v8, %v1333_v49  ;;  %1566 = vadd.xlane.f32.xlu1 %v5598_v7  ;;  %v1572_v10 = vmul.f32 %v5598_v7, %v5598_v7 }
 0xacd   :  { %1568 = vadd.xlane.f32.xlu0 %v5600_v9  ;;  %v1573_v3 = vmul.f32 %v5600_v9, %v5600_v9 }
 0xacf   :  { %1574 = vadd.xlane.f32.xlu1 %v1572_v10 }
 0xad1   :  { %1576 = vadd.xlane.f32.xlu0 %v1573_v3 }
 0xb58   :  { %v1567_v37 = vpop.xlane.xlu1 %1566 }
 0xb59   :  { %v1570_v38 = vmul.f32 0.010416667, %v1567_v37 }
 0xb5a   :  { %v1569_v40 = vpop.xlane.xlu0 %1568 }
 0xb5b   :  { %v1571_v42 = vmul.f32 0.010416667, %v1569_v40  ;;  %v1580_v46 = vmul.f32 %v1570_v38, %v1570_v38  ;;  %v1584_v54 = vsub.f32 %v5598_v7, %v1570_v38 }
 0xb5c   :  { %v1575_v44 = vpop.xlane.xlu1 %1574 }
 0xb5d   :  { %v1578_v47 = vmul.f32 0.010416667, %v1575_v44  ;;  %v1581_v48 = vmul.f32 %v1571_v42, %v1571_v42  ;;  %v1585_v43 = vsub.f32 %v5600_v9, %v1571_v42 }
 0xb5e   :  { %v1577_v23 = vpop.xlane.xlu0 %1576 }
 0xb5f   :  { %v1582_v49 = vsub.f32 %v1578_v47, %v1580_v46  ;;  %v1579_v50 = vmul.f32 0.010416667, %v1577_v23 }
 0xb61   :  { %v1586_v51 = vadd.f32 1e-05, %v1582_v49  ;;  %v1583_v52 = vsub.f32 %v1579_v50, %v1581_v48 }
 0xb63   :  { %5123 = vrsqrt.f32 %v1586_v51  ;;  %v1587_v53 = vadd.f32 1e-05, %v1583_v52 }
 0xb65   :  { %5125 = vrsqrt.f32 %v1587_v53 }
 0xb6d   :  { %v5124_v56 = vpop.eup %5123 }
 0xb6e   :  { %v1590_v45 = vmul.f32 %v5124_v56, %v1584_v54 }
 0xb6f   :  { %v5126_v58 = vpop.eup %5125 }
 0xb70   :  { %v1591_v59 = vmul.f32 %v5126_v58, %v1585_v43  ;;  %v1598_v60 = vmul.f32 %v4066_v57, %v1590_v45 }
 0xb72   :  { %v1599_v22 = vmul.f32 %v4066_v57, %v1591_v59  ;;  %v5653_v62 = vadd.f32 %v4067_v61, %v1598_v60 }
 0xb74   :  { %v5655_v1 = vadd.f32 %v4067_v61, %v1599_v22 }
 0xb76   :  { %v1608_v2 = vpack.c.bf16 %v5655_v1, %v5653_v62 }
 0xb78   :  { %1821 = vmatmul.mubr.bf16.vlgmr.msra.gmra.mrb[24].mxu1 %v1608_v2  ;;  %4592 = vmatmul.mubr.bf16.vlgmr.msra.gmra.mrb[36].mxu0 %v1608_v2 }
 0xb79   :  { %4597 = vmatprep.mubr.msk.bf16.mxu1 %vm5187_vm0, %v5185_v0  ;;  %4621 = vmatprep.mubr.msk.bf16.mxu0 %vm5187_vm0, %v5185_v0 }
 0xc4b   :  { %v1822_v7 = vpop.f32.mrb[24].mxu1  ;;  %v1865_v8 = vpop.f32.mrb[36].mxu0 }
 0xc4c   :  { %v1824_v9 = vpop.f32.mrb[25].mxu1  ;;  %v4593_v10 = vpop.f32.mrb[37].mxu0  ;;  %v1823_v12 = vadd.f32 %v1822_v7, %v1648_v27  ;;  %v1866_v13 = vadd.f32 %v1865_v8, %v1656_v28 }
 0xc4d   :  { %v1826_v3 = vpop.f32.mrb[26].mxu1  ;;  %v1868_v11 = vpop.f32.mrb[38].mxu0  ;;  %v1825_v17 = vadd.f32 %v1824_v9, %v1652_v5 }
 0xc4e   :  { %v1827_v63 = vadd.f32 %v1826_v3, %v1648_v27  ;;  %v1869_v14 = vadd.f32 %v1868_v11, %v1656_v28  ;;  %v1828_v15 = vpop.f32.mrb[27].mxu1  ;;  %v4594_v16 = vpop.f32.mrb[39].mxu0 }
 0xc4f   :  { %v1829_v18 = vadd.f32 %v1828_v15, %v1652_v5 }
 0xc50   :  { %v1872_v21 = vpack.c.bf16 %v1827_v63, %v1823_v12  ;;  %v5668_v55 = vpack.c.bf16 %v1869_v14, %v1866_v13 }
 0xc51   :  { %v1873_v19 = vpack.c.bf16 %v1829_v18, %v1825_v17 }
 0xc53   :  { %v1879_v20 = vsel %vm247_vm7, %v1873_v19, 0 }
 0xc54   :  { %4596 = vmatpush3.bf16.xpose.msra.mxu1 %v1879_v20 }
 0xc55   :  { %4601 = vmatprep.subr.bf16.mxu1 %v5185_v0 }
 0xc5b   :  { %4598 = vmatmul.mubr.msk.bf16.vlgmr.msra.gmra.mrb[28].mxu1 %vm247_vm7, %v1872_v21 }
 0xc5c   :  { %4602 = vmatpush3.bf16.msra.mxu1 %v5668_v55  ;;  %4603 = vmatprep.mubr.msk.bf16.mxu1 %vm5187_vm0, %v5185_v0 }
 0xc5d   :  { %4607 = vmatprep.subr.bf16.mxu1 %v5185_v0 }
 0xd2e   :  { %v1915_v24 = vpop.f32.mrb[28].mxu1 }
 0xd2f   :  { %v1916_v26 = vadd.f32 %v5678_v25, %v1915_v24  ;;  %v4599_v29 = vpop.f32.mrb[29].mxu1 }
 0xd30   :  { %v1918_v30 = vpop.f32.mrb[30].mxu1 }
 0xd31   :  { %v1919_v32 = vadd.f32 %v5682_v31, %v1918_v30  ;;  %v4600_v33 = vpop.f32.mrb[31].mxu1  ;;  %v1922_v34 = vsel %vm711_vm10, %v1916_v26, -inf }
 0xd32   :  { %1923 = vmax.xlane.f32.xlu1 %v1922_v34 }
 0xd33   :  { %v1925_v35 = vsel %vm711_vm10, %v1919_v32, -inf }
 0xd34   :  { %1926 = vmax.xlane.f32.xlu0 %v1925_v35 }
 0xd43   :  { %1993 = vrot.lane.b32.xlu1 %v1873_v19, %s5196_s2 }
 0xd47   :  { %2115 = vrot.lane.b32.xlu1 %v1873_v19, %s5193_s26 }
 0xd4a   :  { %1990 = vrot.lane.b32.xlu0 %v1872_v21, %s5196_s2 }
 0xd4b   :  { %2113 = vrot.lane.b32.xlu1 %v1872_v21, %s5193_s26 }
 0xd4e   :  { %2236 = vrot.lane.b32.xlu0 %v1873_v19, %s5194_s27 }
 0xd4f   :  { %2234 = vrot.lane.b32.xlu1 %v1872_v21, %s5194_s27 }
 0xdbf   :  { %v1924_v36 = vpop.xlane.xlu1 %1923 }
 0xdc0   :  { %v1928_v37 = vsub.f32 %v1916_v26, %v1924_v36 }
 0xdc1   :  { %v1927_v38 = vpop.xlane.xlu0 %1926 }
 0xdc2   :  { %v1930_v40 = vmul.f32 1.442695, %v1928_v37  ;;  %v1929_v42 = vsub.f32 %v1919_v32, %v1927_v38 }
 0xdc3   :  { %v1994_v44 = vpop.permute.xlu1 %1993 }
 0xdc4   :  { %v1932_v46 = vmul.f32 1.442695, %v1929_v42  ;;  %5127 = vpow2.f32 %v1930_v40  ;;  %v1999_v56 = vsel %vm247_vm7, %v1994_v44, 0 }
 0xdc5   :  { %v1991_v47 = vpop.permute.xlu0 %1990 }
 0xdc6   :  { %5129 = vpow2.f32 %v1932_v46 }
 0xdc7   :  { %v2116_v23 = vpop.permute.xlu1 %2115 }
 0xdc8   :  { %v2121_v48 = vsel %vm247_vm7, %v2116_v23, 0 }
 0xdc9   :  { %4620 = vmatpush3.bf16.xpose.msra.mxu0 %v2121_v48  ;;  %v2237_v49 = vpop.permute.xlu0 %2236 }
 0xdca   :  { %4631 = vmatprep.subr.bf16.mxu0 %v5185_v0  ;;  %v2242_v53 = vsel %vm247_vm7, %v2237_v49, 0 }
 0xdcb   :  { %v2114_v51 = vpop.permute.xlu1 %2113 }
 0xdce   :  { %v5695_v50 = vpop.eup %5127 }
 0xdcf   :  { %v2235_v57 = vpop.permute.xlu1 %2234 }
 0xdd0   :  { %v5697_v52 = vpop.eup %5129  ;;  %4622 = vmatmul.mubr.msk.bf16.vlgmr.msra.gmra.mrb[40].mxu0 %vm247_vm7, %v2114_v51 }
 0xdd1   :  { %4632 = vmatpush3.bf16.xpose.msra.mxu0 %v2242_v53  ;;  %v1942_v54 = vpack.c.bf16 %v5697_v52, %v5695_v50  ;;  %4633 = vmatprep.mubr.msk.bf16.mxu0 %vm5187_vm0, %v5185_v0 }
 0xdd2   :  { %4643 = vmatprep.subr.bf16.mxu0 %v5185_v0 }
 0xdd3   :  { %4604 = vmatmul.mubr.msk.bf16.vlgmr.msra.gmra.mrb[32].mxu1 %vm711_vm10, %v1942_v54 }
 0xdd4   :  { %4608 = vmatpush3.bf16.xpose.msra.mxu1 %v1999_v56  ;;  %4609 = vmatprep.mubr.msk.bf16.mxu1 %vm5187_vm0, %v5185_v0 }
 0xdd5   :  { %4613 = vmatprep.subr.bf16.mxu1 %v5185_v0 }
 0xdd8   :  { %4634 = vmatmul.mubr.msk.bf16.vlgmr.msra.gmra.mrb[44].mxu0 %vm247_vm7, %v2235_v57 }
 0xdd9   :  { %4659 = vmatprep.mubr.msk.bf16.mxu0 %vm5187_vm0, %v5185_v0 }
 0xddb   :  { %4610 = vmatmul.mubr.msk.bf16.vlgmr.msra.gmra.mrb[36].mxu1 %vm247_vm7, %v1991_v47 }
 0xddc   :  { %4615 = vmatprep.mubr.msk.bf16.mxu1 %vm5187_vm0, %v5185_v0 }
 0xea3   :  { %v2157_v43 = vpop.f32.mrb[40].mxu0 }
 0xea4   :  { %v2158_v45 = vadd.f32 %v5678_v25, %v2157_v43  ;;  %v4623_v58 = vpop.f32.mrb[41].mxu0 }
 0xea5   :  { %v2160_v59 = vpop.f32.mrb[42].mxu0 }
 0xea6   :  { %v5718_v60 = vpop.f32.mrb[32].mxu1  ;;  %v4624_v61 = vpop.f32.mrb[43].mxu0  ;;  %v2164_v22 = vsel %vm711_vm10, %v2158_v45, -inf  ;;  %v2161_v63 = vadd.f32 %v5682_v31, %v2160_v59 }
 0xea7   :  { %v4605_v2 = vpop.f32.mrb[33].mxu1  ;;  %2165 = vmax.xlane.f32.xlu0 %v2164_v22  ;;  %v1934_v61 = vsel %vm711_vm10, %v5695_v50, 0.0 }
 0xea8   :  { %v5721_v4 = vpop.f32.mrb[34].mxu1  ;;  %v2167_v21 = vsel %vm711_vm10, %v2161_v63, -inf }
 0xea9   :  { %v4606_v27 = vpop.f32.mrb[35].mxu1 }
 0xeab   :  { %v2278_v28 = vpop.f32.mrb[44].mxu0 }
 0xeac   :  { %v2279_v7 = vadd.f32 %v5678_v25, %v2278_v28  ;;  %v4635_v8 = vpop.f32.mrb[45].mxu0  ;;  %v1937_v28 = vsel %vm711_vm10, %v5697_v52, 0.0 }
 0xead   :  { %v2281_v5 = vpop.f32.mrb[46].mxu0  ;;  %v5008_v8 = vld [vmem:[%s5478_s18 + $0x48] sm:$0xff]  }
 0xeae   :  { %v2035_v9 = vpop.f32.mrb[36].mxu1  ;;  %v4636_v10 = vpop.f32.mrb[47].mxu0  ;;  %v2285_v3 = vsel %vm711_vm10, %v2279_v7, -inf  ;;  %v2282_v18 = vadd.f32 %v5682_v31, %v2281_v5  ;;  %v5009_v5 = vld [vmem:[%s5478_s18 + $0x50] sm:$0xff]  }
 0xeaf   :  { %v2036_v11 = vadd.f32 %v5678_v25, %v2035_v9  ;;  %v4611_v12 = vpop.f32.mrb[37].mxu1  ;;  %2286 = vmax.xlane.f32.xlu1 %v2285_v3 }
 0xeb0   :  { %v2038_v13 = vpop.f32.mrb[38].mxu1  ;;  %v2288_v19 = vsel %vm711_vm10, %v2282_v18, -inf  ;;  %v5011_v12 = vld [vmem:[%s5478_s18 + $0x60] sm:$0xff]  }
 0xeb1   :  { %v2039_v14 = vadd.f32 %v5682_v31, %v2038_v13  ;;  %v4612_v15 = vpop.f32.mrb[39].mxu1  ;;  %v2042_v16 = vsel %vm711_vm10, %v2036_v11, -inf }
 0xeb2   :  { %2043 = vmax.xlane.f32.xlu0 %v2042_v16 }
 0xeb3   :  { %v2045_v17 = vsel %vm711_vm10, %v2039_v14, -inf }
 0xeb4   :  { %2046 = vmax.xlane.f32.xlu1 %v2045_v17 }
 0xeb6   :  { %2168 = vmax.xlane.f32.xlu0 %v2167_v21 }
 0xeba   :  { %2289 = vmax.xlane.f32.xlu0 %v2288_v19 }
 0xec5   :  { %2064 = vrot.lane.b32.xlu1 %v5668_v55, %s5196_s2 }
 0xec9   :  { %2306 = vrot.lane.b32.xlu1 %v5668_v55, %s5194_s27 }
 0xed0   :  { %2185 = vrot.lane.b32.xlu0 %v5668_v55, %s5193_s26 }
 0xf34   :  { %v2166_v20 = vpop.xlane.xlu0 %2165 }
 0xf35   :  { %v2170_v24 = vsub.f32 %v2158_v45, %v2166_v20  ;;  %v5012_v20 = vld [vmem:[%s5478_s18 + $0x68] sm:$0xff]  }
 0xf37   :  { %v2172_v25 = vmul.f32 1.442695, %v2170_v24 }
 0xf39   :  { %5131 = vpow2.f32 %v2172_v25 }
 0xf3c   :  { %v2287_v26 = vpop.xlane.xlu1 %2286 }
 0xf3d   :  { %v2291_v29 = vsub.f32 %v2279_v7, %v2287_v26  ;;  %v5007_v7 = vld [vmem:[%s5478_s18 + $0x40] sm:$0xff]   ;;  %v5013_v26 = vld [vmem:[%s5478_s18 + $0x70] sm:$0xff]  }
 0xf3e   :  { %4644 = vmatpush3.bf16.msra.mxu0 %v5007_v7 }
 0xf3f   :  { %v2044_v30 = vpop.xlane.xlu0 %2043  ;;  %v2293_v36 = vmul.f32 1.442695, %v2291_v29  ;;  %4645 = vmatprep.subr.bf16.mxu0 %v5185_v0 }
 0xf40   :  { %v2048_v31 = vsub.f32 %v2036_v11, %v2044_v30  ;;  %v5010_v11 = vld [vmem:[%s5478_s18 + $0x58] sm:$0xff]  }
 0xf41   :  { %v2047_v32 = vpop.xlane.xlu1 %2046 }
 0xf42   :  { %v2050_v33 = vmul.f32 1.442695, %v2048_v31  ;;  %v2049_v34 = vsub.f32 %v2039_v14, %v2047_v32  ;;  %4646 = vmatpush3.bf16.msra.mxu0 %v5008_v8 }
 0xf43   :  { %v5132_v35 = vpop.eup %5131  ;;  %v2169_v37 = vpop.xlane.xlu0 %2168  ;;  %4647 = vmatprep.subr.bf16.mxu0 %v5185_v0 }
 0xf44   :  { %v2052_v38 = vmul.f32 1.442695, %v2049_v34  ;;  %v2171_v40 = vsub.f32 %v2161_v63, %v2169_v37  ;;  %v2176_v42 = vsel %vm711_vm10, %v5132_v35, 0.0  ;;  %5133 = vpow2.f32 %v2050_v33  ;;  %v5014_v37 = vld [vmem:[%s5478_s18 + $0x78] sm:$0xff]  }
 0xf45   :  { %v2065_v55 = vpop.permute.xlu1 %2064  ;;  %2177 = vadd.xlane.f32.xlu0 %v2176_v42 }
 0xf46   :  { %5135 = vpow2.f32 %v2052_v38  ;;  %v2174_v44 = vmul.f32 1.442695, %v2171_v40  ;;  %4614 = vmatpush3.bf16.msra.mxu1 %v2065_v55  ;;  %4648 = vmatpush3.bf16.msra.mxu0 %v5009_v5 }
 0xf47   :  { %5137 = vpow2.f32 %v2293_v36  ;;  %v2290_v46 = vpop.xlane.xlu0 %2289  ;;  %4625 = vmatprep.subr.bf16.mxu1 %v5185_v0  ;;  %4649 = vmatprep.subr.bf16.mxu0 %v5185_v0 }
 0xf48   :  { %5139 = vpow2.f32 %v2174_v44  ;;  %v2292_v47 = vsub.f32 %v2282_v18, %v2290_v46 }
 0xf49   :  { %v2307_v2 = vpop.permute.xlu1 %2306 }
 0xf4a   :  { %v2295_v23 = vmul.f32 1.442695, %v2292_v47  ;;  %4650 = vmatpush3.bf16.msra.mxu0 %v5010_v11 }
 0xf4b   :  { %v2186_v57 = vpop.permute.xlu0 %2185  ;;  %4651 = vmatprep.subr.bf16.mxu0 %v5185_v0 }
 0xf4c   :  { %5141 = vpow2.f32 %v2295_v23 }
 0xf4e   :  { %v5134_v48 = vpop.eup %5133  ;;  %4652 = vmatpush3.bf16.msra.mxu0 %v5011_v12 }
 0xf4f   :  { %v2054_v58 = vsel %vm711_vm10, %v5134_v48, 0.0  ;;  %4653 = vmatprep.subr.bf16.mxu0 %v5185_v0 }
 0xf50   :  { %v5136_v49 = vpop.eup %5135 }
 0xf51   :  { %v5138_v51 = vpop.eup %5137  ;;  %v2057_v53 = vsel %vm711_vm10, %v5136_v49, 0.0  ;;  %v2062_v54 = vpack.c.bf16 %v5136_v49, %v5134_v48 }
 0xf52   :  { %v5140_v56 = vpop.eup %5139  ;;  %2058 = vadd.xlane.f32.xlu0 %v2057_v53  ;;  %v2297_v45 = vsel %vm711_vm10, %v5138_v51, 0.0  ;;  %4654 = vmatpush3.bf16.msra.mxu0 %v5012_v20  ;;  %v5019_v20 = vld [vmem:[%s5529_s28 + $0x60] sm:$0xff]  }
 0xf53   :  { %4616 = vmatmul.mubr.msk.bf16.vlgmr.msra.gmra.mrb[40].mxu1 %vm711_vm10, %v2062_v54  ;;  %v2179_v43 = vsel %vm711_vm10, %v5140_v56, 0.0  ;;  %v2184_v22 = vpack.c.bf16 %v5140_v56, %v5132_v35  ;;  %4655 = vmatprep.subr.bf16.mxu0 %v5185_v0 }
 0xf54   :  { %4626 = vmatpush3.bf16.msra.mxu1 %v2186_v57  ;;  %2180 = vadd.xlane.f32.xlu1 %v2179_v43 }
 0xf55   :  { %4627 = vmatprep.mubr.msk.bf16.mxu1 %vm5187_vm0, %v5185_v0  ;;  %4637 = vmatprep.subr.bf16.mxu1 %v5185_v0 }
 0xf56   :  { %2298 = vadd.xlane.f32.xlu0 %v2297_v45  ;;  %v5142_v59 = vpop.eup %5141  ;;  %4656 = vmatpush3.bf16.msra.mxu0 %v5013_v26  ;;  %v5022_v26 = vld [vmem:[%s5529_s28 + $0x78] sm:$0xff]  }
 0xf57   :  { %v2300_v27 = vsel %vm711_vm10, %v5142_v59, 0.0  ;;  %v2305_v50 = vpack.c.bf16 %v5142_v59, %v5138_v51  ;;  %4657 = vmatprep.subr.bf16.mxu0 %v5185_v0 }
 0xf58   :  { %2055 = vadd.xlane.f32.xlu1 %v2054_v58 }
 0xf5a   :  { %1935 = vadd.xlane.f32.xlu0 %v1934_v61  ;;  %4658 = vmatpush3.bf16.msra.mxu0 %v5014_v37 }
 0xf5b   :  { %4628 = vmatmul.mubr.msk.bf16.vlgmr.msra.gmra.mrb[44].mxu1 %vm711_vm10, %v2184_v22  ;;  %4683 = vmatprep.subr.bf16.mxu0 %v5185_v0 }
 0xf5c   :  { %4638 = vmatpush3.bf16.msra.mxu1 %v2307_v2  ;;  %2301 = vadd.xlane.f32.xlu1 %v2300_v27 }
 0xf5d   :  { %4639 = vmatprep.mubr.msk.bf16.mxu1 %vm5187_vm0, %v5185_v0  ;;  %4663 = vmatprep.subr.bf16.mxu1 %v5185_v0 }
 0xf60   :  { %1938 = vadd.xlane.f32.xlu1 %v1937_v28 }
 0xf63   :  { %4640 = vmatmul.mubr.msk.bf16.vlgmr.msra.gmra.mrb[48].mxu1 %vm711_vm10, %v2305_v50 }
 0xf64   :  { %4679 = vmatprep.mubr.msk.bf16.mxu1 %vm5187_vm0, %v5185_v0 }
 0xfd2   :  { %v2178_v9 = vpop.xlane.xlu0 %2177 }
 0xfdf   :  { %v2059_v10 = vpop.xlane.xlu0 %2058 }
 0xfe0   :  { %5143 = vrcp.f32 %v2059_v10 }
 0xfe1   :  { %v2181_v52 = vpop.xlane.xlu1 %2180 }
 0xfe3   :  { %v2299_v19 = vpop.xlane.xlu0 %2298 }
 0xfe5   :  { %v2056_v3 = vpop.xlane.xlu1 %2055 }
 0xfe6   :  { %5145 = vrcp.f32 %v2056_v3 }
 0xfe7   :  { %5147 = vrcp.f32 %v2178_v9  ;;  %v1936_v51 = vpop.xlane.xlu0 %1935 }
 0xfe8   :  { %5149 = vrcp.f32 %v2181_v52 }
 0xfe9   :  { %v2302_v24 = vpop.xlane.xlu1 %2301  ;;  %5151 = vrcp.f32 %v2299_v19  ;;  %v5018_v19 = vld [vmem:[%s5529_s28 + $0x58] sm:$0xff]  }
 0xfea   :  { %v5144_v63 = vpop.eup %5143  ;;  %5153 = vrcp.f32 %v2302_v24  ;;  %v5020_v24 = vld [vmem:[%s5529_s28 + $0x68] sm:$0xff]  }
 0xfeb   :  { %5155 = vrcp.f32 %v1936_v51 }
 0xfed   :  { %v1939_v53 = vpop.xlane.xlu1 %1938 }
 0xfee   :  { %5157 = vrcp.f32 %v1939_v53 }
 0xff0   :  { %v5146_v15 = vpop.eup %5145 }
 0xff1   :  { %v5148_v30 = vpop.eup %5147 }
 0xff2   :  { %v5150_v32 = vpop.eup %5149 }
 0xff3   :  { %v5152_v42 = vpop.eup %5151 }
 0xff4   :  { %v5154_v44 = vpop.eup %5153 }
 0xff5   :  { %v5156_v56 = vpop.eup %5155 }
 0xff6   :  { %v1987_v22 = vmul.f32 %v5156_v56, %v5718_v60  ;;  %v4150_v60 = vld [vmem:[%s5511_s22 + $0x1] ss:$0 sm:$0xff]  ;;  %s5844_s22 = sld [smem:[%s6070_s0 + %s5210_s10]]  }
 0xff7   :  { %s5990_s10 = sld [smem:[%s6070_s0 + %s5217_s5]]  }
 0xff8   :  { %v5158_v43 = vpop.eup %5157 }
 0xff9   :  { %v1988_v2 = vmul.f32 %v5158_v43, %v5721_v4 }
0x1026   :  { %v2104_v13 = vpop.f32.mrb[40].mxu1 }
0x1027   :  { %v4617_v14 = vpop.f32.mrb[41].mxu1  ;;  %v2111_v17 = vmul.f32 %v5146_v15, %v2104_v13 }
0x1028   :  { %v2107_v16 = vpop.f32.mrb[42].mxu1 }
0x1029   :  { %v2112_v18 = vmul.f32 %v5144_v63, %v2107_v16  ;;  %v4618_v21 = vpop.f32.mrb[43].mxu1 }
0x102a   :  { %v5017_v21 = vld [vmem:[%s5529_s28 + $0x50] sm:$0xff]  }
0x102b   :  { %v4894_v25 = vpack.i.bf16 %v2112_v18, %v2111_v17  ;;  %v5015_v18 = vld [vmem:[%s5529_s28 + $0x40] sm:$0xff]  }
0x102c   :  { %4664 = vmatpush3.bf16.msra.mxu1 %v5015_v18 }
0x102d   :  { %4895 = vrot.lane.b32.xlu0 %v4894_v25, %s5194_s27  ;;  %4665 = vmatprep.subr.bf16.mxu1 %v5185_v0  ;;  %v5021_v25 = vld [vmem:[%s5529_s28 + $0x70] sm:$0xff]  }
0x102e   :  { %v2225_v29 = vpop.f32.mrb[44].mxu1 }
0x102f   :  { %v4629_v31 = vpop.f32.mrb[45].mxu1  ;;  %v2232_v34 = vmul.f32 %v5148_v30, %v2225_v29  ;;  %v5023_v29 = vld [vmem:[%s5549_s4 + $0x40] sm:$0xff]   ;;  %v5024_v30 = vld [vmem:[%s5549_s4 + $0x48] sm:$0xff]  }
0x1030   :  { %v2228_v33 = vpop.f32.mrb[46].mxu1  ;;  %v5025_v31 = vld [vmem:[%s5549_s4 + $0x50] sm:$0xff]  }
0x1031   :  { %v2233_v35 = vmul.f32 %v5150_v32, %v2228_v33  ;;  %v4630_v36 = vpop.f32.mrb[47].mxu1  ;;  %v5026_v32 = vld [vmem:[%s5549_s4 + $0x58] sm:$0xff]   ;;  %v5027_v33 = vld [vmem:[%s5549_s4 + $0x60] sm:$0xff]  }
0x1033   :  { %v4899_v38 = vpack.i.bf16 %v2233_v35, %v2232_v34  ;;  %v5028_v34 = vld [vmem:[%s5549_s4 + $0x68] sm:$0xff]  }
0x1035   :  { %4900 = vrot.lane.b32.xlu1 %v4899_v38, %s5193_s26 }
0x1036   :  { %v2346_v40 = vpop.f32.mrb[48].mxu1 }
0x1037   :  { %v4641_v55 = vpop.f32.mrb[49].mxu1  ;;  %v2353_v47 = vmul.f32 %v5152_v42, %v2346_v40 }
0x1038   :  { %v2349_v46 = vpop.f32.mrb[50].mxu1 }
0x1039   :  { %v2354_v23 = vmul.f32 %v5154_v44, %v2349_v46  ;;  %v4642_v48 = vpop.f32.mrb[51].mxu1 }
0x103b   :  { %v4904_v49 = vpack.i.bf16 %v2354_v23, %v2353_v47 }
0x103d   :  { %4905 = vrot.lane.b32.xlu1 %v4904_v49, %s5196_s2 }
0x109f   :  { %v4896_v54 = vpop.permute.xlu0 %4895 }
0x10a0   :  { %v4898_v45 = vunpack.i.h.bf16 %v4896_v54  ;;  %v4897_v58 = vunpack.i.l.bf16 %v4896_v54 }
0x10a2   :  { %v2380_v28 = vsel %vm247_vm7, %v1988_v2, %v4898_v45  ;;  %v2379_v50 = vsel %vm247_vm7, %v1987_v22, %v4897_v58 }
0x10a7   :  { %v4901_v57 = vpop.permute.xlu1 %4900 }
0x10a8   :  { %v4903_v59 = vunpack.i.h.bf16 %v4901_v57  ;;  %v4902_v61 = vunpack.i.l.bf16 %v4901_v57  ;;  %v4161_v57 = vld [vmem:[%s5566_s8 + $0x1] ss:$0 sm:$0xff] }
0x10aa   :  { %v2381_v5 = vsel %vm250_vm9, %v2379_v50, %v4902_v61  ;;  %v2382_v52 = vsel %vm250_vm9, %v2380_v28, %v4903_v59  ;;  %v4162_v61 = vld [vmem:[%s5571_s13 + $0x1] ss:$0 sm:$0xff]  ;;  %v5029_v50 = vld [vmem:[%s5549_s4 + $0x70] sm:$0xff]  }
0x10af   :  { %v4906_v27 = vpop.permute.xlu1 %4905 }
0x10b0   :  { %v4908_v7 = vunpack.i.h.bf16 %v4906_v27  ;;  %v4907_v8 = vunpack.i.l.bf16 %v4906_v27 }
0x10b2   :  { %v2383_v9 = vsel %vm253_vm8, %v2381_v5, %v4907_v8  ;;  %v2384_v10 = vsel %vm253_vm8, %v2382_v52, %v4908_v7  ;;  %v5030_v7 = vld [vmem:[%s5549_s4 + $0x78] sm:$0xff]   ;;  %v4180_v8 = vld [vmem:[%s5585_s19 + $0x1] ss:$0 sm:$0xff] }
0x10b3   :  { %v2385_v3 = vpack.c.bf16 %v2384_v10, %v2383_v9 }
0x10b5   :  { %4660 = vmatmul.mubr.bf16.vlgmr.msra.gmra.mrb[48].mxu0 %v2385_v3 }
0x10b6   :  { %4699 = vmatprep.mubr.msk.bf16.mxu0 %vm5187_vm0, %v5185_v0  ;;  %4684 = vmatpush3.bf16.msra.mxu0 %v5023_v29  ;;  %v5037_v29 = vld [vmem:[%s5844_s22 + $0x20] ss:$8 sps:$4 sm:$0xff]  }
0x10b7   :  { %4685 = vmatprep.subr.bf16.mxu0 %v5185_v0 }
0x10ba   :  { %4686 = vmatpush3.bf16.msra.mxu0 %v5024_v30  ;;  %v5042_v30 = vld [vmem:[%s5844_s22 + $0x34] ss:$8 sps:$4 sm:$0xff]  }
0x10bb   :  { %4687 = vmatprep.subr.bf16.mxu0 %v5185_v0 }
0x10be   :  { %4688 = vmatpush3.bf16.msra.mxu0 %v5025_v31  ;;  %v5040_v31 = vld [vmem:[%s5844_s22 + $0x30] ss:$8 sps:$4 sm:$0xff]  }
0x10bf   :  { %4689 = vmatprep.subr.bf16.mxu0 %v5185_v0 }
0x10c2   :  { %4690 = vmatpush3.bf16.msra.mxu0 %v5026_v32  ;;  %v5045_v32 = vld [vmem:[%s5844_s22 + $0x44] ss:$8 sps:$4 sm:$0xff]  }
0x10c3   :  { %4691 = vmatprep.subr.bf16.mxu0 %v5185_v0 }
0x10c6   :  { %4692 = vmatpush3.bf16.msra.mxu0 %v5027_v33  ;;  %v5043_v33 = vld [vmem:[%s5844_s22 + $0x40] ss:$8 sps:$4 sm:$0xff]  }
0x10c7   :  { %4693 = vmatprep.subr.bf16.mxu0 %v5185_v0 }
0x10ca   :  { %4694 = vmatpush3.bf16.msra.mxu0 %v5028_v34  ;;  %v5048_v34 = vld [vmem:[%s5844_s22 + $0x54] ss:$8 sps:$4 sm:$0xff]  }
0x10cb   :  { %4695 = vmatprep.subr.bf16.mxu0 %v5185_v0 }
0x10ce   :  { %4696 = vmatpush3.bf16.msra.mxu0 %v5029_v50 }
0x10cf   :  { %4697 = vmatprep.subr.bf16.mxu0 %v5185_v0 }
0x10d2   :  { %4698 = vmatpush3.bf16.msra.mxu0 %v5030_v7  ;;  %v4218_v7 = vld [vmem:[%s5647_s7 + $0x1] ss:$0 sm:$0xff] }
0x1188   :  { %v2493_v4 = vpop.f32.mrb[48].mxu0 }
0x1189   :  { %v2494_v11 = vadd.f32 %v4150_v60, %v2493_v4  ;;  %v4661_v12 = vpop.f32.mrb[49].mxu0 }
0x118a   :  { %v2496_v13 = vpop.f32.mrb[50].mxu0 }
0x118b   :  { %v5792_v63 = vadd.f32 %v2494_v11, %v5653_v62  ;;  %v2497_v14 = vadd.f32 %v4150_v60, %v2496_v13  ;;  %v4662_v15 = vpop.f32.mrb[51].mxu0  ;;  %v5031_v13 = vld [vmem:[%s5844_s22] ss:$8 sps:$4 sm:$0xff]  }
0x118d   :  { %v5795_v16 = vadd.f32 %v2497_v14, %v5655_v1  ;;  %2506 = vadd.xlane.f32.xlu0 %v5792_v63  ;;  %v2512_v17 = vmul.f32 %v5792_v63, %v5792_v63  ;;  %v5016_v1 = vld [vmem:[%s5529_s28 + $0x48] sm:$0xff]   ;;  %v4206_v14 = vld [vmem:[%s5595_s24 + $0x1] ss:$0 sm:$0xff]  ;;  %s5212_s28 = smov 22  }
0x118e   :  { %4666 = vmatpush3.bf16.msra.mxu1 %v5016_v1  ;;  %s5877_s9 = sld [smem:[%s6070_s0 + %s5212_s28]]  }
0x118f   :  { %2508 = vadd.xlane.f32.xlu1 %v5795_v16  ;;  %v2513_v62 = vmul.f32 %v5795_v16, %v5795_v16  ;;  %4667 = vmatprep.subr.bf16.mxu1 %v5185_v0  ;;  %s6012_s28 = sld [smem:[%s6070_s0 + %s5218_s14]]  }
0x1191   :  { %2514 = vadd.xlane.f32.xlu0 %v2512_v17 }
0x1192   :  { %4668 = vmatpush3.bf16.msra.mxu1 %v5017_v21 }
0x1193   :  { %4669 = vmatprep.subr.bf16.mxu1 %v5185_v0 }
0x1195   :  { %2516 = vadd.xlane.f32.xlu0 %v2513_v62 }
0x1196   :  { %4670 = vmatpush3.bf16.msra.mxu1 %v5018_v19 }
0x1197   :  { %4671 = vmatprep.subr.bf16.mxu1 %v5185_v0 }
0x119a   :  { %4672 = vmatpush3.bf16.msra.mxu1 %v5019_v20 }
0x119b   :  { %4673 = vmatprep.subr.bf16.mxu1 %v5185_v0 }
0x119e   :  { %4674 = vmatpush3.bf16.msra.mxu1 %v5020_v24  ;;  %v5036_v24 = vld [vmem:[%s5844_s22 + $0x14] ss:$8 sps:$4 sm:$0xff]  }
0x119f   :  { %4675 = vmatprep.subr.bf16.mxu1 %v5185_v0 }
0x11a2   :  { %4676 = vmatpush3.bf16.msra.mxu1 %v5021_v25  ;;  %v5034_v25 = vld [vmem:[%s5844_s22 + $0x10] ss:$8 sps:$4 sm:$0xff]  }
0x11a3   :  { %4677 = vmatprep.subr.bf16.mxu1 %v5185_v0 }
0x11a6   :  { %4678 = vmatpush3.bf16.msra.mxu1 %v5022_v26  ;;  %v5039_v26 = vld [vmem:[%s5844_s22 + $0x24] ss:$8 sps:$4 sm:$0xff]  }
0x121a   :  { %v2507_v35 = vpop.xlane.xlu0 %2506 }
0x121b   :  { %v2510_v36 = vmul.f32 0.010416667, %v2507_v35  ;;  %v5211_v35 = vmov 0.0|0.0  }
0x121c   :  { %v2509_v37 = vpop.xlane.xlu1 %2508  ;;  %4838 = vmatprep.subr.bf16.mxu1 %v5211_v35 }
0x121d   :  { %v2520_v40 = vmul.f32 %v2510_v36, %v2510_v36  ;;  %v2511_v42 = vmul.f32 0.010416667, %v2509_v37  ;;  %v2524_v53 = vsub.f32 %v5792_v63, %v2510_v36  ;;  %v5033_v63 = vld [vmem:[%s5844_s22 + $0x4] ss:$8 sps:$4 sm:$0xff]   ;;  %v5046_v36 = vld [vmem:[%s5844_s22 + $0x50] ss:$8 sps:$4 sm:$0xff]  }
0x121e   :  { %v2515_v38 = vpop.xlane.xlu0 %2514  ;;  %3123 = vmatprep.subr.bf16.mxu0 %v5033_v63  ;;  %v5051_v37 = vld [vmem:[%s5844_s22 + $0x64] ss:$8 sps:$4 sm:$0xff]   ;;  %v5061_v63 = vld [vmem:[%s5877_s9 + $0x30] sm:$0xff]  }
0x121f   :  { %v2518_v55 = vmul.f32 0.010416667, %v2515_v38  ;;  %v2521_v47 = vmul.f32 %v2511_v42, %v2511_v42  ;;  %v2525_v43 = vsub.f32 %v5795_v16, %v2511_v42  ;;  %v5049_v38 = vld [vmem:[%s5844_s22 + $0x60] ss:$8 sps:$4 sm:$0xff]   ;;  %v5052_v42 = vld [vmem:[%s5844_s22 + $0x70] ss:$8 sps:$4 sm:$0xff]  }
0x1221   :  { %v2522_v44 = vsub.f32 %v2518_v55, %v2520_v40  ;;  %v5054_v40 = vld [vmem:[%s5844_s22 + $0x74] ss:$8 sps:$4 sm:$0xff]  }
0x1222   :  { %v2517_v46 = vpop.xlane.xlu0 %2516 }
0x1223   :  { %v2526_v23 = vadd.f32 1e-05, %v2522_v44  ;;  %v2519_v48 = vmul.f32 0.010416667, %v2517_v46 }
0x1225   :  { %5159 = vrsqrt.f32 %v2526_v23  ;;  %v2523_v49 = vsub.f32 %v2519_v48, %v2521_v47 }
0x1227   :  { %v2527_v51 = vadd.f32 1e-05, %v2523_v49 }
0x1229   :  { %5161 = vrsqrt.f32 %v2527_v51 }
0x122f   :  { %v5160_v54 = vpop.eup %5159 }
0x1230   :  { %v2530_v56 = vmul.f32 %v5160_v54, %v2524_v53 }
0x1232   :  { %v2538_v59 = vmul.f32 %v4161_v57, %v2530_v56 }
0x1233   :  { %v5162_v45 = vpop.eup %5161 }
0x1234   :  { %v2531_v58 = vmul.f32 %v5162_v45, %v2525_v43  ;;  %v2546_v2 = vadd.f32 %v4162_v61, %v2538_v59 }
0x1236   :  { %v2539_v22 = vmul.f32 %v4161_v57, %v2531_v58 }
0x1238   :  { %v2547_v27 = vadd.f32 %v4162_v61, %v2539_v22  ;;  %v4217_v61 = vld [vmem:[%s5642_s30 + $0x1] ss:$0 sm:$0xff] }
0x123a   :  { %v2548_v28 = vpack.c.bf16 %v2547_v27, %v2546_v2 }
0x123c   :  { %4680 = vmatmul.mubr.bf16.vlgmr.msra.gmra.mrb[52].mxu1 %v2548_v28 }
0x123d   :  { %4707 = vmatprep.mubr.msk.f32.mxu1 %vm5187_vm0, %v5185_v0 }
0x130f   :  { %v2656_v5 = vpop.f32.mrb[52].mxu1 }
0x1310   :  { %v2657_v52 = vadd.f32 %v4180_v8, %v2656_v5  ;;  %v4681_v9 = vpop.f32.mrb[53].mxu1 }
0x1311   :  { %v2659_v10 = vpop.f32.mrb[54].mxu1 }
0x1312   :  { %v2660_v3 = vadd.f32 %v4180_v8, %v2659_v10  ;;  %v4682_v60 = vpop.f32.mrb[55].mxu1  ;;  %v2663_v4 = vmax.f32 %v2657_v52, 0.0  ;;  %v2828_v10 = vld [vmem:[%s3963_s15] sm:$0x3]  ;;  %s5221_s15 = smov 31  }
0x1313   :  { %v5056_v60 = vld [vmem:[%s5877_s9 + $0x8] sm:$0xff]   ;;  %s3989_s19 = sld [smem:[%s6070_s0 + %s5221_s15]]  }
0x1314   :  { %v2664_v11 = vmax.f32 %v2660_v3, 0.0  ;;  %v5055_v3 = vld [vmem:[%s5877_s9] sm:$0xff]  }
0x1316   :  { %v2665_v12 = vpack.c.bf16 %v2664_v11, %v2663_v4  ;;  %v5057_v4 = vld [vmem:[%s5877_s9 + $0x10] sm:$0xff]   ;;  %v5058_v11 = vld [vmem:[%s5877_s9 + $0x18] sm:$0xff]  }
0x1318   :  { %4700 = vmatmul.mubr.bf16.vlgmr.msra.gmra.mrb[52].mxu0 %v2665_v12  ;;  %v5059_v12 = vld [vmem:[%s5877_s9 + $0x20] sm:$0xff]  }
0x1319   :  { %3155 = vmatprep.mubr.bf16.mxu0 %v5188_v6  ;;  %3124 = vmatpush1.bf16.msra.mxu0 %v5031_v13  ;;  %v5060_v13 = vld [vmem:[%s5877_s9 + $0x28] sm:$0xff]  }
0x131a   :  { %3125 = vmatprep.subr.bf16.mxu0 %v5036_v24 }
0x131d   :  { %3126 = vmatpush1.bf16.msra.mxu0 %v5034_v25 }
0x131e   :  { %3127 = vmatprep.subr.bf16.mxu0 %v5039_v26 }
0x1321   :  { %3128 = vmatpush1.bf16.msra.mxu0 %v5037_v29 }
0x1322   :  { %3129 = vmatprep.subr.bf16.mxu0 %v5042_v30 }
0x1325   :  { %3130 = vmatpush1.bf16.msra.mxu0 %v5040_v31 }
0x1326   :  { %3131 = vmatprep.subr.bf16.mxu0 %v5045_v32 }
0x1329   :  { %3132 = vmatpush1.bf16.msra.mxu0 %v5043_v33 }
0x132a   :  { %3133 = vmatprep.subr.bf16.mxu0 %v5048_v34 }
0x132d   :  { %3134 = vmatpush1.bf16.msra.mxu0 %v5046_v36 }
0x132e   :  { %3135 = vmatprep.subr.bf16.mxu0 %v5051_v37 }
0x1331   :  { %3136 = vmatpush1.bf16.msra.mxu0 %v5049_v38  ;;  %v3166_v38 = vld [vmem:[%s3962_s3] sm:$0x3] }
0x1332   :  { %3137 = vmatprep.subr.bf16.mxu0 %v5054_v40 }
0x1335   :  { %3138 = vmatpush1.bf16.msra.mxu0 %v5052_v42 }
0x1336   :  { %4748 = vmatprep.subr.bf16.mxu0 %v5185_v0 }
0x13eb   :  { %v2773_v15 = vpop.f32.mrb[52].mxu0 }
0x13ec   :  { %v2774_v16 = vadd.f32 %v4206_v14, %v2773_v15  ;;  %v4701_v17 = vpop.f32.mrb[53].mxu0  ;;  %v3031_v15 = vld [vmem:[%s3983_s20] sm:$0x3]  ;;  %s5222_s20 = smov 29  }
0x13ed   :  { %v2776_v6 = vpop.f32.mrb[54].mxu0  ;;  %s3987_s24 = sld [smem:[%s6070_s0 + %s5222_s20]]  }
0x13ee   :  { %v5849_v62 = vadd.f32 %v2774_v16, %v2546_v2  ;;  %v2777_v18 = vadd.f32 %v4206_v14, %v2776_v6  ;;  %v4702_v1 = vpop.f32.mrb[55].mxu0  ;;  %v5062_v14 = vld [vmem:[%s5877_s9 + $0x38] sm:$0xff]   ;;  %v3036_v16 = vrot.slane %v3031_v15, %v5365_v39  ;;  %v3040_v6 = vrot.slane %v3031_v15, %v5369_v41  ;;  %v4220_v41 = vld [vmem:[%s3981_s1] ss:$0 sm:$0xff]  ;;  %s5220_s9 = smov 27  }
0x13ef   :  { %s3985_s13 = sld [smem:[%s6070_s0 + %s5220_s9]]  }
0x13f0   :  { %v5851_v21 = vadd.f32 %v2777_v18, %v2547_v27  ;;  %2786 = vadd.xlane.f32.xlu1 %v5849_v62  ;;  %v2792_v19 = vmul.f32 %v5849_v62, %v5849_v62 }
0x13f2   :  { %2788 = vadd.xlane.f32.xlu0 %v5851_v21  ;;  %v2793_v20 = vmul.f32 %v5851_v21, %v5851_v21 }
0x13f4   :  { %2794 = vadd.xlane.f32.xlu1 %v2792_v19 }
0x13f6   :  { %2796 = vadd.xlane.f32.xlu0 %v2793_v20 }
0x147d   :  { %v2787_v55 = vpop.xlane.xlu1 %2786 }
0x147e   :  { %v2790_v44 = vmul.f32 0.010416667, %v2787_v55 }
0x147f   :  { %v2789_v46 = vpop.xlane.xlu0 %2788 }
0x1480   :  { %v2791_v47 = vmul.f32 0.010416667, %v2789_v46  ;;  %v2800_v48 = vmul.f32 %v2790_v44, %v2790_v44  ;;  %v2804_v58 = vsub.f32 %v5849_v62, %v2790_v44 }
0x1481   :  { %v2795_v23 = vpop.xlane.xlu1 %2794 }
0x1482   :  { %v2798_v49 = vmul.f32 0.010416667, %v2795_v23  ;;  %v2801_v53 = vmul.f32 %v2791_v47, %v2791_v47  ;;  %v2805_v22 = vsub.f32 %v5851_v21, %v2791_v47 }
0x1483   :  { %v2797_v51 = vpop.xlane.xlu0 %2796 }
0x1484   :  { %v2802_v54 = vsub.f32 %v2798_v49, %v2800_v48  ;;  %v2799_v56 = vmul.f32 0.010416667, %v2797_v51 }
0x1486   :  { %v2806_v57 = vadd.f32 1e-05, %v2802_v54  ;;  %v2803_v43 = vsub.f32 %v2799_v56, %v2801_v53 }
0x1488   :  { %5163 = vrsqrt.f32 %v2806_v57  ;;  %v2807_v45 = vadd.f32 1e-05, %v2803_v43 }
0x148a   :  { %5165 = vrsqrt.f32 %v2807_v45 }
0x1492   :  { %v5164_v59 = vpop.eup %5163 }
0x1493   :  { %v2810_v2 = vmul.f32 %v5164_v59, %v2804_v58 }
0x1494   :  { %v5166_v27 = vpop.eup %5165 }
0x1495   :  { %v2811_v28 = vmul.f32 %v5166_v27, %v2805_v22  ;;  %v2818_v50 = vmul.f32 %v4217_v61, %v2810_v2 }
0x1497   :  { %v2819_v8 = vmul.f32 %v4217_v61, %v2811_v28  ;;  %v2826_v5 = vadd.f32 %v4218_v7, %v2818_v50 }
0x1499   :  { %v2827_v52 = vadd.f32 %v4218_v7, %v2819_v8 }
0x149b   :  { %v4839_v9 = vpack.c.bf16 %v2827_v52, %v2826_v5 }
0x149d   :  { %4840 = vmatpush3.bf16.msra.mxu1 %v4839_v9  ;;  %3156 = vmatmul.mubr.bf16.vlgmr.msra.gmra.mrb[56].mxu0 %v4839_v9 }
0x149e   :  { %4710 = vmatprep.subr.bf16.mxu1 %v5185_v0  ;;  %4750 = vmatprep.mubr.msk.bf16.mxu0 %vm5187_vm0, %v5185_v0 }
0x14a0   :  { %4708 = vmatmul.mubr.msk.f32.vlgmr.msra.gmra.mrb[56].mxu1 %vm711_vm10, %v2828_v10 }
0x14a1   :  { %4711 = vmatpush3.bf16.msra.mxu1 %v5055_v3  ;;  %4726 = vmatprep.mubr.msk.bf16.mxu1 %vm5187_vm0, %v5185_v0 }
0x14a2   :  { %4712 = vmatprep.subr.bf16.mxu1 %v5185_v0 }
0x14a5   :  { %4713 = vmatpush3.bf16.msra.mxu1 %v5056_v60 }
0x14a6   :  { %4714 = vmatprep.subr.bf16.mxu1 %v5185_v0 }
0x14a9   :  { %4715 = vmatpush3.bf16.msra.mxu1 %v5057_v4 }
0x14aa   :  { %4716 = vmatprep.subr.bf16.mxu1 %v5185_v0 }
0x14ad   :  { %4717 = vmatpush3.bf16.msra.mxu1 %v5058_v11 }
0x14ae   :  { %4718 = vmatprep.subr.bf16.mxu1 %v5185_v0 }
0x14b1   :  { %4719 = vmatpush3.bf16.msra.mxu1 %v5059_v12 }
0x14b2   :  { %4720 = vmatprep.subr.bf16.mxu1 %v5185_v0 }
0x14b5   :  { %4721 = vmatpush3.bf16.msra.mxu1 %v5060_v13 }
0x14b6   :  { %4722 = vmatprep.subr.bf16.mxu1 %v5185_v0 }
0x14b9   :  { %4723 = vmatpush3.bf16.msra.mxu1 %v5061_v63 }
0x14ba   :  { %4724 = vmatprep.subr.bf16.mxu1 %v5185_v0 }
0x14bd   :  { %4725 = vmatpush3.bf16.msra.mxu1 %v5062_v14 }
0x14be   :  { %4730 = vmatprep.subr.bf16.mxu1 %v5185_v0 }
0x1570   :  { %v3157_v17 = vpop.f32.mrb[56].mxu0 }
0x1571   :  { %v3159_v62 = vpop.f32.mrb[57].mxu0  ;;  %v3158_v1 = vadd.f32 %v3157_v17, %v3036_v16 }
0x1572   :  { %v3161_v18 = vpop.f32.mrb[58].mxu0  ;;  %v3160_v24 = vadd.f32 %v3159_v62, %v3040_v6 }
0x1573   :  { %v3162_v21 = vadd.f32 %v3161_v18, %v3036_v16  ;;  %v2898_v19 = vpop.f32.mrb[56].mxu1  ;;  %v3163_v20 = vpop.f32.mrb[59].mxu0 }
0x1574   :  { %v2902_v25 = vpack.c.bf16 %v2898_v19, %v2898_v19  ;;  %v3164_v26 = vadd.f32 %v3163_v20, %v3040_v6  ;;  %v4709_v29 = vpop.f32.mrb[57].mxu1 }
0x1575   :  { %v3168_v30 = vpack.c.bf16 %v3162_v21, %v3158_v1 }
0x1576   :  { %v5913_v31 = vpack.c.bf16 %v3164_v26, %v3160_v24  ;;  %4727 = vmatmul.mubr.bf16.vlgmr.msra.gmra.mrb[60].mxu1 %v2902_v25 }
0x1577   :  { %3276 = vrot.lane.b32.xlu0 %v3168_v30, %s5196_s2  ;;  %v3174_v39 = vsel %vm247_vm7, %v3168_v30, 0  ;;  %4732 = vmatprep.mubr.msk.bf16.mxu1 %vm5187_vm0, %v5185_v0 }
0x1578   :  { %4731 = vmatpush3.bf16.xpose.msra.mxu1 %v3174_v39 }
0x1579   :  { %4736 = vmatprep.subr.bf16.mxu1 %v5185_v0 }
0x15e9   :  { %v3277_v53 = vpop.permute.xlu0 %3276 }
0x15ea   :  { %v3282_v57 = vsel %vm247_vm7, %v3277_v53, 0 }
0x1649   :  { %v3008_v32 = vpop.f32.mrb[60].mxu1 }
0x164a   :  { %v3009_v33 = vadd.f32 %v4220_v41, %v3008_v32  ;;  %v4728_v34 = vpop.f32.mrb[61].mxu1 }
0x164b   :  { %v3011_v35 = vpop.f32.mrb[62].mxu1 }
0x164c   :  { %v3167_v36 = vpack.c.bf16 %v3009_v33, %v3009_v33  ;;  %v4729_v37 = vpop.f32.mrb[63].mxu1 }
0x164e   :  { %3383 = vrot.lane.b32.xlu0 %v3167_v36, %s5193_s26  ;;  %4733 = vmatmul.mubr.msk.bf16.vlgmr.msra.gmra.mrb[64].mxu1 %vm247_vm7, %v3167_v36 }
0x164f   :  { %4737 = vmatpush3.bf16.msra.mxu1 %v5913_v31  ;;  %4738 = vmatprep.mubr.msk.bf16.mxu1 %vm5187_vm0, %v5185_v0 }
0x1650   :  { %4742 = vmatprep.subr.bf16.mxu1 %v5185_v0 }
0x1652   :  { %3491 = vrot.lane.b32.xlu0 %v3167_v36, %s5194_s27 }
0x16c0   :  { %v3384_v59 = vpop.permute.xlu0 %3383 }
0x16c4   :  { %v3492_v22 = vpop.permute.xlu0 %3491 }
0x1721   :  { %v3210_v40 = vpop.f32.mrb[64].mxu1 }
0x1722   :  { %v3211_v42 = vadd.f32 %v3210_v40, %v3166_v38  ;;  %v4734_v55 = vpop.f32.mrb[65].mxu1 }
0x1723   :  { %v3213_v44 = vpop.f32.mrb[66].mxu1  ;;  %v5064_v55 = vld [vmem:[%s5990_s10 + $0x8] sm:$0xff]  }
0x1724   :  { %v4735_v46 = vpop.f32.mrb[67].mxu1  ;;  %v3217_v47 = vsel %vm3216_vm11, %v3211_v42, -inf  ;;  %v5065_v44 = vld [vmem:[%s5990_s10 + $0x10] sm:$0xff]  }
0x1725   :  { %3218 = vmax.xlane.f32.xlu1 %v3217_v47  ;;  %v5066_v47 = vld [vmem:[%s5990_s10 + $0x18] sm:$0xff]  }
0x1736   :  { %3273 = vrot.lane.b32.xlu1 %v3167_v36, %s5196_s2 }
0x173a   :  { %3385 = vrot.lane.b32.xlu1 %v3168_v30, %s5193_s26 }
0x173e   :  { %3493 = vrot.lane.b32.xlu1 %v3168_v30, %s5194_s27 }
0x17b2   :  { %v3219_v23 = vpop.xlane.xlu1 %3218 }
0x17b3   :  { %v3220_v48 = vsub.f32 %v3211_v42, %v3219_v23  ;;  %v5063_v42 = vld [vmem:[%s5990_s10] sm:$0xff]  }
0x17b4   :  { %v5067_v23 = vld [vmem:[%s5990_s10 + $0x20] sm:$0xff]  }
0x17b5   :  { %v3221_v49 = vmul.f32 1.442695, %v3220_v48 }
0x17b6   :  { %v3274_v56 = vpop.permute.xlu1 %3273 }
0x17b7   :  { %5167 = vpow2.f32 %v3221_v49  ;;  %v5068_v49 = vld [vmem:[%s5990_s10 + $0x28] sm:$0xff]  }
0x17ba   :  { %v3386_v43 = vpop.permute.xlu1 %3385 }
0x17bb   :  { %v3391_v45 = vsel %vm247_vm7, %v3386_v43, 0 }
0x17be   :  { %v3494_v58 = vpop.permute.xlu1 %3493 }
0x17bf   :  { %v3499_v61 = vsel %vm247_vm7, %v3494_v58, 0 }
0x17c1   :  { %v5937_v51 = vpop.eup %5167 }
0x17c2   :  { %v3227_v54 = vpack.c.bf16 %v5937_v51, %v5937_v51  ;;  %v3223_v32 = vsel %vm3216_vm11, %v5937_v51, 0.0 }
0x17c4   :  { %4739 = vmatmul.mubr.msk.bf16.vlgmr.msra.gmra.mrb[68].mxu1 %vm711_vm10, %v3227_v54  ;;  %v5069_v54 = vld [vmem:[%s5990_s10 + $0x30] sm:$0xff]  }
0x17c5   :  { %4743 = vmatpush3.bf16.xpose.msra.mxu1 %v3282_v57  ;;  %4744 = vmatprep.mubr.msk.bf16.mxu1 %vm5187_vm0, %v5185_v0 }
0x17c6   :  { %4754 = vmatprep.subr.bf16.mxu1 %v5185_v0 }
0x17cc   :  { %4745 = vmatmul.mubr.msk.bf16.vlgmr.msra.gmra.mrb[72].mxu1 %vm247_vm7, %v3274_v56 }
0x17cd   :  { %4755 = vmatpush3.bf16.xpose.msra.mxu1 %v3391_v45  ;;  %4756 = vmatprep.mubr.msk.bf16.mxu1 %vm5187_vm0, %v5185_v0 }
0x17ce   :  { %4766 = vmatprep.subr.bf16.mxu1 %v5185_v0 }
0x17d4   :  { %4757 = vmatmul.mubr.msk.bf16.vlgmr.msra.gmra.mrb[76].mxu1 %vm247_vm7, %v3384_v59  ;;  %v5070_v59 = vld [vmem:[%s5990_s10 + $0x38] sm:$0xff]  }
0x17d5   :  { %4767 = vmatpush3.bf16.xpose.msra.mxu1 %v3499_v61  ;;  %4768 = vmatprep.mubr.msk.bf16.mxu1 %vm5187_vm0, %v5185_v0 }
0x17d6   :  { %4778 = vmatprep.subr.bf16.mxu1 %v5185_v0 }
0x17dc   :  { %4769 = vmatmul.mubr.msk.bf16.vlgmr.msra.gmra.mrb[80].mxu1 %vm247_vm7, %v3492_v22 }
0x17dd   :  { %4794 = vmatprep.mubr.msk.bf16.mxu1 %vm5187_vm0, %v5185_v0  ;;  %4779 = vmatpush3.bf16.msra.mxu1 %v5063_v42  ;;  %v4262_v42 = vld [vmem:[%s3987_s24] ss:$0 sm:$0xff] }
0x17de   :  { %4780 = vmatprep.subr.bf16.mxu1 %v5185_v0 }
0x17e1   :  { %4781 = vmatpush3.bf16.msra.mxu1 %v5064_v55 }
0x17e2   :  { %4782 = vmatprep.subr.bf16.mxu1 %v5185_v0 }
0x17e5   :  { %4783 = vmatpush3.bf16.msra.mxu1 %v5065_v44 }
0x17e6   :  { %4784 = vmatprep.subr.bf16.mxu1 %v5185_v0 }
0x17e9   :  { %4785 = vmatpush3.bf16.msra.mxu1 %v5066_v47 }
0x17ea   :  { %4786 = vmatprep.subr.bf16.mxu1 %v5185_v0 }
0x17ed   :  { %4787 = vmatpush3.bf16.msra.mxu1 %v5067_v23 }
0x17ee   :  { %4788 = vmatprep.subr.bf16.mxu1 %v5185_v0 }
0x17f1   :  { %4789 = vmatpush3.bf16.msra.mxu1 %v5068_v49 }
0x17f2   :  { %4790 = vmatprep.subr.bf16.mxu1 %v5185_v0 }
0x17f5   :  { %4791 = vmatpush3.bf16.msra.mxu1 %v5069_v54 }
0x17f6   :  { %4792 = vmatprep.subr.bf16.mxu1 %v5185_v0 }
0x17f9   :  { %4793 = vmatpush3.bf16.msra.mxu1 %v5070_v59 }
0x17fa   :  { %4818 = vmatprep.subr.bf16.mxu1 %v5185_v0 }
0x1897   :  { %v5959_v2 = vpop.f32.mrb[68].mxu1 }
0x1898   :  { %v4740_v27 = vpop.f32.mrb[69].mxu1 }
0x1899   :  { %v3268_v28 = vpop.f32.mrb[70].mxu1 }
0x189a   :  { %v4741_v50 = vpop.f32.mrb[71].mxu1 }
0x189f   :  { %v3318_v7 = vpop.f32.mrb[72].mxu1 }
0x18a0   :  { %v3319_v8 = vadd.f32 %v3318_v7, %v3166_v38  ;;  %v4746_v5 = vpop.f32.mrb[73].mxu1 }
0x18a1   :  { %v3321_v52 = vpop.f32.mrb[74].mxu1 }
0x18a2   :  { %v4747_v9 = vpop.f32.mrb[75].mxu1  ;;  %v3324_v10 = vsel %vm3216_vm11, %v3319_v8, -inf  ;;  %v5071_v52 = vld [vmem:[%s6012_s28] sm:$0xff]  }
0x18a3   :  { %3325 = vmax.xlane.f32.xlu1 %v3324_v10 }
0x18a7   :  { %v3427_v3 = vpop.f32.mrb[76].mxu1 }
0x18a8   :  { %v3428_v60 = vadd.f32 %v3427_v3, %v3166_v38  ;;  %v4758_v4 = vpop.f32.mrb[77].mxu1 }
0x18a9   :  { %v3430_v11 = vpop.f32.mrb[78].mxu1 }
0x18aa   :  { %v4759_v12 = vpop.f32.mrb[79].mxu1  ;;  %v3433_v13 = vsel %vm3216_vm11, %v3428_v60, -inf  ;;  %v5073_v11 = vld [vmem:[%s6012_s28 + $0x10] sm:$0xff]  }
0x18ab   :  { %3434 = vmax.xlane.f32.xlu0 %v3433_v13  ;;  %v5074_v12 = vld [vmem:[%s6012_s28 + $0x18] sm:$0xff]   ;;  %v5075_v13 = vld [vmem:[%s6012_s28 + $0x20] sm:$0xff]  }
0x18af   :  { %v3535_v63 = vpop.f32.mrb[80].mxu1 }
0x18b0   :  { %v3536_v14 = vadd.f32 %v3535_v63, %v3166_v38  ;;  %v4770_v15 = vpop.f32.mrb[81].mxu1  ;;  %v5076_v63 = vld [vmem:[%s6012_s28 + $0x28] sm:$0xff]  }
0x18b1   :  { %v3538_v16 = vpop.f32.mrb[82].mxu1 }
0x18b2   :  { %v4771_v17 = vpop.f32.mrb[83].mxu1  ;;  %v3541_v6 = vsel %vm3216_vm11, %v3536_v14, -inf }
0x18b3   :  { %3542 = vmax.xlane.f32.xlu0 %v3541_v6 }
0x18b4   :  { %3336 = vrot.lane.b32.xlu1 %v5913_v31, %s5196_s2 }
0x18b8   :  { %3552 = vrot.lane.b32.xlu1 %v5913_v31, %s5194_s27 }
0x18c9   :  { %3444 = vrot.lane.b32.xlu0 %v5913_v31, %s5193_s26 }
0x1930   :  { %v3326_v62 = vpop.xlane.xlu1 %3325 }
0x1931   :  { %v3327_v18 = vsub.f32 %v3319_v8, %v3326_v62 }
0x1933   :  { %v3328_v1 = vmul.f32 1.442695, %v3327_v18 }
0x1934   :  { %v3337_v21 = vpop.permute.xlu1 %3336 }
0x1935   :  { %5169 = vpow2.f32 %v3328_v1  ;;  %4749 = vmatpush3.bf16.msra.mxu0 %v3337_v21 }
0x1936   :  { %4760 = vmatprep.subr.bf16.mxu0 %v5185_v0 }
0x1938   :  { %v3435_v19 = vpop.xlane.xlu0 %3434  ;;  %v3553_v36 = vpop.permute.xlu1 %3552 }
0x1939   :  { %v3436_v20 = vsub.f32 %v3428_v60, %v3435_v19  ;;  %v5072_v60 = vld [vmem:[%s6012_s28 + $0x8] sm:$0xff]  }
0x193b   :  { %v3437_v24 = vmul.f32 1.442695, %v3436_v20 }
0x193d   :  { %5171 = vpow2.f32 %v3437_v24  ;;  %v5078_v24 = vld [vmem:[%s6012_s28 + $0x38] sm:$0xff]  }
0x193f   :  { %v5170_v25 = vpop.eup %5169 }
0x1940   :  { %v3543_v26 = vpop.xlane.xlu0 %3542  ;;  %v3330_v29 = vsel %vm3216_vm11, %v5170_v25, 0.0  ;;  %v3334_v30 = vpack.c.bf16 %v5170_v25, %v5170_v25 }
0x1941   :  { %v3544_v39 = vsub.f32 %v3536_v14, %v3543_v26  ;;  %3331 = vadd.xlane.f32.xlu1 %v3330_v29  ;;  %v5077_v14 = vld [vmem:[%s6012_s28 + $0x30] sm:$0xff]  }
0x1942   :  { %4751 = vmatmul.mubr.msk.bf16.vlgmr.msra.gmra.mrb[60].mxu0 %vm711_vm10, %v3334_v30 }
0x1943   :  { %v3545_v31 = vmul.f32 1.442695, %v3544_v39  ;;  %4762 = vmatprep.mubr.msk.bf16.mxu0 %vm5187_vm0, %v5185_v0 }
0x1944   :  { %v3445_v41 = vpop.permute.xlu0 %3444 }
0x1945   :  { %5173 = vpow2.f32 %v3545_v31  ;;  %3224 = vadd.xlane.f32.xlu1 %v3223_v32  ;;  %4761 = vmatpush3.bf16.msra.mxu0 %v3445_v41  ;;  %v4253_v31 = vld [vmem:[%s3985_s13] ss:$0 sm:$0xff] }
0x1946   :  { %4772 = vmatprep.subr.bf16.mxu0 %v5185_v0 }
0x1947   :  { %v5172_v33 = vpop.eup %5171 }
0x1948   :  { %v3439_v34 = vsel %vm3216_vm11, %v5172_v33, 0.0  ;;  %v3443_v35 = vpack.c.bf16 %v5172_v33, %v5172_v33 }
0x1949   :  { %3440 = vadd.xlane.f32.xlu0 %v3439_v34 }
0x194a   :  { %4763 = vmatmul.mubr.msk.bf16.vlgmr.msra.gmra.mrb[64].mxu0 %vm711_vm10, %v3443_v35 }
0x194b   :  { %4773 = vmatpush3.bf16.msra.mxu0 %v3553_v36  ;;  %4774 = vmatprep.mubr.msk.bf16.mxu0 %vm5187_vm0, %v5185_v0 }
0x194c   :  { %4798 = vmatprep.subr.bf16.mxu0 %v5185_v0 }
0x194f   :  { %v5174_v37 = vpop.eup %5173 }
0x1950   :  { %v3547_v38 = vsel %vm3216_vm11, %v5174_v37, 0.0  ;;  %v3551_v40 = vpack.c.bf16 %v5174_v37, %v5174_v37 }
0x1951   :  { %3548 = vadd.xlane.f32.xlu0 %v3547_v38 }
0x1952   :  { %4775 = vmatmul.mubr.msk.bf16.vlgmr.msra.gmra.mrb[68].mxu0 %vm711_vm10, %v3551_v40  ;;  %v70_v40 = vstv %s3989_s19 }
0x1953   :  { %4814 = vmatprep.mubr.msk.bf16.mxu0 %vm5187_vm0, %v5185_v0  ;;  %4799 = vmatpush3.bf16.msra.mxu0 %v5071_v52  ;;  %71 = vst [vmem:[#allocation2] sm:$0x1] %v70_v40 }
0x1954   :  { %4800 = vmatprep.subr.bf16.mxu0 %v5185_v0 }
0x1957   :  { %4801 = vmatpush3.bf16.msra.mxu0 %v5072_v60 }
0x1958   :  { %4802 = vmatprep.subr.bf16.mxu0 %v5185_v0 }
0x195b   :  { %4803 = vmatpush3.bf16.msra.mxu0 %v5073_v11 }
0x195c   :  { %4804 = vmatprep.subr.bf16.mxu0 %v5185_v0 }
0x195f   :  { %4805 = vmatpush3.bf16.msra.mxu0 %v5074_v12 }
0x1960   :  { %4806 = vmatprep.subr.bf16.mxu0 %v5185_v0 }
0x1963   :  { %4807 = vmatpush3.bf16.msra.mxu0 %v5075_v13 }
0x1964   :  { %4808 = vmatprep.subr.bf16.mxu0 %v5185_v0 }
0x1967   :  { %4809 = vmatpush3.bf16.msra.mxu0 %v5076_v63 }
0x1968   :  { %4810 = vmatprep.subr.bf16.mxu0 %v5185_v0 }
0x196b   :  { %4811 = vmatpush3.bf16.msra.mxu0 %v5077_v14 }
0x196c   :  { %4812 = vmatprep.subr.bf16.mxu0 %v5185_v0 }
0x196f   :  { %4813 = vmatpush3.bf16.msra.mxu0 %v5078_v24 }
0x19ce   :  { %v3332_v46 = vpop.xlane.xlu1 %3331 }
0x19cf   :  { %5175 = vrcp.f32 %v3332_v46 }
0x19d2   :  { %v3225_v15 = vpop.xlane.xlu1 %3224 }
0x19d6   :  { %v3441_v48 = vpop.xlane.xlu0 %3440 }
0x19d7   :  { %5177 = vrcp.f32 %v3441_v48 }
0x19d9   :  { %v5176_v51 = vpop.eup %5175 }
0x19de   :  { %v3549_v45 = vpop.xlane.xlu0 %3548 }
0x19df   :  { %5179 = vrcp.f32 %v3549_v45 }
0x19e0   :  { %5181 = vrcp.f32 %v3225_v15 }
0x19e1   :  { %v5178_v61 = vpop.eup %5177 }
0x19e9   :  { %v5180_v8 = vpop.eup %5179 }
0x19ea   :  { %v5182_v16 = vpop.eup %5181 }
0x19eb   :  { %v3271_v62 = vmul.f32 %v5182_v16, %v5959_v2 }
0x1a15   :  { %v3376_v53 = vpop.f32.mrb[60].mxu0 }
0x1a16   :  { %v3382_v56 = vmul.f32 %v5176_v51, %v3376_v53  ;;  %v4752_v57 = vpop.f32.mrb[61].mxu0  ;;  %v4271_v51 = vld [vmem:[#allocation2] ss:$0 sm:$0xff] }
0x1a17   :  { %v3379_v43 = vpop.f32.mrb[62].mxu0 }
0x1a18   :  { %v4753_v58 = vpop.f32.mrb[63].mxu0  ;;  %3600 = vrot.lane.b32.xlu0 %v3382_v56, %s5194_s27 }
0x1a1d   :  { %v3484_v22 = vpop.f32.mrb[64].mxu0 }
0x1a1e   :  { %v3490_v27 = vmul.f32 %v5178_v61, %v3484_v22  ;;  %v4764_v28 = vpop.f32.mrb[65].mxu0 }
0x1a1f   :  { %v3487_v50 = vpop.f32.mrb[66].mxu0 }
0x1a20   :  { %v4765_v7 = vpop.f32.mrb[67].mxu0  ;;  %3604 = vrot.lane.b32.xlu1 %v3490_v27, %s5193_s26  ;;  %s5219_s26 = smov 30  }
0x1a21   :  { %s6040_s8 = sld [smem:[%s6070_s0 + %s5219_s26]]  }
0x1a25   :  { %v3592_v5 = vpop.f32.mrb[68].mxu0 }
0x1a26   :  { %v3598_v9 = vmul.f32 %v5180_v8, %v3592_v5  ;;  %v4776_v10 = vpop.f32.mrb[69].mxu0 }
0x1a27   :  { %v3595_v3 = vpop.f32.mrb[70].mxu0  ;;  %v5079_v2 = vld [vmem:[%s6040_s8] sm:$0xff]   ;;  %v5080_v25 = vld [vmem:[%s6040_s8 + $0x8] sm:$0xff]   ;;  %v5081_v26 = vld [vmem:[%s6040_s8 + $0x10] sm:$0xff]  }
0x1a28   :  { %v4777_v4 = vpop.f32.mrb[71].mxu0  ;;  %3608 = vrot.lane.b32.xlu1 %v3598_v9, %s5196_s2  ;;  %v5082_v29 = vld [vmem:[%s6040_s8 + $0x18] sm:$0xff]   ;;  %v5083_v30 = vld [vmem:[%s6040_s8 + $0x20] sm:$0xff]   ;;  %v5084_v39 = vld [vmem:[%s6040_s8 + $0x28] sm:$0xff]  }
0x1a29   :  { %v5085_v37 = vld [vmem:[%s6040_s8 + $0x30] sm:$0xff]   ;;  %v5086_v38 = vld [vmem:[%s6040_s8 + $0x38] sm:$0xff]  }
0x1a8a   :  { %v3601_v17 = vpop.permute.xlu0 %3600 }
0x1a8b   :  { %v3611_v18 = vsel %vm247_vm7, %v3271_v62, %v3601_v17 }
0x1a92   :  { %v3605_v6 = vpop.permute.xlu1 %3604 }
0x1a93   :  { %v3612_v1 = vsel %vm250_vm9, %v3611_v18, %v3605_v6 }
0x1a9a   :  { %v3609_v21 = vpop.permute.xlu1 %3608 }
0x1a9b   :  { %v3613_v19 = vsel %vm253_vm8, %v3612_v1, %v3609_v21 }
0x1a9c   :  { %v3614_v20 = vpack.c.bf16 %v3613_v19, %v3613_v19 }
0x1a9e   :  { %4795 = vmatmul.mubr.bf16.vlgmr.msra.gmra.mrb[84].mxu1 %v3614_v20 }
0x1a9f   :  { %4834 = vmatprep.mubr.msk.bf16.mxu1 %vm5187_vm0, %v5185_v0  ;;  %4819 = vmatpush3.bf16.msra.mxu1 %v5079_v2 }
0x1aa0   :  { %4820 = vmatprep.subr.bf16.mxu1 %v5185_v0 }
0x1aa3   :  { %4821 = vmatpush3.bf16.msra.mxu1 %v5080_v25 }
0x1aa4   :  { %4822 = vmatprep.subr.bf16.mxu1 %v5185_v0 }
0x1aa7   :  { %4823 = vmatpush3.bf16.msra.mxu1 %v5081_v26 }
0x1aa8   :  { %4824 = vmatprep.subr.bf16.mxu1 %v5185_v0 }
0x1aab   :  { %4825 = vmatpush3.bf16.msra.mxu1 %v5082_v29 }
0x1aac   :  { %4826 = vmatprep.subr.bf16.mxu1 %v5185_v0 }
0x1aaf   :  { %4827 = vmatpush3.bf16.msra.mxu1 %v5083_v30 }
0x1ab0   :  { %4828 = vmatprep.subr.bf16.mxu1 %v5185_v0 }
0x1ab3   :  { %4829 = vmatpush3.bf16.msra.mxu1 %v5084_v39 }
0x1ab4   :  { %4830 = vmatprep.subr.bf16.mxu1 %v5185_v0 }
0x1ab7   :  { %4831 = vmatpush3.bf16.msra.mxu1 %v5085_v37 }
0x1ab8   :  { %4832 = vmatprep.subr.bf16.mxu1 %v5185_v0 }
0x1abb   :  { %4833 = vmatpush3.bf16.msra.mxu1 %v5086_v38 }
0x1b71   :  { %v3720_v41 = vpop.f32.mrb[84].mxu1 }
0x1b72   :  { %v3721_v32 = vadd.f32 %v4253_v31, %v3720_v41  ;;  %v4796_v33 = vpop.f32.mrb[85].mxu1 }
0x1b73   :  { %v3723_v34 = vpop.f32.mrb[86].mxu1 }
0x1b74   :  { %v3726_v35 = vpack.c.bf16 %v3721_v32, %v3721_v32  ;;  %v4797_v36 = vpop.f32.mrb[87].mxu1 }
0x1b76   :  { %4815 = vmatmul.mubr.bf16.vlgmr.msra.gmra.mrb[72].mxu0 %v3726_v35 }
0x1c49   :  { %v3832_v55 = vpop.f32.mrb[72].mxu0 }
0x1c4a   :  { %v3833_v44 = vadd.f32 %v4262_v42, %v3832_v55  ;;  %v4816_v46 = vpop.f32.mrb[73].mxu0 }
0x1c4b   :  { %v3835_v47 = vpop.f32.mrb[74].mxu0 }
0x1c4c   :  { %vm3838_vm12 = vcmp.ge.f32.partialorder %v3833_v44, 0.0  ;;  %v3839_v0 = vmul.f32 0.01, %v3833_v44  ;;  %v4817_v23 = vpop.f32.mrb[75].mxu0 }
0x1c4e   :  { %v3840_v48 = vsel %vm3838_vm12, %v3833_v44, %v3839_v0 }
0x1c4f   :  { %v3841_v49 = vpack.c.bf16 %v3840_v48, %v3840_v48 }
0x1c51   :  { %4835 = vmatmul.mubr.bf16.vlgmr.msra.gmra.mrb[88].mxu1 %v3841_v49 }
0x1d24   :  { %v3947_v53 = vpop.f32.mrb[88].mxu1 }
0x1d25   :  { %v3948_v54 = vadd.f32 %v4271_v51, %v3947_v53  ;;  %v4836_v56 = vpop.f32.mrb[89].mxu1 }
0x1d26   :  { %v3950_v57 = vpop.f32.mrb[90].mxu1 }
0x1d27   :  { %3954 = vst.msk [vmem:[%s3990_s29] sm:$0x3] %vm3953_vm13, %v3948_v54  ;;  %v4837_v43 = vpop.f32.mrb[91].mxu1 }

</bundles_post_ra>
